<compile_context>
chip_gen: v7x
topology: tpu7x:2x2x1
jax: 0.10.0
libtpu: 0.0.40
codegen_flags: <defaults>
</compile_context>

<pallas_src>
import jax
import jax.numpy as jnp
from jax.experimental import pallas as pl
from jax.experimental.pallas import tpu as pltpu

EXPANSION = 4
BN_EPS = 1e-5


def bottleneck_kernel(x_ref, w1_ref, s1_ref, b1_ref,
                      w2_ref, s2_ref, b2_ref,
                      w3_ref, s3_ref, b3_ref,
                      o_ref, hp_ref):
    # x_ref : (1, H, W, CO)  f32, channel-padded, full image resident per batch
    # o_ref : (1, TH, W, CO) f32
    # hp_ref: (TH+2, W+2, CP) bf16 scratch (zero-padded conv1 output tile)
    H, W, CO = x_ref.shape[1], x_ref.shape[2], x_ref.shape[3]
    TH = o_ref.shape[1]
    CP = w1_ref.shape[1]

    h = pl.program_id(1)
    nh = pl.num_programs(1)

    r0 = h * TH
    if TH % 8 == 0:
        r0 = pl.multiple_of(r0, 8)

    # hoist grid-invariant weight / BN loads
    w1 = w1_ref[...]          # (CO, CP) bf16
    s1 = s1_ref[...]          # (1, CP)  f32
    b1 = b1_ref[...]

    def conv1_bn_relu(rows_f32, nrows):
        m = rows_f32.reshape(nrows * W, CO).astype(jnp.bfloat16)
        y = jnp.dot(m, w1, preferred_element_type=jnp.float32)
        y = jnp.maximum(y * s1 + b1, 0.0)
        return y.astype(jnp.bfloat16).reshape(nrows, W, CP)

    # ---- conv1 (1x1) + bn1 + relu, written into zero-padded scratch --------
    hp_ref[...] = jnp.zeros_like(hp_ref)

    xc = x_ref[0, pl.ds(r0, TH)]                              # (TH, W, CO) f32
    hp_ref[1:TH + 1, 1:W + 1, :] = conv1_bn_relu(xc, TH)

    # halo rows (1-row recompute; clamped reads, conditional writes)
    x_top = x_ref[0, pl.ds(jnp.maximum(r0 - 1, 0), 1)]        # (1, W, CO)
    x_bot = x_ref[0, pl.ds(jnp.minimum(r0 + TH, H - 1), 1)]   # (1, W, CO)
    h_top = conv1_bn_relu(x_top, 1)
    h_bot = conv1_bn_relu(x_bot, 1)

    @pl.when(h > 0)
    def _():
        hp_ref[0:1, 1:W + 1, :] = h_top

    @pl.when(h < nh - 1)
    def _():
        hp_ref[TH + 1:TH + 2, 1:W + 1, :] = h_bot

    # ---- conv2 (3x3, stride 1, pad 1) as 9 shifted matmuls + bn2 + relu ----
    acc = None
    for ky in range(3):
        for kx in range(3):
            win = hp_ref[ky:ky + TH, kx:kx + W, :].reshape(TH * W, CP)
            d = jnp.dot(win, w2_ref[ky * 3 + kx],
                        preferred_element_type=jnp.float32)
            acc = d if acc is None else acc + d
    h2 = jnp.maximum(acc * s2_ref[...] + b2_ref[...], 0.0)     # (TH*W, CP) f32

    # ---- conv3 (1x1) + bn3 -------------------------------------------------
    h3 = jnp.dot(h2.astype(jnp.bfloat16), w3_ref[...],
                 preferred_element_type=jnp.float32)
    h3 = h3 * s3_ref[...] + b3_ref[...]                        # (TH*W, CO) f32

    # ---- identity residual (downsample is None) + relu ---------------------
    out = jnp.maximum(h3 + xc.reshape(TH * W, CO), 0.0)
    o_ref[0] = out.reshape(TH, W, CO)


def _round_up(x, m):
    return ((x + m - 1) // m) * m


def bottleneck_forward(x_nchw, params):
    """x_nchw: (N, Cin, H, W) float32.  Returns (N, Cin, H, W) float32."""
    N, Cin, H, W = x_nchw.shape
    P = params['conv1'].shape[0]
    Cout = params['conv3'].shape[0]
    # identity residual path: fail loudly if the config doesn't allow it
    assert Cin == Cout == P * EXPANSION, (
        "Bottleneck with downsample=None/stride=1 requires "
        "inplanes == planes * expansion")

    CP = _round_up(P, 128)       # padded mid channels (lane/MXU width)
    CO = _round_up(Cout, 128)    # padded in/out channels

    TH = 8 if H % 8 == 0 else H  # row tile (1-row halo recomputed per tile)
    HT = H // TH

    # NHWC, channel-padded to CO so the residual add / output are lane-dense.
    x = jnp.transpose(x_nchw, (0, 2, 3, 1)).astype(jnp.float32)
    if CO > Cin:
        x = jnp.pad(x, ((0, 0), (0, 0), (0, 0), (0, CO - Cin)))

    # Conv weights (PyTorch OIHW) -> matmul layouts, zero-padded, bf16.
    w1 = jnp.zeros((CO, CP), jnp.float32).at[:Cin, :P].set(
        jnp.transpose(params['conv1'][:, :, 0, 0], (1, 0))).astype(jnp.bfloat16)
    w2core = jnp.transpose(params['conv2'], (2, 3, 1, 0)).reshape(9, P, P)
    w2 = jnp.zeros((9, CP, CP), jnp.float32).at[:, :P, :P].set(
        w2core).astype(jnp.bfloat16)
    w3 = jnp.zeros((CP, CO), jnp.float32).at[:P, :Cout].set(
        jnp.transpose(params['conv3'][:, :, 0, 0], (1, 0))).astype(jnp.bfloat16)

    def fold_bn_pad(p, cpad):
        gamma, beta, mean, var = p
        s = gamma / jnp.sqrt(var + BN_EPS)
        b = beta - mean * s
        sp = jnp.zeros((1, cpad), jnp.float32).at[0, :s.shape[0]].set(s)
        bp = jnp.zeros((1, cpad), jnp.float32).at[0, :b.shape[0]].set(b)
        return sp, bp

    s1, b1 = fold_bn_pad(params['bn1'], CP)
    s2, b2 = fold_bn_pad(params['bn2'], CP)
    s3, b3 = fold_bn_pad(params['bn3'], CO)

    out = pl.pallas_call(
        bottleneck_kernel,
        out_shape=jax.ShapeDtypeStruct((N, H, W, CO), jnp.float32),
        grid=(N, HT),
        in_specs=[
            # full image resident per batch index (re-used across row tiles)
            pl.BlockSpec((1, H, W, CO), lambda n, h: (n, 0, 0, 0)),
            pl.BlockSpec((CO, CP), lambda n, h: (0, 0)),
            pl.BlockSpec((1, CP), lambda n, h: (0, 0)),
            pl.BlockSpec((1, CP), lambda n, h: (0, 0)),
            pl.BlockSpec((9, CP, CP), lambda n, h: (0, 0, 0)),
            pl.BlockSpec((1, CP), lambda n, h: (0, 0)),
            pl.BlockSpec((1, CP), lambda n, h: (0, 0)),
            pl.BlockSpec((CP, CO), lambda n, h: (0, 0)),
            pl.BlockSpec((1, CO), lambda n, h: (0, 0)),
            pl.BlockSpec((1, CO), lambda n, h: (0, 0)),
        ],
        out_specs=pl.BlockSpec((1, TH, W, CO), lambda n, h: (n, h, 0, 0)),
        scratch_shapes=[pltpu.VMEM((TH + 2, W + 2, CP), jnp.bfloat16)],
        compiler_params=pltpu.CompilerParams(
            dimension_semantics=("parallel", "parallel"),
            vmem_limit_bytes=32 * 1024 * 1024),
    )(x, w1, s1, b1, w2, s2, b2, w3, s3, b3)

    out = out[..., :Cout]                       # drop channel padding
    return jnp.transpose(out, (0, 3, 1, 2))     # back to NCHW


# ---------------- pure-JAX reference (NCHW, PyTorch eval mode) ---------------

def reference_forward(x, params):
    def conv(x, w, padding=0):
        return jax.lax.conv_general_dilated(
            x, w, (1, 1), [(padding, padding)] * 2,
            dimension_numbers=('NCHW', 'OIHW', 'NCHW'))

    def bn(x, p):
        gamma, beta, mean, var = p
        s = gamma / jnp.sqrt(var + BN_EPS)
        b = beta - mean * s
        return x * s[None, :, None, None] + b[None, :, None, None]

    out = jax.nn.relu(bn(conv(x, params['conv1']), params['bn1']))
    out = jax.nn.relu(bn(conv(out, params['conv2'], padding=1), params['bn2']))
    out = bn(conv(out, params['conv3']), params['bn3'])
    return jax.nn.relu(out + x)


# ---------------------------------- main -------------------------------------

if __name__ == "__main__":
    # inplanes=32, planes=8 (planes*4 == inplanes => identity residual),
    # spatial 16x16 (=> 2 row tiles of 8, exercising both halo paths), batch 2.
    N, inplanes, planes, H, W = 2, 32, 8, 16, 16
    cout = planes * EXPANSION

    key = jax.random.PRNGKey(0)
    ks = jax.random.split(key, 16)

    def bn_params(k, c):
        k1, k2, k3, k4 = jax.random.split(k, 4)
        gamma = jax.random.uniform(k1, (c,), jnp.float32, 0.5, 1.5)
        beta = 0.1 * jax.random.normal(k2, (c,), jnp.float32)
        mean = 0.1 * jax.random.normal(k3, (c,), jnp.float32)
        var = jax.random.uniform(k4, (c,), jnp.float32, 0.5, 1.5)
        return (gamma, beta, mean, var)

    params = {
        'conv1': 0.1 * jax.random.normal(ks[0], (planes, inplanes, 1, 1), jnp.float32),
        'bn1': bn_params(ks[1], planes),
        'conv2': 0.1 * jax.random.normal(ks[2], (planes, planes, 3, 3), jnp.float32),
        'bn2': bn_params(ks[3], planes),
        'conv3': 0.1 * jax.random.normal(ks[4], (cout, planes, 1, 1), jnp.float32),
        'bn3': bn_params(ks[5], cout),
    }

    x = jax.random.normal(ks[6], (N, inplanes, H, W), jnp.float32)

    out = jax.block_until_ready(bottleneck_forward(x, params))
    ref = jax.block_until_ready(reference_forward(x, params))

    assert out.shape == ref.shape == (N, cout, H, W)
    # bf16 matmul operands (f32 accumulate) vs a pure-f32 reference: use a
    # bf16-appropriate tolerance.
    if not jnp.allclose(out, ref, atol=5e-2, rtol=5e-2):
        max_err = float(jnp.max(jnp.abs(out - ref)))
        raise AssertionError(f"Pallas kernel mismatch vs reference, max_err={max_err}")

    # TODO(synk): BatchNorm is implemented in eval mode (folded running stats);
    # PyTorch's default training-mode batch statistics are not reproduced.
    print("KERNEL_OK")
</pallas_src>

<mosaic_0001>
module attributes {stable_mosaic.version = 11 : i64} {
  func.func @bottleneck_kernel(%arg0: i32, %arg1: i32, %arg2: memref<1x16x16x128xf32, #tpu.memory_space<vmem>>, %arg3: memref<128x128xbf16, #tpu.memory_space<vmem>>, %arg4: memref<1x128xf32, #tpu.memory_space<vmem>>, %arg5: memref<1x128xf32, #tpu.memory_space<vmem>>, %arg6: memref<9x128x128xbf16, #tpu.memory_space<vmem>>, %arg7: memref<1x128xf32, #tpu.memory_space<vmem>>, %arg8: memref<1x128xf32, #tpu.memory_space<vmem>>, %arg9: memref<128x128xbf16, #tpu.memory_space<vmem>>, %arg10: memref<1x128xf32, #tpu.memory_space<vmem>>, %arg11: memref<1x128xf32, #tpu.memory_space<vmem>>, %arg12: memref<1x8x16x128xf32, #tpu.memory_space<vmem>>, %arg13: memref<10x18x128xbf16, #tpu.memory_space<vmem>>) attributes {dimension_semantics = [#tpu.dimension_semantics<parallel>, #tpu.dimension_semantics<parallel>], iteration_bounds = array<i64: 2, 2>, scalar_prefetch = 0 : i64, scratch_operands = 1 : i64, tpu.core_type = #tpu.core_type<tc>, window_params = [{transform_indices = @transform_0, window_bounds = array<i64: 1, 16, 16, 128>}, {pipeline_mode = #tpu.pipeline_mode<synchronous>, transform_indices = @transform_1, window_bounds = array<i64: 128, 128>}, {pipeline_mode = #tpu.pipeline_mode<synchronous>, transform_indices = @transform_2, window_bounds = array<i64: 1, 128>}, {pipeline_mode = #tpu.pipeline_mode<synchronous>, transform_indices = @transform_3, window_bounds = array<i64: 1, 128>}, {pipeline_mode = #tpu.pipeline_mode<synchronous>, transform_indices = @transform_4, window_bounds = array<i64: 9, 128, 128>}, {pipeline_mode = #tpu.pipeline_mode<synchronous>, transform_indices = @transform_5, window_bounds = array<i64: 1, 128>}, {pipeline_mode = #tpu.pipeline_mode<synchronous>, transform_indices = @transform_6, window_bounds = array<i64: 1, 128>}, {pipeline_mode = #tpu.pipeline_mode<synchronous>, transform_indices = @transform_7, window_bounds = array<i64: 128, 128>}, {pipeline_mode = #tpu.pipeline_mode<synchronous>, transform_indices = @transform_8, window_bounds = array<i64: 1, 128>}, {pipeline_mode = #tpu.pipeline_mode<synchronous>, transform_indices = @transform_9, window_bounds = array<i64: 1, 128>}, {transform_indices = @transform_10, window_bounds = array<i64: 1, 8, 16, 128>}]} {
    %c8_i32 = arith.constant 8 : i32
    %0 = arith.muli %arg1, %c8_i32 : i32
    %1 = tpu.assume_multiple %0, 8 : i32
    %c0 = arith.constant 0 : index
    %c0_0 = arith.constant 0 : index
    %2 = vector.load %arg3[%c0, %c0_0] : memref<128x128xbf16, #tpu.memory_space<vmem>>, vector<128x128xbf16>
    %c0_1 = arith.constant 0 : index
    %c0_2 = arith.constant 0 : index
    %3 = vector.load %arg4[%c0_1, %c0_2] : memref<1x128xf32, #tpu.memory_space<vmem>>, vector<1x128xf32>
    %c0_3 = arith.constant 0 : index
    %c0_4 = arith.constant 0 : index
    %4 = vector.load %arg5[%c0_3, %c0_4] : memref<1x128xf32, #tpu.memory_space<vmem>>, vector<1x128xf32>
    %cst = arith.constant 0.000000e+00 : bf16
    %5 = vector.broadcast %cst : bf16 to vector<10x18x128xbf16>
    %c0_5 = arith.constant 0 : index
    %c0_6 = arith.constant 0 : index
    %c0_7 = arith.constant 0 : index
    %6 = vector.load %arg13[%c0_5, %c0_6, %c0_7] : memref<10x18x128xbf16, #tpu.memory_space<vmem>>, vector<10x18x128xbf16>
    tpu.vector_store %arg13[%c0_5, %c0_6, %c0_7], %5 {strides = array<i32>} : memref<10x18x128xbf16, #tpu.memory_space<vmem>>, vector<10x18x128xbf16>,
    %c0_8 = arith.constant 0 : index
    %7 = arith.index_cast %1 : i32 to index
    %c0_9 = arith.constant 0 : index
    %c0_10 = arith.constant 0 : index
    %8 = vector.load %arg2[%c0_8, %7, %c0_9, %c0_10] : memref<1x16x16x128xf32, #tpu.memory_space<vmem>>, vector<1x8x16x128xf32>
    %9 = vector.shape_cast %8 : vector<1x8x16x128xf32> to vector<8x16x128xf32>
    %10 = vector.shape_cast %9 : vector<8x16x128xf32> to vector<128x128xf32>
    %11 = arith.truncf %10 : vector<128x128xf32> to vector<128x128xbf16>
    %cst_11 = arith.constant dense<0.000000e+00> : vector<128x128xf32>
    %12 = tpu.matmul %11, %2, %cst_11 {dimension_numbers = #tpu.dot_dimension_numbers<[1], [0], [0], [1], [0, 0, 1, 1], [], []>} : vector<128x128xbf16>, vector<128x128xbf16>, vector<128x128xf32> -> vector<128x128xf32>
    %13 = vector.broadcast %3 : vector<1x128xf32> to vector<128x128xf32>
    %14 = arith.mulf %12, %13 : vector<128x128xf32>
    %15 = vector.broadcast %4 : vector<1x128xf32> to vector<128x128xf32>
    %16 = arith.addf %14, %15 : vector<128x128xf32>
    %cst_12 = arith.constant 0.000000e+00 : f32
    %17 = vector.broadcast %cst_12 : f32 to vector<128x128xf32>
    %18 = arith.maximumf %16, %17 : vector<128x128xf32>
    %19 = arith.truncf %18 : vector<128x128xf32> to vector<128x128xbf16>
    %20 = vector.shape_cast %19 : vector<128x128xbf16> to vector<8x16x128xbf16>
    %c1 = arith.constant 1 : index
    %c1_13 = arith.constant 1 : index
    %c0_14 = arith.constant 0 : index
    %21 = vector.load %arg13[%c1, %c1_13, %c0_14] : memref<10x18x128xbf16, #tpu.memory_space<vmem>>, vector<8x16x128xbf16>
    tpu.vector_store %arg13[%c1, %c1_13, %c0_14], %20 {strides = array<i32>} : memref<10x18x128xbf16, #tpu.memory_space<vmem>>, vector<8x16x128xbf16>,
    %c1_i32 = arith.constant 1 : i32
    %22 = arith.subi %1, %c1_i32 : i32
    %c0_i32 = arith.constant 0 : i32
    %23 = arith.maxsi %22, %c0_i32 : i32
    %c0_15 = arith.constant 0 : index
    %24 = arith.index_cast %23 : i32 to index
    %c0_16 = arith.constant 0 : index
    %c0_17 = arith.constant 0 : index
    %25 = vector.load %arg2[%c0_15, %24, %c0_16, %c0_17] : memref<1x16x16x128xf32, #tpu.memory_space<vmem>>, vector<1x1x16x128xf32>
    %26 = vector.shape_cast %25 : vector<1x1x16x128xf32> to vector<1x16x128xf32>
    %c8_i32_18 = arith.constant 8 : i32
    %27 = arith.addi %1, %c8_i32_18 : i32
    %c15_i32 = arith.constant 15 : i32
    %28 = arith.minsi %27, %c15_i32 : i32
    %c0_19 = arith.constant 0 : index
    %29 = arith.index_cast %28 : i32 to index
    %c0_20 = arith.constant 0 : index
    %c0_21 = arith.constant 0 : index
    %30 = vector.load %arg2[%c0_19, %29, %c0_20, %c0_21] : memref<1x16x16x128xf32, #tpu.memory_space<vmem>>, vector<1x1x16x128xf32>
    %31 = vector.shape_cast %30 : vector<1x1x16x128xf32> to vector<1x16x128xf32>
    %32 = vector.shape_cast %26 : vector<1x16x128xf32> to vector<16x128xf32>
    %33 = arith.truncf %32 : vector<16x128xf32> to vector<16x128xbf16>
    %cst_22 = arith.constant dense<0.000000e+00> : vector<16x128xf32>
    %34 = tpu.matmul %33, %2, %cst_22 {dimension_numbers = #tpu.dot_dimension_numbers<[1], [0], [0], [1], [0, 0, 1, 1], [], []>} : vector<16x128xbf16>, vector<128x128xbf16>, vector<16x128xf32> -> vector<16x128xf32>
    %35 = vector.broadcast %3 : vector<1x128xf32> to vector<16x128xf32>
    %36 = arith.mulf %34, %35 : vector<16x128xf32>
    %37 = vector.broadcast %4 : vector<1x128xf32> to vector<16x128xf32>
    %38 = arith.addf %36, %37 : vector<16x128xf32>
    %cst_23 = arith.constant 0.000000e+00 : f32
    %39 = vector.broadcast %cst_23 : f32 to vector<16x128xf32>
    %40 = arith.maximumf %38, %39 : vector<16x128xf32>
    %41 = arith.truncf %40 : vector<16x128xf32> to vector<16x128xbf16>
    %42 = vector.shape_cast %41 : vector<16x128xbf16> to vector<1x16x128xbf16>
    %43 = vector.shape_cast %31 : vector<1x16x128xf32> to vector<16x128xf32>
    %44 = arith.truncf %43 : vector<16x128xf32> to vector<16x128xbf16>
    %cst_24 = arith.constant dense<0.000000e+00> : vector<16x128xf32>
    %45 = tpu.matmul %44, %2, %cst_24 {dimension_numbers = #tpu.dot_dimension_numbers<[1], [0], [0], [1], [0, 0, 1, 1], [], []>} : vector<16x128xbf16>, vector<128x128xbf16>, vector<16x128xf32> -> vector<16x128xf32>
    %46 = vector.broadcast %3 : vector<1x128xf32> to vector<16x128xf32>
    %47 = arith.mulf %45, %46 : vector<16x128xf32>
    %48 = vector.broadcast %4 : vector<1x128xf32> to vector<16x128xf32>
    %49 = arith.addf %47, %48 : vector<16x128xf32>
    %cst_25 = arith.constant 0.000000e+00 : f32
    %50 = vector.broadcast %cst_25 : f32 to vector<16x128xf32>
    %51 = arith.maximumf %49, %50 : vector<16x128xf32>
    %52 = arith.truncf %51 : vector<16x128xf32> to vector<16x128xbf16>
    %53 = vector.shape_cast %52 : vector<16x128xbf16> to vector<1x16x128xbf16>
    %c0_i32_26 = arith.constant 0 : i32
    %54 = arith.cmpi sgt, %arg1, %c0_i32_26 : i32
    %55 = arith.extui %54 : i1 to i32
    %c0_i32_27 = arith.constant 0 : i32
    %56 = arith.cmpi ne, %55, %c0_i32_27 : i32
    scf.if %56 {
      %c0_103 = arith.constant 0 : index
      %c1_104 = arith.constant 1 : index
      %c0_105 = arith.constant 0 : index
      %138 = vector.load %arg13[%c0_103, %c1_104, %c0_105] : memref<10x18x128xbf16, #tpu.memory_space<vmem>>, vector<1x16x128xbf16>
      tpu.vector_store %arg13[%c0_103, %c1_104, %c0_105], %42 {strides = array<i32>} : memref<10x18x128xbf16, #tpu.memory_space<vmem>>, vector<1x16x128xbf16>,
    } else {
    }
    %c1_i32_28 = arith.constant 1 : i32
    %57 = arith.cmpi slt, %arg1, %c1_i32_28 : i32
    %58 = arith.extui %57 : i1 to i32
    %c0_i32_29 = arith.constant 0 : i32
    %59 = arith.cmpi ne, %58, %c0_i32_29 : i32
    scf.if %59 {
      %c9 = arith.constant 9 : index
      %c1_103 = arith.constant 1 : index
      %c0_104 = arith.constant 0 : index
      %138 = vector.load %arg13[%c9, %c1_103, %c0_104] : memref<10x18x128xbf16, #tpu.memory_space<vmem>>, vector<1x16x128xbf16>
      tpu.vector_store %arg13[%c9, %c1_103, %c0_104], %53 {strides = array<i32>} : memref<10x18x128xbf16, #tpu.memory_space<vmem>>, vector<1x16x128xbf16>,
    } else {
    }
    %c0_30 = arith.constant 0 : index
    %c0_31 = arith.constant 0 : index
    %c0_32 = arith.constant 0 : index
    %60 = vector.load %arg13[%c0_30, %c0_31, %c0_32] : memref<10x18x128xbf16, #tpu.memory_space<vmem>>, vector<8x16x128xbf16>
    %61 = vector.shape_cast %60 : vector<8x16x128xbf16> to vector<128x128xbf16>
    %c0_33 = arith.constant 0 : index
    %c0_34 = arith.constant 0 : index
    %c0_35 = arith.constant 0 : index
    %62 = vector.load %arg6[%c0_33, %c0_34, %c0_35] : memref<9x128x128xbf16, #tpu.memory_space<vmem>>, vector<1x128x128xbf16>
    %63 = vector.shape_cast %62 : vector<1x128x128xbf16> to vector<128x128xbf16>
    %cst_36 = arith.constant dense<0.000000e+00> : vector<128x128xf32>
    %64 = tpu.matmul %61, %63, %cst_36 {dimension_numbers = #tpu.dot_dimension_numbers<[1], [0], [0], [1], [0, 0, 1, 1], [], []>} : vector<128x128xbf16>, vector<128x128xbf16>, vector<128x128xf32> -> vector<128x128xf32>
    %c0_37 = arith.constant 0 : index
    %c1_38 = arith.constant 1 : index
    %c0_39 = arith.constant 0 : index
    %65 = vector.load %arg13[%c0_37, %c1_38, %c0_39] : memref<10x18x128xbf16, #tpu.memory_space<vmem>>, vector<8x16x128xbf16>
    %66 = vector.shape_cast %65 : vector<8x16x128xbf16> to vector<128x128xbf16>
    %c1_40 = arith.constant 1 : index
    %c0_41 = arith.constant 0 : index
    %c0_42 = arith.constant 0 : index
    %67 = vector.load %arg6[%c1_40, %c0_41, %c0_42] : memref<9x128x128xbf16, #tpu.memory_space<vmem>>, vector<1x128x128xbf16>
    %68 = vector.shape_cast %67 : vector<1x128x128xbf16> to vector<128x128xbf16>
    %cst_43 = arith.constant dense<0.000000e+00> : vector<128x128xf32>
    %69 = tpu.matmul %66, %68, %cst_43 {dimension_numbers = #tpu.dot_dimension_numbers<[1], [0], [0], [1], [0, 0, 1, 1], [], []>} : vector<128x128xbf16>, vector<128x128xbf16>, vector<128x128xf32> -> vector<128x128xf32>
    %70 = arith.addf %64, %69 : vector<128x128xf32>
    %c0_44 = arith.constant 0 : index
    %c2 = arith.constant 2 : index
    %c0_45 = arith.constant 0 : index
    %71 = vector.load %arg13[%c0_44, %c2, %c0_45] : memref<10x18x128xbf16, #tpu.memory_space<vmem>>, vector<8x16x128xbf16>
    %72 = vector.shape_cast %71 : vector<8x16x128xbf16> to vector<128x128xbf16>
    %c2_46 = arith.constant 2 : index
    %c0_47 = arith.constant 0 : index
    %c0_48 = arith.constant 0 : index
    %73 = vector.load %arg6[%c2_46, %c0_47, %c0_48] : memref<9x128x128xbf16, #tpu.memory_space<vmem>>, vector<1x128x128xbf16>
    %74 = vector.shape_cast %73 : vector<1x128x128xbf16> to vector<128x128xbf16>
    %cst_49 = arith.constant dense<0.000000e+00> : vector<128x128xf32>
    %75 = tpu.matmul %72, %74, %cst_49 {dimension_numbers = #tpu.dot_dimension_numbers<[1], [0], [0], [1], [0, 0, 1, 1], [], []>} : vector<128x128xbf16>, vector<128x128xbf16>, vector<128x128xf32> -> vector<128x128xf32>
    %76 = arith.addf %70, %75 : vector<128x128xf32>
    %c1_50 = arith.constant 1 : index
    %c0_51 = arith.constant 0 : index
    %c0_52 = arith.constant 0 : index
    %77 = vector.load %arg13[%c1_50, %c0_51, %c0_52] : memref<10x18x128xbf16, #tpu.memory_space<vmem>>, vector<8x16x128xbf16>
    %78 = vector.shape_cast %77 : vector<8x16x128xbf16> to vector<128x128xbf16>
    %c3 = arith.constant 3 : index
    %c0_53 = arith.constant 0 : index
    %c0_54 = arith.constant 0 : index
    %79 = vector.load %arg6[%c3, %c0_53, %c0_54] : memref<9x128x128xbf16, #tpu.memory_space<vmem>>, vector<1x128x128xbf16>
    %80 = vector.shape_cast %79 : vector<1x128x128xbf16> to vector<128x128xbf16>
    %cst_55 = arith.constant dense<0.000000e+00> : vector<128x128xf32>
    %81 = tpu.matmul %78, %80, %cst_55 {dimension_numbers = #tpu.dot_dimension_numbers<[1], [0], [0], [1], [0, 0, 1, 1], [], []>} : vector<128x128xbf16>, vector<128x128xbf16>, vector<128x128xf32> -> vector<128x128xf32>
    %82 = arith.addf %76, %81 : vector<128x128xf32>
    %c1_56 = arith.constant 1 : index
    %c1_57 = arith.constant 1 : index
    %c0_58 = arith.constant 0 : index
    %83 = vector.load %arg13[%c1_56, %c1_57, %c0_58] : memref<10x18x128xbf16, #tpu.memory_space<vmem>>, vector<8x16x128xbf16>
    %84 = vector.shape_cast %83 : vector<8x16x128xbf16> to vector<128x128xbf16>
    %c4 = arith.constant 4 : index
    %c0_59 = arith.constant 0 : index
    %c0_60 = arith.constant 0 : index
    %85 = vector.load %arg6[%c4, %c0_59, %c0_60] : memref<9x128x128xbf16, #tpu.memory_space<vmem>>, vector<1x128x128xbf16>
    %86 = vector.shape_cast %85 : vector<1x128x128xbf16> to vector<128x128xbf16>
    %cst_61 = arith.constant dense<0.000000e+00> : vector<128x128xf32>
    %87 = tpu.matmul %84, %86, %cst_61 {dimension_numbers = #tpu.dot_dimension_numbers<[1], [0], [0], [1], [0, 0, 1, 1], [], []>} : vector<128x128xbf16>, vector<128x128xbf16>, vector<128x128xf32> -> vector<128x128xf32>
    %88 = arith.addf %82, %87 : vector<128x128xf32>
    %c1_62 = arith.constant 1 : index
    %c2_63 = arith.constant 2 : index
    %c0_64 = arith.constant 0 : index
    %89 = vector.load %arg13[%c1_62, %c2_63, %c0_64] : memref<10x18x128xbf16, #tpu.memory_space<vmem>>, vector<8x16x128xbf16>
    %90 = vector.shape_cast %89 : vector<8x16x128xbf16> to vector<128x128xbf16>
    %c5 = arith.constant 5 : index
    %c0_65 = arith.constant 0 : index
    %c0_66 = arith.constant 0 : index
    %91 = vector.load %arg6[%c5, %c0_65, %c0_66] : memref<9x128x128xbf16, #tpu.memory_space<vmem>>, vector<1x128x128xbf16>
    %92 = vector.shape_cast %91 : vector<1x128x128xbf16> to vector<128x128xbf16>
    %cst_67 = arith.constant dense<0.000000e+00> : vector<128x128xf32>
    %93 = tpu.matmul %90, %92, %cst_67 {dimension_numbers = #tpu.dot_dimension_numbers<[1], [0], [0], [1], [0, 0, 1, 1], [], []>} : vector<128x128xbf16>, vector<128x128xbf16>, vector<128x128xf32> -> vector<128x128xf32>
    %94 = arith.addf %88, %93 : vector<128x128xf32>
    %c2_68 = arith.constant 2 : index
    %c0_69 = arith.constant 0 : index
    %c0_70 = arith.constant 0 : index
    %95 = vector.load %arg13[%c2_68, %c0_69, %c0_70] : memref<10x18x128xbf16, #tpu.memory_space<vmem>>, vector<8x16x128xbf16>
    %96 = vector.shape_cast %95 : vector<8x16x128xbf16> to vector<128x128xbf16>
    %c6 = arith.constant 6 : index
    %c0_71 = arith.constant 0 : index
    %c0_72 = arith.constant 0 : index
    %97 = vector.load %arg6[%c6, %c0_71, %c0_72] : memref<9x128x128xbf16, #tpu.memory_space<vmem>>, vector<1x128x128xbf16>
    %98 = vector.shape_cast %97 : vector<1x128x128xbf16> to vector<128x128xbf16>
    %cst_73 = arith.constant dense<0.000000e+00> : vector<128x128xf32>
    %99 = tpu.matmul %96, %98, %cst_73 {dimension_numbers = #tpu.dot_dimension_numbers<[1], [0], [0], [1], [0, 0, 1, 1], [], []>} : vector<128x128xbf16>, vector<128x128xbf16>, vector<128x128xf32> -> vector<128x128xf32>
    %100 = arith.addf %94, %99 : vector<128x128xf32>
    %c2_74 = arith.constant 2 : index
    %c1_75 = arith.constant 1 : index
    %c0_76 = arith.constant 0 : index
    %101 = vector.load %arg13[%c2_74, %c1_75, %c0_76] : memref<10x18x128xbf16, #tpu.memory_space<vmem>>, vector<8x16x128xbf16>
    %102 = vector.shape_cast %101 : vector<8x16x128xbf16> to vector<128x128xbf16>
    %c7 = arith.constant 7 : index
    %c0_77 = arith.constant 0 : index
    %c0_78 = arith.constant 0 : index
    %103 = vector.load %arg6[%c7, %c0_77, %c0_78] : memref<9x128x128xbf16, #tpu.memory_space<vmem>>, vector<1x128x128xbf16>
    %104 = vector.shape_cast %103 : vector<1x128x128xbf16> to vector<128x128xbf16>
    %cst_79 = arith.constant dense<0.000000e+00> : vector<128x128xf32>
    %105 = tpu.matmul %102, %104, %cst_79 {dimension_numbers = #tpu.dot_dimension_numbers<[1], [0], [0], [1], [0, 0, 1, 1], [], []>} : vector<128x128xbf16>, vector<128x128xbf16>, vector<128x128xf32> -> vector<128x128xf32>
    %106 = arith.addf %100, %105 : vector<128x128xf32>
    %c2_80 = arith.constant 2 : index
    %c2_81 = arith.constant 2 : index
    %c0_82 = arith.constant 0 : index
    %107 = vector.load %arg13[%c2_80, %c2_81, %c0_82] : memref<10x18x128xbf16, #tpu.memory_space<vmem>>, vector<8x16x128xbf16>
    %108 = vector.shape_cast %107 : vector<8x16x128xbf16> to vector<128x128xbf16>
    %c8 = arith.constant 8 : index
    %c0_83 = arith.constant 0 : index
    %c0_84 = arith.constant 0 : index
    %109 = vector.load %arg6[%c8, %c0_83, %c0_84] : memref<9x128x128xbf16, #tpu.memory_space<vmem>>, vector<1x128x128xbf16>
    %110 = vector.shape_cast %109 : vector<1x128x128xbf16> to vector<128x128xbf16>
    %cst_85 = arith.constant dense<0.000000e+00> : vector<128x128xf32>
    %111 = tpu.matmul %108, %110, %cst_85 {dimension_numbers = #tpu.dot_dimension_numbers<[1], [0], [0], [1], [0, 0, 1, 1], [], []>} : vector<128x128xbf16>, vector<128x128xbf16>, vector<128x128xf32> -> vector<128x128xf32>
    %112 = arith.addf %106, %111 : vector<128x128xf32>
    %c0_86 = arith.constant 0 : index
    %c0_87 = arith.constant 0 : index
    %113 = vector.load %arg7[%c0_86, %c0_87] : memref<1x128xf32, #tpu.memory_space<vmem>>, vector<1x128xf32>
    %114 = vector.broadcast %113 : vector<1x128xf32> to vector<128x128xf32>
    %115 = arith.mulf %112, %114 : vector<128x128xf32>
    %c0_88 = arith.constant 0 : index
    %c0_89 = arith.constant 0 : index
    %116 = vector.load %arg8[%c0_88, %c0_89] : memref<1x128xf32, #tpu.memory_space<vmem>>, vector<1x128xf32>
    %117 = vector.broadcast %116 : vector<1x128xf32> to vector<128x128xf32>
    %118 = arith.addf %115, %117 : vector<128x128xf32>
    %cst_90 = arith.constant 0.000000e+00 : f32
    %119 = vector.broadcast %cst_90 : f32 to vector<128x128xf32>
    %120 = arith.maximumf %118, %119 : vector<128x128xf32>
    %121 = arith.truncf %120 : vector<128x128xf32> to vector<128x128xbf16>
    %c0_91 = arith.constant 0 : index
    %c0_92 = arith.constant 0 : index
    %122 = vector.load %arg9[%c0_91, %c0_92] : memref<128x128xbf16, #tpu.memory_space<vmem>>, vector<128x128xbf16>
    %cst_93 = arith.constant dense<0.000000e+00> : vector<128x128xf32>
    %123 = tpu.matmul %121, %122, %cst_93 {dimension_numbers = #tpu.dot_dimension_numbers<[1], [0], [0], [1], [0, 0, 1, 1], [], []>} : vector<128x128xbf16>, vector<128x128xbf16>, vector<128x128xf32> -> vector<128x128xf32>
    %c0_94 = arith.constant 0 : index
    %c0_95 = arith.constant 0 : index
    %124 = vector.load %arg10[%c0_94, %c0_95] : memref<1x128xf32, #tpu.memory_space<vmem>>, vector<1x128xf32>
    %125 = vector.broadcast %124 : vector<1x128xf32> to vector<128x128xf32>
    %126 = arith.mulf %123, %125 : vector<128x128xf32>
    %c0_96 = arith.constant 0 : index
    %c0_97 = arith.constant 0 : index
    %127 = vector.load %arg11[%c0_96, %c0_97] : memref<1x128xf32, #tpu.memory_space<vmem>>, vector<1x128xf32>
    %128 = vector.broadcast %127 : vector<1x128xf32> to vector<128x128xf32>
    %129 = arith.addf %126, %128 : vector<128x128xf32>
    %130 = vector.shape_cast %9 : vector<8x16x128xf32> to vector<128x128xf32>
    %131 = arith.addf %129, %130 : vector<128x128xf32>
    %cst_98 = arith.constant 0.000000e+00 : f32
    %132 = vector.broadcast %cst_98 : f32 to vector<128x128xf32>
    %133 = arith.maximumf %131, %132 : vector<128x128xf32>
    %134 = vector.shape_cast %133 : vector<128x128xf32> to vector<8x16x128xf32>
    %c0_99 = arith.constant 0 : index
    %c0_100 = arith.constant 0 : index
    %c0_101 = arith.constant 0 : index
    %c0_102 = arith.constant 0 : index
    %135 = vector.load %arg12[%c0_99, %c0_100, %c0_101, %c0_102] : memref<1x8x16x128xf32, #tpu.memory_space<vmem>>, vector<1x8x16x128xf32>
    %136 = vector.shape_cast %135 : vector<1x8x16x128xf32> to vector<8x16x128xf32>
    %137 = vector.shape_cast %134 : vector<8x16x128xf32> to vector<1x8x16x128xf32>
    tpu.vector_store %arg12[%c0_99, %c0_100, %c0_101, %c0_102], %137 {strides = array<i32>} : memref<1x8x16x128xf32, #tpu.memory_space<vmem>>, vector<1x8x16x128xf32>,
    return
  }
  func.func @transform_0(%arg0: i32, %arg1: i32) -> (i32, i32, i32, i32) {
    %c0_i32 = arith.constant 0 : i32
    %c0_i32_0 = arith.constant 0 : i32
    %c0_i32_1 = arith.constant 0 : i32
    %c0_i32_2 = arith.constant 0 : i32
    return %arg0, %c0_i32, %c0_i32_0, %c0_i32_1 : i32, i32, i32, i32
  }
  func.func @transform_1(%arg0: i32, %arg1: i32) -> (i32, i32) {
    %c0_i32 = arith.constant 0 : i32
    %c0_i32_0 = arith.constant 0 : i32
    %c0_i32_1 = arith.constant 0 : i32
    return %c0_i32, %c0_i32_0 : i32, i32
  }
  func.func @transform_2(%arg0: i32, %arg1: i32) -> (i32, i32) {
    %c0_i32 = arith.constant 0 : i32
    %c0_i32_0 = arith.constant 0 : i32
    %c0_i32_1 = arith.constant 0 : i32
    return %c0_i32, %c0_i32_0 : i32, i32
  }
  func.func @transform_3(%arg0: i32, %arg1: i32) -> (i32, i32) {
    %c0_i32 = arith.constant 0 : i32
    %c0_i32_0 = arith.constant 0 : i32
    %c0_i32_1 = arith.constant 0 : i32
    return %c0_i32, %c0_i32_0 : i32, i32
  }
  func.func @transform_4(%arg0: i32, %arg1: i32) -> (i32, i32, i32) {
    %c0_i32 = arith.constant 0 : i32
    %c0_i32_0 = arith.constant 0 : i32
    %c0_i32_1 = arith.constant 0 : i32
    %c0_i32_2 = arith.constant 0 : i32
    return %c0_i32, %c0_i32_0, %c0_i32_1 : i32, i32, i32
  }
  func.func @transform_5(%arg0: i32, %arg1: i32) -> (i32, i32) {
    %c0_i32 = arith.constant 0 : i32
    %c0_i32_0 = arith.constant 0 : i32
    %c0_i32_1 = arith.constant 0 : i32
    return %c0_i32, %c0_i32_0 : i32, i32
  }
  func.func @transform_6(%arg0: i32, %arg1: i32) -> (i32, i32) {
    %c0_i32 = arith.constant 0 : i32
    %c0_i32_0 = arith.constant 0 : i32
    %c0_i32_1 = arith.constant 0 : i32
    return %c0_i32, %c0_i32_0 : i32, i32
  }
  func.func @transform_7(%arg0: i32, %arg1: i32) -> (i32, i32) {
    %c0_i32 = arith.constant 0 : i32
    %c0_i32_0 = arith.constant 0 : i32
    %c0_i32_1 = arith.constant 0 : i32
    return %c0_i32, %c0_i32_0 : i32, i32
  }
  func.func @transform_8(%arg0: i32, %arg1: i32) -> (i32, i32) {
    %c0_i32 = arith.constant 0 : i32
    %c0_i32_0 = arith.constant 0 : i32
    %c0_i32_1 = arith.constant 0 : i32
    return %c0_i32, %c0_i32_0 : i32, i32
  }
  func.func @transform_9(%arg0: i32, %arg1: i32) -> (i32, i32) {
    %c0_i32 = arith.constant 0 : i32
    %c0_i32_0 = arith.constant 0 : i32
    %c0_i32_1 = arith.constant 0 : i32
    return %c0_i32, %c0_i32_0 : i32, i32
  }
  func.func @transform_10(%arg0: i32, %arg1: i32) -> (i32, i32, i32, i32) {
    %c0_i32 = arith.constant 0 : i32
    %c0_i32_0 = arith.constant 0 : i32
    %c0_i32_1 = arith.constant 0 : i32
    return %arg0, %arg1, %c0_i32, %c0_i32_0 : i32, i32, i32, i32
  }
}

</mosaic_0001>

<bundles_post_ra>
// kernel: tpu_custom_call.1
= control target key start
LH: loop header
LB: loop body
LE: loop exit
PB: predicated region body
PF: predicated region fallthrough
CT: control target
= control target key end

     0   :  { %s7496_s0 = inlined_call_operand.hbm [shape: f32[2,16,16,128], index: 0, kind: input, shape index: {}]   ;;  %s7497_s1 = inlined_call_operand.hbm [shape: bf16[128,128], index: 1, kind: input, shape index: {}]   ;;  %s7498_s2 = inlined_call_operand.vmem [shape: f32[1,128], index: 2, kind: input, shape index: {}]   ;;  %s7499_s3 = inlined_call_operand.vmem [shape: f32[1,128], index: 3, kind: input, shape index: {}]   ;;  %s7500_s4 = inlined_call_operand.hbm [shape: bf16[9,128,128], index: 4, kind: input, shape index: {}]   ;;  %s7501_s5 = inlined_call_operand.vmem [shape: f32[1,128], index: 5, kind: input, shape index: {}]   ;;  %s7502_s6 = inlined_call_operand.vmem [shape: f32[1,128], index: 6, kind: input, shape index: {}]   ;;  %s7503_s7 = inlined_call_operand.hbm [shape: bf16[128,128], index: 7, kind: input, shape index: {}]   ;;  %s7504_s8 = inlined_call_operand.vmem [shape: f32[1,128], index: 8, kind: input, shape index: {}]   ;;  %s7505_s9 = inlined_call_operand.vmem [shape: f32[1,128], index: 9, kind: input, shape index: {}]   ;;  %s7506_s10 = inlined_call_operand.hbm [shape: f32[2,16,16,128], index: 10, kind: output, shape index: {}]  }
   0x1   :  { %7543 = sst [smem:[#allocation45_spill]] %s7497_s1 }
   0x2   :  { %7544 = sst [smem:[#allocation46_spill]] %s7498_s2 }
   0x3   :  { %7545 = sst [smem:[#allocation47_spill]] %s7499_s3 }
   0x4   :  { %7546 = sst [smem:[#allocation48_spill]] %s7500_s4 }
   0x5   :  { %7547 = sst [smem:[#allocation49_spill]] %s7501_s5 }
   0x6   :  { %7548 = sst [smem:[#allocation50_spill]] %s7502_s6 }
   0x7   :  { %7549 = sst [smem:[#allocation51_spill]] %s7504_s8 }
   0x8   :  { %7550 = sst [smem:[#allocation52_spill]] %s7505_s9 }
   0x9   :  { %7551 = sst [smem:[#allocation53_spill]] %s7506_s10 }
   0xa   :  { %15 = vsyncpa [#allocation4], 0 }
   0xb   :  { %17 = vsyncpa [#allocation4 + $0x1], 0 }
   0xc   :  { %18 = vsyncpa [#allocation7], 0 }
   0xd   :  { %19 = vsyncpa [#allocation10], 0 }
   0xe   :  { %20 = vsyncpa [#allocation5], 0 }
   0xf   :  { %22 = vsyncpa [#allocation5 + $0x1], 0  ;;  %s6047_s13 = smov 0   ;;  %s6049_s14 = smov 0  }
  0x10   :  { %s6051_s15 = smov 0   ;;  %s6053_s16 = smov 0  }
  0x11   :  { %s6055_s17 = smov 0   ;;  %s6057_s18 = smov 0  }
  0x12   :  { %s6059_s19 = smov 0   ;;  %s6061_s20 = smov 0  }
  0x13   :  { %s6063_s21 = smov 0   ;;  %s6065_s22 = smov 0  }
  0x14   :  { %s6067_s23 = smov 0  }
  0x15 LB: > { %7552 = sst [smem:[#allocation16_spill]] %s5936_s13  ;;  %s4488_s24 = sadd.s32 4294967295, %s5976_s23   ;;  %s5976_s23 = sphi %s6067_s23, %s28_s23   ;;  %s5972_s22 = sphi %s6065_s22, %s7653_s22   ;;  %s5968_s21 = sphi %s6063_s21, %s7652_s21   ;;  %s5964_s20 = sphi %s6061_s20, %s7651_s20   ;;  %s5960_s19 = sphi %s6059_s19, %s7650_s19   ;;  %s5956_s18 = sphi %s6057_s18, %s7649_s18   ;;  %s5952_s17 = sphi %s6055_s17, %s7648_s17   ;;  %s5948_s16 = sphi %s6053_s16, %s7647_s16   ;;  %s5944_s15 = sphi %s6051_s15, %s7646_s15   ;;  %s5940_s14 = sphi %s6049_s14, %s7645_s14   ;;  %s5936_s13 = sphi %s6047_s13, %s7644_s13  }
  0x16   : > { %7553 = sst [smem:[#allocation17_spill]] %s5964_s20  ;;  %s4489_s25 = sadd.s32 4294967294, %s5976_s23  }
  0x17   : > { %p60_p0 = scmp.ne.s32.totalorder %s5952_s17, %s5948_s16  ;;  %p6103_p1 = scmp.eq.s32.totalorder %s4488_s24, 0 }
  0x18   : > { %p274_p2 = scmp.ne.s32.totalorder %s5944_s15, %s5940_s14  ;;  %p275_p4 = scmp.eq.s32.totalorder %s4488_s24, 3 }
  0x19   : > { %s7554_s26 = scalar_select %p6103_p1, 1, 0 }
  0x1a   : > { %p6112_p3 = por %p6103_p1, %p60_p0  ;;  %p280_p5 = scmp.ne.s32.totalorder %s5940_s14, %s5936_s13 }
  0x1b   : > { %p281_p6 = scmp.eq.s32.totalorder %s4489_s25, 3  ;;  %p6118_p7 = por %p275_p4, %p274_p2 }
  0x1c   : > { %s7555_s28 = scalar_select %p6112_p3, 1, 0 }
  0x1d   : > { %s7556_s29 = scalar_select %p6118_p7, 1, 0 }
  0x1e   : > { %p4490_p8 = scmp.ge.s32.totalorder %s5976_s23, 1  ;;  %p6123_p9 = por %p281_p6, %p280_p5 }
  0x1f   : > { %7557 = sst [smem:[#allocation18_spill]] %s7556_s29  ;;  %p288_p10 = scmp.lt.s32.totalorder %s5976_s23, 5 }
  0x20   : > { %s7558_s30 = scalar_select %p6123_p9, 1, 0 }
  0x21   : > { %p6128_p11 = pnand %p4490_p8, %p288_p10  ;;  %s5978_s12 = smov [#allocation6]  }
  0x22   : > { %7559 = sst [smem:[#allocation19_spill]] %s7558_s30  ;;  %s300_s16 = sshll.u32 %s5978_s12, 4  ;;  %s6132_s16 = int_to_ptr.vmem [resolvable:$true] %s300_s16 }
  0x23   : > { %s7560_s11 = scalar_select %p6128_p11, 1, 0 }
  0x24   : > { %p5481_p12 = pneg %p6128_p11  ;;  %s5979_s25 = smov [#allocation8]  }
  0x25   : > { %s319_s27 = sshll.u32 %s5979_s25, 4  ;;  %s5980_s30 = smov [#allocation9]   ;;  %s6142_s27 = int_to_ptr.vmem [resolvable:$true] %s319_s27 }
  0x26   : > { %p6138_p13 = pnand %p5481_p12, %p6103_p1  ;;  %s6144_s13 = sshll.u32 %s5980_s30, 4  ;;  %s339_s13 = int_to_ptr.vmem [resolvable:$true] %s6144_s13 }
  0x27   : > { %s7562_s1 = sld [smem:[#allocation45_spill]] }
  0x28   : > { %p6154_p2 = pneg %p6138_p13 }
  0x2d   : > { %s5732_s12 = scalar_lea.hbm %s7562_s1, 1024 }
  0x2e   : > { %p5733_p0 = scmp.ne.s32.totalorder %s7562_s1, %s5732_s12  ;;  %p5739_p6 = scmp.lt.u32.totalorder %s5732_s12, %s7562_s1 }
  0x30   : > { %p5735_p4 = pnand %p6154_p2, %p5733_p0 }
  0x32   : > { %p5736_p5 = pneg %p5735_p4 }
  0x34   : > { %p5741_p8 = pnand %p5739_p6, %p5736_p5 }
  0x36   : > { %5744 = shalt.err (!%p5741_p8)
}
  0x37   : > { %s5745_s9 = scalar_lea.vmem %s6132_s16, 1024  ;;  %p5753_p7 = scmp.lt.s32.totalorder %s6132_s16, %s6132_s16 }
  0x38   : > { %p5746_p10 = scmp.ne.s32.totalorder %s6132_s16, %s5745_s9  ;;  %p5754_p1 = scmp.lt.s32.totalorder %s5745_s9, %s5745_s9 }
  0x3a   : > { %p5748_p12 = pnand %p5746_p10, %p6154_p2  ;;  %p5755_p0 = por %p5754_p1, %p5753_p7 }
  0x3c   : > { %p5749_p9 = pneg %p5748_p12 }
  0x3e   : > { %p5756_p4 = pnand %p5755_p0, %p5749_p9 }
  0x40   : > { %5759 = shalt.err (!%p5756_p4)
}
  0x41   : > { %s5981_s10 = smov 64   ;;  %s5982_s20 = smov 4  }
  0x42   : > { %5484 = dma.hbm_to_vmem [thread:$0]  (!%p6138_p13), %s7562_s1, 1024, %s6132_s16, [#allocation7], %s5981_s10, %s5981_s10, %s5982_s20  }
  0x43   : > { %s7564_s4 = sld [smem:[#allocation48_spill]] }
  0x49   : > { %s5760_s9 = scalar_lea.hbm %s7564_s4, 9216 }
  0x4a   : > { %p5761_p1 = scmp.ne.s32.totalorder %s7564_s4, %s5760_s9  ;;  %p5767_p5 = scmp.lt.u32.totalorder %s5760_s9, %s7564_s4 }
  0x4c   : > { %p5763_p7 = pnand %p5761_p1, %p6154_p2 }
  0x4e   : > { %p5764_p9 = pneg %p5763_p7 }
  0x50   : > { %p5769_p6 = pnand %p5767_p5, %p5764_p9 }
  0x52   : > { %5772 = shalt.err (!%p5769_p6)
}
  0x53   : > { %s5773_s16 = scalar_lea.vmem %s6142_s27, 9216  ;;  %p5781_p0 = scmp.lt.s32.totalorder %s6142_s27, %s6142_s27 }
  0x54   : > { %p5774_p8 = scmp.ne.s32.totalorder %s6142_s27, %s5773_s16  ;;  %p5782_p4 = scmp.lt.s32.totalorder %s5773_s16, %s5773_s16 }
  0x56   : > { %p5776_p10 = pnand %p5774_p8, %p6154_p2  ;;  %p5783_p1 = por %p5782_p4, %p5781_p0 }
  0x58   : > { %p5777_p12 = pneg %p5776_p10 }
  0x5a   : > { %p5784_p7 = pnand %p5783_p1, %p5777_p12 }
  0x5c   : > { %5787 = shalt.err (!%p5784_p7)
}
  0x5d   : > { %5487 = dma.hbm_to_vmem [thread:$0]  (!%p6138_p13), %s7564_s4, 9216, %s6142_s27, [#allocation7], %s5981_s10, %s5981_s10, %s5982_s20  }
  0x5e   : > { %s5788_s29 = scalar_lea.hbm %s7503_s7, 1024 }
  0x5f   : > { %p5789_p9 = scmp.ne.s32.totalorder %s7503_s7, %s5788_s29  ;;  %p5795_p8 = scmp.lt.u32.totalorder %s5788_s29, %s7503_s7 }
  0x61   : > { %p5791_p5 = pnand %p5789_p9, %p6154_p2 }
  0x63   : > { %p5792_p6 = pneg %p5791_p5 }
  0x65   : > { %p5797_p10 = pnand %p5795_p8, %p5792_p6 }
  0x67   : > { %5800 = shalt.err (!%p5797_p10)
}
  0x68   : > { %s5801_s16 = scalar_lea.vmem %s339_s13, 1024  ;;  %p5809_p1 = scmp.lt.s32.totalorder %s339_s13, %s339_s13 }
  0x69   : > { %p5802_p12 = scmp.ne.s32.totalorder %s339_s13, %s5801_s16  ;;  %p5810_p7 = scmp.lt.s32.totalorder %s5801_s16, %s5801_s16 }
  0x6b   : > { %p5804_p0 = pnand %p5802_p12, %p6154_p2  ;;  %p5811_p3 = por %p5810_p7, %p5809_p1 }
  0x6d   : > { %p5805_p4 = pneg %p5804_p0 }
  0x6f   : > { %p5812_p11 = pnand %p5811_p3, %p5805_p4 }
  0x71   : > { %5815 = shalt.err (!%p5812_p11)
}
  0x72   : > { %5490 = dma.hbm_to_vmem [thread:$0]  (!%p6138_p13), %s7503_s7, 1024, %s339_s13, [#allocation10], %s5981_s10, %s5981_s10, %s5982_s20  }
  0x73   : > { %s37_s8 = sadd.s32 1, %s5968_s21  ;;  %s40_s24 = sadd.s32 1, %s5972_s22 }
  0x74   : > { %p38_p3 = scmp.ge.s32.totalorder %s37_s8, 2  ;;  %s47_s3 = sadd.s32 1, %s5956_s18 }
  0x75   : > { %p54_p11 = scmp.ne.s32.totalorder %s5956_s18, %s5952_s17  ;;  %p55_p2 = scmp.eq.s32.totalorder %s5976_s23, 0 }
  0x76   : > { %s7655_s8 = smov (%p38_p3, %s37_s8), 0  ;;  %s7657_s24 = smov (!%p38_p3, %s40_s24), %s5972_s22 }
  0x77   : > { %s260_s5 = ssub.s32 %s5968_s21, %s7655_s8  ;;  %p42_p9 = scmp.ge.s32.totalorder %s7657_s24, 2 }
  0x78   : > { %p5502_p5 = scmp.lt.s32.totalorder %s5976_s23, 4  ;;  %p6238_p13 = por %p55_p2, %p54_p11 }
  0x79   : > { %s358_s10 = sand.u32 1, %s5956_s18   ;;  %s7659_s24 = smov (%p42_p9, %s7657_s24), 0 }
  0x7a   : > { %s4495_s20 = sshll.u32 %s358_s10, 8  ;;  %s44_s6 = ssub.s32 %s5972_s22, %s7659_s24 }
  0x7b   : > { %p45_p6 = scmp.eq.s32.totalorder %s44_s6, 0  ;;  %s261_s29 = sor.u32 %s260_s5, %s44_s6 }
  0x7c   : > { %p262_p8 = scmp.eq.s32.totalorder %s261_s29, 0  ;;  %s4728_s12 = sshll.u32 %s5972_s22, 12 }
  0x7d   : > { %s6249_s25 = scalar_select %p45_p6, %s5956_s18, %s47_s3  }
  0x7e   : > { %s7566_s30 = sadd.s32 1, %s5944_s15  ;;  %s6259_s2 = scalar_lea.hbm %s7496_s0, %s4728_s12 }
  0x7f   : > { %s6254_s9 = scalar_select %p262_p8, %s5944_s15, %s7566_s30  }
  0x80   : > { %s362_s1 = scalar_lea.vmem [#allocation3], %s4495_s20  ;;  %p6267_p10 = pnand %p5502_p5, %p6238_p13 }
  0x81   : > { %s369_s4 = sshll.u32 %s362_s1, 4  ;;  %s6271_s5 = scalar_lea.sflag [#allocation4], %s358_s10  ;;  %s6261_s4 = int_to_ptr.vmem [resolvable:$true] %s369_s4 }
  0x82   : > { %s5816_s6 = scalar_lea.hbm %s6259_s2, 4096  ;;  %p5818_p0 = pneg %p6267_p10 }
  0x83   : > { %p5817_p12 = scmp.ne.s32.totalorder %s6259_s2, %s5816_s6  ;;  %s5821_s13 = scalar_lea.hbm %s7496_s0, 8192 }
  0x84   : > { %p5822_p7 = scmp.lt.u32.totalorder %s6259_s2, %s7496_s0  ;;  %p5823_p3 = scmp.lt.u32.totalorder %s5821_s13, %s5816_s6 }
  0x85   : > { %p5819_p4 = pnand %p5818_p0, %p5817_p12  ;;  %p5825_p2 = scmp.lt.u32.totalorder %s5816_s6, %s6259_s2 }
  0x86   : > { %p5824_p11 = por %p5823_p3, %p5822_p7 }
  0x87   : > { %p5820_p1 = pneg %p5819_p4 }
  0x88   : > { %p5826_p9 = por %p5825_p2, %p5824_p11 }
  0x8a   : > { %p5827_p5 = pnand %p5826_p9, %p5820_p1 }
  0x8c   : > { %5830 = shalt.err (!%p5827_p5)
}
  0x8d   : > { %s5831_s10 = scalar_lea.vmem %s6261_s4, 4096  ;;  %s5983_s30 = smov [#allocation3]  }
  0x8e   : > { %p5832_p13 = scmp.ne.s32.totalorder %s6261_s4, %s5831_s10  ;;  %s5836_s16 = sshll.u32 %s5983_s30, 4  ;;  %s5837_s16 = int_to_ptr.vmem [resolvable:$false] %s5836_s16 }
  0x8f   : > { %s5838_s27 = scalar_lea.vmem %s5837_s16, 8192  ;;  %p5839_p12 = scmp.lt.s32.totalorder %s6261_s4, %s5837_s16 }
  0x90   : > { %p5834_p6 = pnand %p5832_p13, %p5818_p0  ;;  %p5840_p4 = scmp.lt.s32.totalorder %s5838_s27, %s5831_s10 }
  0x92   : > { %p5835_p8 = pneg %p5834_p6  ;;  %p5841_p7 = por %p5840_p4, %p5839_p12 }
  0x94   : > { %p5842_p3 = pnand %p5841_p7, %p5835_p8 }
  0x96   : > { %5845 = shalt.err (!%p5842_p3)
}
  0x97   : > { %s5984_s6 = smov 128   ;;  %s5985_s1 = smov 8  }
  0x98   : > { %5494 = dma.hbm_to_vmem [thread:$0]  (!%p6267_p10), %s6259_s2, 4096, %s6261_s4, %s6271_s5, %s5984_s6, %s5984_s6, %s5985_s1  }
  0x99   : > { %p7568_p0 = scmp.ne.s32.totalorder %s7560_s11, 0 }
  0x9b   : > { %381 = sbr.rel (%p7568_p0) target bundleno = 1213 (0x4bd), region = 60 }
  0xa2   : > { %s383_s20 = sand.u32 1, %s5952_s17   ;;  %p7569_p1 = scmp.ne.s32.totalorder %s7555_s28, 0 }
  0xa3   : > { %s4499_s13 = sshll.u32 %s383_s20, 8  ;;  %s384_s29 = scalar_lea.sflag [#allocation4], %s383_s20 }
  0xa4   : > { %s6302_s12 = scalar_lea.vmem [#allocation3], %s4499_s13 }
  0xa5   : > { %5919 = dma.done.wait (%p7569_p1), %s384_s29, 4096  }
  0xa6   : > { %5921 = vsyncadd (%p7569_p1), %s384_s29, 4294963200  ;;  %p7570_p11 = scmp.ne.s32.totalorder %s7554_s26, 0 }
  0xa8   : > { %5923 = dma.done.wait (%p7570_p11), [#allocation7], 10240  }
  0xa9   : > { %5925 = vsyncadd (%p7570_p11), [#allocation7], 4294957056 }
  0xaa   : > { %5927 = dma.done.wait (%p7570_p11), [#allocation10], 1024  }
  0xab   : > { %5929 = vsyncadd (%p7570_p11), [#allocation10], 4294966272  ;;  %s433_s4 = sand.u32 1, %s5940_s14   ;;  %v5986_v0 = vmov 0   ;;  %v6321_v1 = vld [vmem:[#allocation6] sm:$0xff]   ;;  %v6323_v2 = vld [vmem:[#allocation6 + $0x8] sm:$0xff]  }
  0xac   : > { %457 = vst [vmem:[#allocation2] sm:$0xf] %v5986_v0  ;;  %458 = vst [vmem:[#allocation2 + $0x4] sm:$0xf] %v5986_v0  ;;  %s6319_s26 = sshll.u32 %s433_s4, 7  ;;  %4945 = vmatprep.subr.bf16.mxu0 %v6321_v1  ;;  %s4729_s28 = sshll.u32 %s5960_s19, 7 }
  0xad   : > { %459 = vst [vmem:[#allocation2 + $0x8] sm:$0x1] %v5986_v0  ;;  %484 = vst [vmem:[#allocation2 + $0x6c] sm:$0xf] %v5986_v0  ;;  %4946 = vmatpush3.bf16.msra.mxu0 %v6321_v1  ;;  %v6329_v3 = vld [vmem:[#allocation6 + $0x10] sm:$0xff]   ;;  %s6332_s11 = scalar_lea.vmem %s6302_s12, %s4729_s28 [#allocation3]  ;;  %v6336_v4 = vld [vmem:[#allocation6 + $0x18] sm:$0xff]  }
  0xae   : > { %485 = vst [vmem:[#allocation2 + $0x70] sm:$0xf] %v5986_v0  ;;  %486 = vst [vmem:[#allocation2 + $0x74] sm:$0x1] %v5986_v0  ;;  %4947 = vmatprep.subr.bf16.mxu0 %v6323_v2  ;;  %v6339_v5 = vld [vmem:[%s6332_s11] sm:$0xff]  ;;  %v6342_v6 = vld [vmem:[%s6332_s11 + $0x8] sm:$0xff] }
  0xaf   : > { %460 = vst [vmem:[#allocation2 + $0xc] sm:$0xf] %v5986_v0  ;;  %461 = vst [vmem:[#allocation2 + $0x10] sm:$0xf] %v5986_v0  ;;  %v505_v7 = vpack.c.bf16 %v6342_v6, %v6339_v5  ;;  %v6348_v8 = vld [vmem:[#allocation6 + $0x20] sm:$0xff]   ;;  %v6352_v9 = vld [vmem:[#allocation6 + $0x28] sm:$0xff]  }
  0xb0   : > { %462 = vst [vmem:[#allocation2 + $0x14] sm:$0x1] %v5986_v0  ;;  %463 = vst [vmem:[#allocation2 + $0x18] sm:$0xf] %v5986_v0  ;;  %v6356_v10 = vld [vmem:[#allocation6 + $0x30] sm:$0xff]   ;;  %v6360_v11 = vld [vmem:[#allocation6 + $0x38] sm:$0xff]  }
  0xb1   : > { %464 = vst [vmem:[#allocation2 + $0x1c] sm:$0xf] %v5986_v0  ;;  %465 = vst [vmem:[#allocation2 + $0x20] sm:$0x1] %v5986_v0  ;;  %4948 = vmatpush3.bf16.msra.mxu0 %v6323_v2  ;;  %4961 = vmatprep.mubr.bf16.mxu0 %v505_v7  ;;  %v6364_v12 = vld [vmem:[%s6332_s11 + $0x10] sm:$0xff]  ;;  %v6367_v13 = vld [vmem:[%s6332_s11 + $0x18] sm:$0xff] }
  0xb2   : > { %466 = vst [vmem:[#allocation2 + $0x24] sm:$0xf] %v5986_v0  ;;  %467 = vst [vmem:[#allocation2 + $0x28] sm:$0xf] %v5986_v0  ;;  %4949 = vmatprep.subr.bf16.mxu0 %v6329_v3  ;;  %v6371_v14 = vld [vmem:[%s6332_s11 + $0x20] sm:$0xff]  ;;  %v6374_v15 = vld [vmem:[%s6332_s11 + $0x28] sm:$0xff]  ;;  %v506_v16 = vpack.c.bf16 %v6367_v13, %v6364_v12 }
  0xb3   : > { %468 = vst [vmem:[#allocation2 + $0x2c] sm:$0x1] %v5986_v0  ;;  %469 = vst [vmem:[#allocation2 + $0x30] sm:$0xf] %v5986_v0  ;;  %v507_v17 = vpack.c.bf16 %v6374_v15, %v6371_v14  ;;  %v5987_v18 = vmov 0.0   ;;  %v6384_v19 = vld [vmem:[%s6332_s11 + $0x30] sm:$0xff] }
  0xb4   : > { %470 = vst [vmem:[#allocation2 + $0x34] sm:$0xf] %v5986_v0  ;;  %471 = vst [vmem:[#allocation2 + $0x38] sm:$0x1] %v5986_v0  ;;  %v6387_v20 = vld [vmem:[%s6332_s11 + $0x38] sm:$0xff]  ;;  %v6391_v21 = vld [vmem:[%s6332_s11 + $0x40] sm:$0xff] }
  0xb5   : > { %472 = vst [vmem:[#allocation2 + $0x3c] sm:$0xf] %v5986_v0  ;;  %473 = vst [vmem:[#allocation2 + $0x40] sm:$0xf] %v5986_v0  ;;  %4950 = vmatpush3.bf16.msra.mxu0 %v6329_v3  ;;  %v6394_v22 = vld [vmem:[%s6332_s11 + $0x48] sm:$0xff]  ;;  %v508_v23 = vpack.c.bf16 %v6387_v20, %v6384_v19  ;;  %s4504_s2 = sshll.u32 %s5960_s19, 3 }
  0xb6   : > { %474 = vst [vmem:[#allocation2 + $0x44] sm:$0x1] %v5986_v0  ;;  %475 = vst [vmem:[#allocation2 + $0x48] sm:$0xf] %v5986_v0  ;;  %4951 = vmatprep.subr.bf16.mxu0 %v6336_v4  ;;  %v509_v24 = vpack.c.bf16 %v6394_v22, %v6391_v21  ;;  %s4532_s3 = sadd.s32 4294967295, %s4504_s2  ;;  %v6407_v25 = vld [vmem:[%s6332_s11 + $0x50] sm:$0xff] }
  0xb7   : > { %476 = vst [vmem:[#allocation2 + $0x4c] sm:$0xf] %v5986_v0  ;;  %477 = vst [vmem:[#allocation2 + $0x50] sm:$0x1] %v5986_v0  ;;  %v6410_v26 = vld [vmem:[%s6332_s11 + $0x58] sm:$0xff]  ;;  %v6414_v27 = vld [vmem:[%s6332_s11 + $0x60] sm:$0xff] }
  0xb8   : > { %478 = vst [vmem:[#allocation2 + $0x54] sm:$0xf] %v5986_v0  ;;  %479 = vst [vmem:[#allocation2 + $0x58] sm:$0xf] %v5986_v0  ;;  %v6417_v28 = vld [vmem:[%s6332_s11 + $0x68] sm:$0xff]  ;;  %p992_p10 = scmp.gt.s32.totalorder %s4532_s3, 0  ;;  %v510_v29 = vpack.c.bf16 %v6410_v26, %v6407_v25 }
  0xb9   : > { %480 = vst [vmem:[#allocation2 + $0x5c] sm:$0x1] %v5986_v0  ;;  %481 = vst [vmem:[#allocation2 + $0x60] sm:$0xf] %v5986_v0  ;;  %4952 = vmatpush3.bf16.msra.mxu0 %v6336_v4  ;;  %v511_v30 = vpack.c.bf16 %v6417_v28, %v6414_v27  ;;  %v6427_v31 = vld [vmem:[%s6332_s11 + $0x70] sm:$0xff]  ;;  %v6430_v32 = vld [vmem:[%s6332_s11 + $0x78] sm:$0xff] }
  0xba   : > { %482 = vst [vmem:[#allocation2 + $0x64] sm:$0xf] %v5986_v0  ;;  %483 = vst [vmem:[#allocation2 + $0x68] sm:$0x1] %v5986_v0  ;;  %4953 = vmatprep.subr.bf16.mxu0 %v6348_v8  ;;  %s7661_s3 = smov (!%p992_p10, %s4532_s3), 0  ;;  %v512_v33 = vpack.c.bf16 %v6430_v32, %v6427_v31  ;;  %vm5988_vm0 = vmmov 0  }
  0xbb   : > { %7571 = vst [vmem:[#allocation20_spill] sm:$0xff] %v6339_v5  ;;  %7572 = vst [vmem:[#allocation21_spill] sm:$0xff] %v6342_v6  ;;  %s4533_s5 = sshll.u32 %s7661_s3, 4  ;;  %s998_s30 = sadd.s32 8, %s4504_s2  ;;  %vm930_vm1 = vcmask 1043456   ;;  %vm937_vm5 = vcmask 1040384  }
  0xbc   : > { %7573 = vst [vmem:[#allocation22_spill] sm:$0xff] %v6364_v12  ;;  %7574 = vst [vmem:[#allocation23_spill] sm:$0xff] %v6367_v13  ;;  %s995_s10 = scalar_lea.vmem %s6302_s12, %s4533_s5 [#allocation3]  ;;  %p999_p2 = scmp.lt.s32.totalorder %s998_s30, 15  ;;  %vm931_vm2 = vsmask.f32 7938 }
  0xbd   : > { %4954 = vmatpush3.bf16.msra.mxu0 %v6348_v8  ;;  %7575 = vst [vmem:[#allocation24_spill] sm:$0xff] %v6371_v14  ;;  %7576 = vst [vmem:[#allocation25_spill] sm:$0xff] %v6374_v15  ;;  %v996_v34 = vld [vmem:[%s995_s10] sm:$0xff]  ;;  %v997_v35 = vld [vmem:[%s995_s10 + $0x8] sm:$0xff]  ;;  %s7587_s20 = sld [smem:[#allocation46_spill]]  ;;  %s7588_s28 = sld [smem:[#allocation47_spill]] }
  0xbe   : > { %4955 = vmatprep.subr.bf16.mxu0 %v6352_v9  ;;  %7577 = vst [vmem:[#allocation26_spill] sm:$0xff] %v6384_v19  ;;  %7578 = vst [vmem:[#allocation27_spill] sm:$0xff] %v6387_v20  ;;  %v1005_v36 = vpack.c.bf16 %v997_v35, %v996_v34  ;;  %s7663_s30 = smov (!%p999_p2, %s998_s30), 15  ;;  %vm766_vm3 = vsmask.f32 256  ;;  %p4535_p9 = scmp.le.s32.totalorder %s5960_s19, 0 }
  0xbf   : > { %7579 = vst [vmem:[#allocation28_spill] sm:$0xff] %v6391_v21  ;;  %7580 = vst [vmem:[#allocation29_spill] sm:$0xff] %v6394_v22  ;;  %s4534_s16 = sshll.u32 %s7663_s30, 4  ;;  %vm767_vm4 = vsmask.f32 4368 }
  0xc0   : > { %7581 = vst [vmem:[#allocation30_spill] sm:$0xff] %v6407_v25  ;;  %7582 = vst [vmem:[#allocation31_spill] sm:$0xff] %v6410_v26  ;;  %s1002_s27 = scalar_lea.vmem %s6302_s12, %s4534_s16 [#allocation3]  ;;  %s6587_s12 = scalar_lea.vmem [#allocation11], %s6319_s26 }
  0xc1   : > { %4956 = vmatpush3.bf16.msra.mxu0 %v6352_v9  ;;  %7583 = vst [vmem:[#allocation32_spill] sm:$0xff] %v6414_v27  ;;  %7584 = vst [vmem:[#allocation33_spill] sm:$0xff] %v6417_v28  ;;  %v1003_v37 = vld [vmem:[%s1002_s27] sm:$0xff]  ;;  %v1004_v38 = vld [vmem:[%s1002_s27 + $0x8] sm:$0xff] }
  0xc2   : > { %4957 = vmatprep.subr.bf16.mxu0 %v6356_v10  ;;  %7585 = vst [vmem:[#allocation34_spill] sm:$0xff] %v6427_v31  ;;  %7586 = vst [vmem:[#allocation35_spill] sm:$0xff] %v6430_v32  ;;  %v1054_v39 = vpack.c.bf16 %v1004_v38, %v1003_v37 }
  0xc3   : > { %v6465_v40 = vld [vmem:[%s7587_s20] ss:$0 sm:$0xff]  ;;  %vm6485_vm6 = vmand %vm930_vm1, %vm931_vm2 }
  0xc4   : > { %v6470_v41 = vld [vmem:[%s7588_s28] ss:$0 sm:$0xff]  ;;  %vm6492_vm7 = vmor %vm766_vm3, %vm767_vm4 }
  0xc5   : > { %4958 = vmatpush3.bf16.msra.mxu0 %v6356_v10  ;;  %vm6498_vm8 = vmand %vm937_vm5, %vm766_vm3 }
  0xc6   : > { %4959 = vmatprep.subr.bf16.mxu0 %v6360_v11 }
  0xc9   : > { %4960 = vmatpush3.bf16.msra.mxu0 %v6360_v11 }
  0xca   : > { %4977 = vmatprep.subr.bf16.mxu0 %v5987_v18 }
  0xcc   : > { %4962 = vmatmul.mubr.bf16.vlgmr.msra.gmra.mrb[0].mxu0 %v506_v16 }
  0xcd   : > { %4978 = vmatpush3.bf16.msra.mxu0 %v6321_v1  ;;  %4965 = vmatprep.mubr.bf16.mxu0 %v507_v17 }
  0xce   : > { %4979 = vmatprep.subr.bf16.mxu0 %v5987_v18 }
  0xd1   : > { %4980 = vmatpush3.bf16.msra.mxu0 %v6323_v2 }
  0xd2   : > { %4981 = vmatprep.subr.bf16.mxu0 %v5987_v18 }
  0xd4   : > { %4966 = vmatmul.mubr.bf16.gmra.mrb[4].mxu0 %v508_v23  ;;  %v942_v23 = vld [vmem:[#allocation2 + $0x18] sm:$0xf] }
  0xd5   : > { %4982 = vmatpush3.bf16.msra.mxu0 %v6329_v3  ;;  %4969 = vmatprep.mubr.bf16.mxu0 %v509_v24 }
  0xd6   : > { %4983 = vmatprep.subr.bf16.mxu0 %v5987_v18 }
  0xd9   : > { %4984 = vmatpush3.bf16.msra.mxu0 %v6336_v4 }
  0xda   : > { %4985 = vmatprep.subr.bf16.mxu0 %v5987_v18 }
  0xdc   : > { %4970 = vmatmul.mubr.bf16.gmra.mrb[8].mxu0 %v510_v29 }
  0xdd   : > { %4986 = vmatpush3.bf16.msra.mxu0 %v6348_v8  ;;  %4973 = vmatprep.mubr.bf16.mxu0 %v511_v30 }
  0xde   : > { %4987 = vmatprep.subr.bf16.mxu0 %v5987_v18 }
  0xe1   : > { %4988 = vmatpush3.bf16.msra.mxu0 %v6352_v9 }
  0xe2   : > { %4989 = vmatprep.subr.bf16.mxu0 %v5987_v18 }
  0xe4   : > { %4974 = vmatmul.mubr.bf16.gmra.mrb[12].mxu0 %v512_v33 }
  0xe5   : > { %4990 = vmatpush3.bf16.msra.mxu0 %v6356_v10  ;;  %4993 = vmatprep.mubr.msk.bf16.mxu0 %vm5988_vm0, %v5987_v18 }
  0xe6   : > { %4991 = vmatprep.subr.bf16.mxu0 %v5987_v18 }
  0xe9   : > { %4992 = vmatpush3.bf16.msra.mxu0 %v6360_v11 }
  0xea   : > { %4997 = vmatprep.subr.bf16.mxu0 %v5987_v18 }
  0xec   : > { %4994 = vmatmul.mubr.bf16.vlgmr.msra.gmra.mrb[16].mxu0 %v1005_v36  ;;  %v933_v36 = vld [vmem:[#allocation2 + $0xc] sm:$0xf] }
  0xed   : > { %4998 = vmatpush3.bf16.msra.mxu0 %v6321_v1  ;;  %5013 = vmatprep.mubr.msk.bf16.mxu0 %vm5988_vm0, %v5987_v18 }
  0xee   : > { %4999 = vmatprep.subr.bf16.mxu0 %v5987_v18 }
  0xf1   : > { %5000 = vmatpush3.bf16.msra.mxu0 %v6323_v2 }
  0xf2   : > { %5001 = vmatprep.subr.bf16.mxu0 %v5987_v18 }
  0xf5   : > { %5002 = vmatpush3.bf16.msra.mxu0 %v6329_v3 }
  0xf6   : > { %5003 = vmatprep.subr.bf16.mxu0 %v5987_v18 }
  0xf9   : > { %5004 = vmatpush3.bf16.msra.mxu0 %v6336_v4 }
  0xfa   : > { %5005 = vmatprep.subr.bf16.mxu0 %v5987_v18 }
  0xfd   : > { %5006 = vmatpush3.bf16.msra.mxu0 %v6348_v8 }
  0xfe   : > { %5007 = vmatprep.subr.bf16.mxu0 %v5987_v18 }
 0x101   : > { %5008 = vmatpush3.bf16.msra.mxu0 %v6352_v9 }
 0x102   : > { %5009 = vmatprep.subr.bf16.mxu0 %v5987_v18 }
 0x105   : > { %5010 = vmatpush3.bf16.msra.mxu0 %v6356_v10 }
 0x106   : > { %5011 = vmatprep.subr.bf16.mxu0 %v5987_v18 }
 0x109   : > { %5012 = vmatpush3.bf16.msra.mxu0 %v6360_v11 }
 0x10c   : > { %5014 = vmatmul.mubr.bf16.vlgmr.msra.gmra.mrb[20].mxu0 %v1054_v39 }
 0x19f   : > { %v4963_v42 = vpop.f32.mrb[0].mxu0 }
 0x1a0   : > { %v666_v43 = vmul.f32 %v4963_v42, %v6465_v40  ;;  %v595_v44 = vpop.f32.mrb[1].mxu0 }
 0x1a1   : > { %v664_v45 = vmul.f32 %v6465_v40, %v595_v44  ;;  %v4964_v46 = vpop.f32.mrb[2].mxu0 }
 0x1a2   : > { %v688_v47 = vadd.f32 %v6470_v41, %v666_v43  ;;  %v667_v48 = vmul.f32 %v4964_v46, %v6465_v40  ;;  %v598_v49 = vpop.f32.mrb[3].mxu0 }
 0x1a3   : > { %v686_v50 = vadd.f32 %v6470_v41, %v664_v45  ;;  %v665_v51 = vmul.f32 %v6465_v40, %v598_v49  ;;  %v946_v45 = vld [vmem:[#allocation2 + $0x20] sm:$0x1] }
 0x1a4   : > { %v704_v52 = vmax.f32 %v688_v47, 0.0  ;;  %v689_v53 = vadd.f32 %v6470_v41, %v667_v48 }
 0x1a5   : > { %v702_v54 = vmax.f32 %v686_v50, 0.0  ;;  %v687_v55 = vadd.f32 %v6470_v41, %v665_v51  ;;  %v939_v51 = vld [vmem:[#allocation2 + $0x14] sm:$0x1] }
 0x1a6   : > { %v4732_v56 = vpack.c.bf16 %v704_v52, %v704_v52  ;;  %v705_v57 = vmax.f32 %v689_v53, 0.0 }
 0x1a7   : > { %v4730_v58 = vpack.c.bf16 %v702_v54, %v702_v54  ;;  %v703_v59 = vmax.f32 %v687_v55, 0.0  ;;  %v4967_v60 = vpop.f32.mrb[4].mxu0 }
 0x1a8   : > { %v787_v61 = vshrl.u32 %v4732_v56, 16  ;;  %v790_v62 = vshll.u32 %v4732_v56, 16  ;;  %v4733_v63 = vpack.c.bf16 %v705_v57, %v705_v57  ;;  %v670_v0 = vmul.f32 %v4967_v60, %v6465_v40  ;;  %v611_v1 = vpop.f32.mrb[5].mxu0 }
 0x1a9   : > { %v770_v2 = vshrl.u32 %v4730_v58, 16  ;;  %v773_v3 = vshll.u32 %v4730_v58, 16  ;;  %v4731_v4 = vpack.c.bf16 %v703_v59, %v703_v59  ;;  %v668_v7 = vmul.f32 %v6465_v40, %v611_v1  ;;  %v4968_v8 = vpop.f32.mrb[6].mxu0 }
 0x1aa   : > { %v789_v9 = vrot.slane %v787_v61, 7  ;;  %v795_v10 = vshrl.u32 %v4733_v63, 16  ;;  %v798_v11 = vshll.u32 %v4733_v63, 16  ;;  %v692_v16 = vadd.f32 %v6470_v41, %v670_v0  ;;  %v614_v17 = vpop.f32.mrb[7].mxu0 }
 0x1ab   : > { %v772_v24 = vrot.slane %v770_v2, 7  ;;  %v778_v29 = vshrl.u32 %v4731_v4, 16  ;;  %v781_v30 = vshll.u32 %v4731_v4, 16  ;;  %v690_v33 = vadd.f32 %v6470_v41, %v668_v7 }
 0x1ac   : > { %v792_v34 = vor.u32 %v790_v62, %v789_v9  ;;  %v793_v35 = vrot.slane %v789_v9, 4  ;;  %v797_v38 = vrot.slane %v795_v10, 7  ;;  %v708_v39 = vmax.f32 %v692_v16, 0.0  ;;  %v956_v16 = vld [vmem:[#allocation2 + $0x30] sm:$0xf] }
 0x1ad   : > { %v775_v42 = vor.u32 %v773_v3, %v772_v24  ;;  %v776_v43 = vrot.slane %v772_v24, 4  ;;  %v780_v46 = vrot.slane %v778_v29, 7  ;;  %v706_v47 = vmax.f32 %v690_v33, 0.0 }
 0x1ae   : > { %v943_v48 = vsel %vm6485_vm6, %v792_v34, %v942_v23  ;;  %v800_v49 = vor.u32 %v798_v11, %v797_v38  ;;  %v802_v50 = vrot.slane %v797_v38, 4  ;;  %v4736_v52 = vpack.c.bf16 %v708_v39, %v708_v39 }
 0x1af   : > { %944 = vst [vmem:[#allocation2 + $0x18] sm:$0xf] %v943_v48  ;;  %v934_v53 = vsel %vm6485_vm6, %v775_v42, %v933_v36  ;;  %v783_v54 = vor.u32 %v781_v30, %v780_v46  ;;  %v785_v55 = vrot.slane %v780_v46, 4  ;;  %v4734_v56 = vpack.c.bf16 %v706_v47, %v706_v47  ;;  %v4971_v57 = vpop.f32.mrb[8].mxu0 }
 0x1b0   : > { %935 = vst [vmem:[#allocation2 + $0xc] sm:$0xf] %v934_v53  ;;  %v801_v58 = vsel %vm6492_vm7, %v793_v35, %v800_v49  ;;  %v947_v59 = vsel %vm6498_vm8, %v802_v50, %v946_v45  ;;  %v821_v60 = vshrl.u32 %v4736_v52, 16  ;;  %v824_v61 = vshll.u32 %v4736_v52, 16  ;;  %v627_v62 = vpop.f32.mrb[9].mxu0 }
 0x1b1   : > { %945 = vst [vmem:[#allocation2 + $0x1c] sm:$0xf] %v801_v58  ;;  %948 = vst [vmem:[#allocation2 + $0x20] sm:$0x1] %v947_v59  ;;  %v784_v63 = vsel %vm6492_vm7, %v776_v43, %v783_v54  ;;  %v940_v0 = vsel %vm6498_vm8, %v785_v55, %v939_v51  ;;  %v804_v1 = vshrl.u32 %v4734_v56, 16  ;;  %v807_v2 = vshll.u32 %v4734_v56, 16 }
 0x1b2   : > { %v4972_v3 = vpop.f32.mrb[10].mxu0  ;;  %936 = vst [vmem:[#allocation2 + $0x10] sm:$0xf] %v784_v63  ;;  %941 = vst [vmem:[#allocation2 + $0x14] sm:$0x1] %v940_v0  ;;  %v6514_v4 = vrot.slane %v821_v60, 7  ;;  %v671_v7 = vmul.f32 %v4968_v8, %v6465_v40  ;;  %v669_v9 = vmul.f32 %v6465_v40, %v614_v17  ;;  %v674_v10 = vmul.f32 %v4971_v57, %v6465_v40 }
 0x1b3   : > { %v630_v11 = vpop.f32.mrb[11].mxu0  ;;  %v6519_v23 = vrot.slane %v804_v1, 7  ;;  %v672_v24 = vmul.f32 %v6465_v40, %v627_v62  ;;  %v675_v29 = vmul.f32 %v4972_v3, %v6465_v40  ;;  %v949_v35 = vld [vmem:[#allocation2 + $0x24] sm:$0xf] }
 0x1b4   : > { %v673_v30 = vmul.f32 %v6465_v40, %v630_v11  ;;  %v826_v33 = vor.u32 %v824_v61, %v6514_v4  ;;  %v827_v34 = vrot.slane %v6514_v4, 4  ;;  %v693_v8 = vadd.f32 %v6470_v41, %v671_v7 }
 0x1b5   : > { %v691_v17 = vadd.f32 %v6470_v41, %v669_v9  ;;  %v809_v36 = vor.u32 %v807_v2, %v6519_v23  ;;  %v810_v38 = vrot.slane %v6519_v23, 4  ;;  %v696_v39 = vadd.f32 %v6470_v41, %v674_v10 }
 0x1b6   : > { %v694_v42 = vadd.f32 %v6470_v41, %v672_v24  ;;  %v957_v43 = vsel %vm6485_vm6, %v826_v33, %v956_v16  ;;  %v709_v45 = vmax.f32 %v693_v8, 0.0  ;;  %v697_v47 = vadd.f32 %v6470_v41, %v675_v29  ;;  %v960_v29 = vld [vmem:[#allocation2 + $0x38] sm:$0x1] }
 0x1b7   : > { %v707_v46 = vmax.f32 %v691_v17, 0.0  ;;  %958 = vst [vmem:[#allocation2 + $0x30] sm:$0xf] %v957_v43  ;;  %v950_v48 = vsel %vm6485_vm6, %v809_v36, %v949_v35  ;;  %v712_v49 = vmax.f32 %v696_v39, 0.0  ;;  %v695_v51 = vadd.f32 %v6470_v41, %v673_v30  ;;  %v4975_v52 = vpop.f32.mrb[12].mxu0 }
 0x1b8   : > { %v710_v50 = vmax.f32 %v694_v42, 0.0  ;;  %951 = vst [vmem:[#allocation2 + $0x24] sm:$0xf] %v950_v48  ;;  %v4737_v53 = vpack.c.bf16 %v709_v45, %v709_v45  ;;  %v713_v55 = vmax.f32 %v697_v47, 0.0  ;;  %v678_v56 = vmul.f32 %v4975_v52, %v6465_v40  ;;  %v643_v57 = vpop.f32.mrb[13].mxu0 }
 0x1b9   : > { %v4735_v54 = vpack.c.bf16 %v707_v46, %v707_v46  ;;  %v4740_v58 = vpack.c.bf16 %v712_v49, %v712_v49  ;;  %v711_v60 = vmax.f32 %v695_v51, 0.0  ;;  %v676_v61 = vmul.f32 %v6465_v40, %v643_v57  ;;  %v4976_v62 = vpop.f32.mrb[14].mxu0  ;;  %v953_v30 = vld [vmem:[#allocation2 + $0x2c] sm:$0x1]  ;;  %v970_v45 = vld [vmem:[#allocation2 + $0x48] sm:$0xf] }
 0x1ba   : > { %v4738_v59 = vpack.c.bf16 %v710_v50, %v710_v50  ;;  %v829_v63 = vshrl.u32 %v4737_v53, 16  ;;  %v832_v0 = vshll.u32 %v4737_v53, 16  ;;  %v646_v3 = vpop.f32.mrb[15].mxu0  ;;  %v4741_v23 = vpack.c.bf16 %v713_v55, %v713_v55  ;;  %v963_v46 = vld [vmem:[#allocation2 + $0x3c] sm:$0xf] }
 0x1bb   : > { %v812_v1 = vshrl.u32 %v4735_v54, 16  ;;  %v815_v2 = vshll.u32 %v4735_v54, 16  ;;  %v855_v4 = vshrl.u32 %v4740_v58, 16  ;;  %v858_v7 = vshll.u32 %v4740_v58, 16 }
 0x1bc   : > { %v838_v9 = vshrl.u32 %v4738_v59, 16  ;;  %v841_v10 = vshll.u32 %v4738_v59, 16  ;;  %v831_v11 = vrot.slane %v829_v63, 7  ;;  %v4739_v24 = vpack.c.bf16 %v711_v60, %v711_v60 }
 0x1bd   : > { %v814_v16 = vrot.slane %v812_v1, 7  ;;  %v857_v33 = vrot.slane %v855_v4, 7  ;;  %v700_v8 = vadd.f32 %v6470_v41, %v678_v56  ;;  %v698_v17 = vadd.f32 %v6470_v41, %v676_v61 }
 0x1be   : > { %v840_v35 = vrot.slane %v838_v9, 7  ;;  %v834_v36 = vor.u32 %v832_v0, %v831_v11  ;;  %v836_v39 = vrot.slane %v831_v11, 4  ;;  %v863_v58 = vshrl.u32 %v4741_v23, 16 }
 0x1bf   : > { %v817_v42 = vor.u32 %v815_v2, %v814_v16  ;;  %v819_v43 = vrot.slane %v814_v16, 4  ;;  %v860_v47 = vor.u32 %v858_v7, %v857_v33  ;;  %v861_v48 = vrot.slane %v857_v33, 4  ;;  %v1040_v51 = vpop.f32.mrb[16].mxu0 }
 0x1c0   : > { %v843_v49 = vor.u32 %v841_v10, %v840_v35  ;;  %v844_v50 = vrot.slane %v840_v35, 4  ;;  %v835_v52 = vsel %vm6492_vm7, %v827_v34, %v834_v36  ;;  %v961_v53 = vsel %vm6498_vm8, %v836_v39, %v960_v29  ;;  %v4995_v56 = vpop.f32.mrb[17].mxu0  ;;  %v974_v10 = vld [vmem:[#allocation2 + $0x50] sm:$0x1]  ;;  %v967_v35 = vld [vmem:[#allocation2 + $0x44] sm:$0x1] }
 0x1c1   : > { %v818_v54 = vsel %vm6492_vm7, %v810_v38, %v817_v42  ;;  %v954_v55 = vsel %vm6498_vm8, %v819_v43, %v953_v30  ;;  %959 = vst [vmem:[#allocation2 + $0x34] sm:$0xf] %v835_v52  ;;  %962 = vst [vmem:[#allocation2 + $0x38] sm:$0x1] %v961_v53  ;;  %v971_v57 = vsel %vm6485_vm6, %v860_v47, %v970_v45  ;;  %v866_v59 = vshll.u32 %v4741_v23, 16  ;;  %v1043_v60 = vpop.f32.mrb[18].mxu0 }
 0x1c2   : > { %952 = vst [vmem:[#allocation2 + $0x28] sm:$0xf] %v818_v54  ;;  %955 = vst [vmem:[#allocation2 + $0x2c] sm:$0x1] %v954_v55  ;;  %v964_v34 = vsel %vm6485_vm6, %v843_v49, %v963_v46  ;;  %v846_v38 = vshrl.u32 %v4739_v24, 16  ;;  %v849_v61 = vshll.u32 %v4739_v24, 16  ;;  %v679_v4 = vmul.f32 %v4976_v62, %v6465_v40 }
 0x1c3   : > { %972 = vst [vmem:[#allocation2 + $0x48] sm:$0xf] %v971_v57  ;;  %965 = vst [vmem:[#allocation2 + $0x3c] sm:$0xf] %v964_v34  ;;  %v716_v63 = vmax.f32 %v700_v8, 0.0  ;;  %v714_v0 = vmax.f32 %v698_v17, 0.0  ;;  %v677_v7 = vmul.f32 %v6465_v40, %v646_v3  ;;  %v1047_v9 = vmul.f32 %v6465_v40, %v1040_v51 }
 0x1c4   : > { %v4996_v1 = vpop.f32.mrb[19].mxu0  ;;  %v865_v2 = vrot.slane %v863_v58, 7  ;;  %v848_v11 = vrot.slane %v846_v38, 7  ;;  %v1048_v23 = vmul.f32 %v6465_v40, %v1043_v60  ;;  %v701_v24 = vadd.f32 %v6470_v41, %v679_v4  ;;  %v984_v52 = vld [vmem:[#allocation2 + $0x60] sm:$0xf] }
 0x1c5   : > { %v4744_v16 = vpack.c.bf16 %v716_v63, %v716_v63  ;;  %v4742_v29 = vpack.c.bf16 %v714_v0, %v714_v0  ;;  %v699_v8 = vadd.f32 %v6470_v41, %v677_v7  ;;  %v1049_v54 = vadd.f32 %v6470_v41, %v1047_v9  ;;  %v977_v57 = vld [vmem:[#allocation2 + $0x54] sm:$0xf]  ;;  %v988_v7 = vld [vmem:[#allocation2 + $0x68] sm:$0x1] }
 0x1c6   : > { %v868_v30 = vor.u32 %v866_v59, %v865_v2  ;;  %v870_v33 = vrot.slane %v865_v2, 4  ;;  %v851_v17 = vor.u32 %v849_v61, %v848_v11  ;;  %v853_v36 = vrot.slane %v848_v11, 4 }
 0x1c7   : > { %v889_v62 = vshrl.u32 %v4744_v16, 16  ;;  %v892_v39 = vshll.u32 %v4744_v16, 16  ;;  %v872_v43 = vshrl.u32 %v4742_v29, 16  ;;  %v875_v45 = vshll.u32 %v4742_v29, 16  ;;  %v981_v29 = vld [vmem:[#allocation2 + $0x5c] sm:$0x1] }
 0x1c8   : > { %v869_v3 = vsel %vm6492_vm7, %v861_v48, %v868_v30  ;;  %v975_v42 = vsel %vm6498_vm8, %v870_v33, %v974_v10  ;;  %v852_v46 = vsel %vm6492_vm7, %v844_v50, %v851_v17  ;;  %v968_v47 = vsel %vm6498_vm8, %v853_v36, %v967_v35 }
 0x1c9   : > { %973 = vst [vmem:[#allocation2 + $0x4c] sm:$0xf] %v869_v3  ;;  %976 = vst [vmem:[#allocation2 + $0x50] sm:$0x1] %v975_v42  ;;  %v891_v49 = vrot.slane %v889_v62, 7  ;;  %v717_v51 = vmax.f32 %v701_v24, 0.0  ;;  %v1050_v55 = vadd.f32 %v6470_v41, %v1048_v23 }
 0x1ca   : > { %966 = vst [vmem:[#allocation2 + $0x40] sm:$0xf] %v852_v46  ;;  %969 = vst [vmem:[#allocation2 + $0x44] sm:$0x1] %v968_v47  ;;  %v874_v53 = vrot.slane %v872_v43, 7  ;;  %v715_v48 = vmax.f32 %v699_v8, 0.0 }
 0x1cb   : > { %v894_v56 = vor.u32 %v892_v39, %v891_v49  ;;  %v4745_v34 = vpack.c.bf16 %v717_v51, %v717_v51  ;;  %v1051_v50 = vmax.f32 %v1049_v54, 0.0  ;;  %v1052_v61 = vmax.f32 %v1050_v55, 0.0 }
 0x1cc   : > { %v877_v58 = vor.u32 %v875_v45, %v874_v53  ;;  %v4743_v59 = vpack.c.bf16 %v715_v48, %v715_v48  ;;  %v895_v1 = vrot.slane %v891_v49, 4  ;;  %v878_v23 = vrot.slane %v874_v53, 4 }
 0x1cd   : > { %v985_v60 = vsel %vm6485_vm6, %v894_v56, %v984_v52  ;;  %v897_v38 = vshrl.u32 %v4745_v34, 16  ;;  %v900_v4 = vshll.u32 %v4745_v34, 16  ;;  %v4746_v51 = vpack.c.bf16 (!%p4535_p9), %v1051_v50, %v1051_v50  ;;  %v1132_v34 = vld [vmem:[#allocation2] sm:$0xf] (!%p4535_p9) }
 0x1ce   : > { %986 = vst [vmem:[#allocation2 + $0x60] sm:$0xf] %v985_v60  ;;  %v978_v63 = vsel %vm6485_vm6, %v877_v58, %v977_v57  ;;  %v880_v0 = vshrl.u32 %v4743_v59, 16  ;;  %v883_v10 = vshll.u32 %v4743_v59, 16  ;;  %v4747_v52 = vpack.c.bf16 (!%p4535_p9), %v1052_v61, %v1052_v61 }
 0x1cf   : > { %979 = vst [vmem:[#allocation2 + $0x54] sm:$0xf] %v978_v63  ;;  %v899_v2 = vrot.slane %v897_v38, 7  ;;  %v1113_v53 = vshrl.u32 (!%p4535_p9), %v4746_v51, 16  ;;  %v1116_v48 = vshll.u32 (!%p4535_p9), %v4746_v51, 16 }
 0x1d0   : > { %v882_v9 = vrot.slane %v880_v0, 7  ;;  %v1121_v54 = vshrl.u32 (!%p4535_p9), %v4747_v52, 16  ;;  %v1124_v55 = vshll.u32 (!%p4535_p9), %v4747_v52, 16 }
 0x1d1   : > { %v902_v11 = vor.u32 %v900_v4, %v899_v2  ;;  %v904_v16 = vrot.slane %v899_v2, 4  ;;  %v1115_v56 = vrot.slane (!%p4535_p9), %v1113_v53, 7 }
 0x1d2   : > { %v885_v30 = vor.u32 %v883_v10, %v882_v9  ;;  %v887_v33 = vrot.slane %v882_v9, 4  ;;  %v1123_v57 = vrot.slane (!%p4535_p9), %v1121_v54, 7 }
 0x1d3   : > { %v903_v35 = vsel %vm6492_vm7, %v895_v1, %v902_v11  ;;  %v989_v24 = vsel %vm6498_vm8, %v904_v16, %v988_v7  ;;  %v1118_v58 = vor.u32 (!%p4535_p9), %v1116_v48, %v1115_v56  ;;  %v1119_v59 = vrot.slane (!%p4535_p9), %v1115_v56, 4 }
 0x1d4   : > { %987 = vst [vmem:[#allocation2 + $0x64] sm:$0xf] %v903_v35  ;;  %990 = vst [vmem:[#allocation2 + $0x68] sm:$0x1] %v989_v24  ;;  %v886_v8 = vsel %vm6492_vm7, %v878_v23, %v885_v30  ;;  %v982_v17 = vsel %vm6498_vm8, %v887_v33, %v981_v29  ;;  %v1126_v60 = vor.u32 (!%p4535_p9), %v1124_v55, %v1123_v57 }
 0x1d5   : > { %980 = vst [vmem:[#allocation2 + $0x58] sm:$0xf] %v886_v8  ;;  %983 = vst [vmem:[#allocation2 + $0x5c] sm:$0x1] %v982_v17  ;;  %v1133_v38 = vsel (!%p4535_p9), %vm6485_vm6, %v1118_v58, %v1132_v34 }
 0x1d6   : > { %v1127_v63 = vsel (!%p4535_p9), %vm6492_vm7, %v1119_v59, %v1126_v60  ;;  %1134 = vst [vmem:[#allocation2] sm:$0xf] (!%p4535_p9), %v1133_v38 }
 0x1d7   : > { %1135 = vst [vmem:[#allocation2 + $0x4] sm:$0xf] (!%p4535_p9), %v1127_v63 }
 0x1df   : > { %v1089_v36 = vpop.f32.mrb[20].mxu0 }
 0x1e0   : > { %v1096_v62 = vmul.f32 %v6465_v40, %v1089_v36  ;;  %v5015_v39 = vpop.f32.mrb[21].mxu0  ;;  %1106 = sbr.rel (%p4535_p9) target bundleno = 488 (0x1e8), region = 80 }
 0x1e1   : > { %v1092_v3 = vpop.f32.mrb[22].mxu0 }
 0x1e2   : > { %v1098_v42 = vadd.f32 %v6470_v41, %v1096_v62  ;;  %v1097_v43 = vmul.f32 %v6465_v40, %v1092_v3  ;;  %v5016_v45 = vpop.f32.mrb[23].mxu0  ;;  %v1136_v40 = vld [vmem:[#allocation2 + $0x8] sm:$0x1] (!%p4535_p9) }
 0x1e4   : > { %v1100_v46 = vmax.f32 %v1098_v42, 0.0  ;;  %v1099_v47 = vadd.f32 %v6470_v41, %v1097_v43  ;;  %v1128_v41 = vrot.slane (!%p4535_p9), %v1123_v57, 4 }
 0x1e6   : > { %v1101_v49 = vmax.f32 %v1099_v47, 0.0  ;;  %v1137_v50 = vsel (!%p4535_p9), %vm6498_vm8, %v1128_v41, %v1136_v40 }
 0x1e7   : > { %1138 = vst [vmem:[#allocation2 + $0x8] sm:$0x1] %v1137_v50 }
 0x1e8 PF: > { %p4538_p5 = scmp.ge.s32.totalorder %s5960_s19, 1 }
 0x1e9   : > { %v4748_v61 = vpack.c.bf16 (!%p4538_p5), %v1100_v46, %v1100_v46  ;;  %v4749_v0 = vpack.c.bf16 (!%p4538_p5), %v1101_v49, %v1101_v49  ;;  %v1169_v11 = vld [vmem:[#allocation2 + $0x6c] sm:$0xf] (!%p4538_p5)  ;;  %v1173_v16 = vld [vmem:[#allocation2 + $0x74] sm:$0x1] (!%p4538_p5) }
 0x1ea   : > { %1142 = sbr.rel (%p4538_p5) target bundleno = 500 (0x1f4), region = 84 }
 0x1eb   : > { %v1149_v1 = vshrl.u32 (!%p4538_p5), %v4748_v61, 16  ;;  %v1152_v2 = vshll.u32 (!%p4538_p5), %v4748_v61, 16  ;;  %v1157_v4 = vshrl.u32 (!%p4538_p5), %v4749_v0, 16  ;;  %v1160_v7 = vshll.u32 (!%p4538_p5), %v4749_v0, 16 }
 0x1ed   : > { %v1151_v9 = vrot.slane (!%p4538_p5), %v1149_v1, 7  ;;  %v1159_v10 = vrot.slane (!%p4538_p5), %v1157_v4, 7 }
 0x1ef   : > { %v1154_v29 = vor.u32 (!%p4538_p5), %v1152_v2, %v1151_v9  ;;  %v1155_v23 = vrot.slane (!%p4538_p5), %v1151_v9, 4  ;;  %v1162_v30 = vor.u32 (!%p4538_p5), %v1160_v7, %v1159_v10  ;;  %v1164_v33 = vrot.slane (!%p4538_p5), %v1159_v10, 4 }
 0x1f1   : > { %v1170_v35 = vsel %vm6485_vm6, %v1154_v29, %v1169_v11  ;;  %v1163_v24 = vsel %vm6492_vm7, %v1155_v23, %v1162_v30  ;;  %v1174_v8 = vsel %vm6498_vm8, %v1164_v33, %v1173_v16 }
 0x1f2   : > { %1171 = vst [vmem:[#allocation2 + $0x6c] sm:$0xf] %v1170_v35  ;;  %1172 = vst [vmem:[#allocation2 + $0x70] sm:$0xf] %v1163_v24 }
 0x1f3   : > { %1175 = vst [vmem:[#allocation2 + $0x74] sm:$0x1] %v1174_v8 }
 0x1f4 PF: > { %v5615_v17 = vld [vmem:[#allocation8 + $0x80] sm:$0xff]   ;;  %v5616_v36 = vld [vmem:[#allocation8 + $0x88] sm:$0xff]   ;;  %v5617_v62 = vld [vmem:[#allocation8 + $0x90] sm:$0xff]   ;;  %vm1822_vm9 = vcmask 1042432   ;;  %vm1823_vm10 = vcmask 1046532   ;;  %s7617_s2 = sld [smem:[#allocation49_spill]] }
 0x1f5   : > { %5081 = vmatprep.subr.bf16.mxu1 %v5615_v17  ;;  %v5618_v18 = vld [vmem:[#allocation8 + $0x98] sm:$0xff]   ;;  %v6603_v37 = vld [vmem:[#allocation2 + $0x4] sm:$0xf]  ;;  %v6605_v39 = vld [vmem:[#allocation2 + $0x8] sm:$0x1]  ;;  %s7618_s10 = sld [smem:[#allocation50_spill]] }
 0x1f6   : > { %5082 = vmatpush3.bf16.msra.mxu1 %v5615_v17  ;;  %v1798_v44 = vld [vmem:[#allocation2] sm:$0xe]  ;;  %vm6607_vm11 = vmor %vm1822_vm9, %vm1823_vm10  ;;  %v1827_v43 = vrot.slane %v6603_v37, 5  ;;  %v1830_v45 = vrot.slane %v6605_v39, 5  ;;  %v5619_v49 = vld [vmem:[#allocation8 + $0xa0] sm:$0xff]   ;;  %s7619_s27 = sld [smem:[#allocation51_spill]] }
 0x1f7   : > { %5083 = vmatprep.subr.bf16.mxu1 %v5616_v36  ;;  %v4573_v42 = vrot.slane %v1798_v44, 9  ;;  %v5620_v53 = vld [vmem:[#allocation8 + $0xa8] sm:$0xff]   ;;  %v6617_v48 = vld [vmem:[#allocation2 + $0x10] sm:$0xf]  ;;  %v1799_v54 = vld [vmem:[#allocation2 + $0xc] sm:$0xe] }
 0x1f8   : > { %v1829_v47 = vrot.slane %v1827_v43, 4  ;;  %v6619_v55 = vld [vmem:[#allocation2 + $0x1c] sm:$0xf]  ;;  %v6621_v56 = vld [vmem:[#allocation2 + $0x14] sm:$0x1]  ;;  %v1834_v57 = vrot.slane %v6617_v48, 5 }
 0x1f9   : > { %v1828_v46 = vsel %vm6607_vm11, %v4573_v42, %v1827_v43  ;;  %v1183_v34 = vld [vmem:[#allocation2 + $0x28] sm:$0xf]  ;;  %v4574_v58 = vrot.slane %v1799_v54, 9  ;;  %v6624_v59 = vld [vmem:[#allocation2 + $0x20] sm:$0x1]  ;;  %v1841_v60 = vrot.slane %v6619_v55, 5 }
 0x1fa   : > { %5084 = vmatpush3.bf16.msra.mxu1 %v5616_v36  ;;  %v1831_v51 = vsel %vm6607_vm11, %v1829_v47, %v1830_v45  ;;  %v5621_v40 = vld [vmem:[#allocation8 + $0xb0] sm:$0xff]   ;;  %7597 = vst [vmem:[#allocation36_spill] sm:$0xff] %v6624_v59  ;;  %v1800_v41 = vld [vmem:[#allocation2 + $0x18] sm:$0xe]  ;;  %v1801_v38 = vld [vmem:[#allocation2 + $0x24] sm:$0xe] }
 0x1fb   : > { %5085 = vmatprep.subr.bf16.mxu1 %v5617_v62  ;;  %v4581_v52 = vcombine.low %v1828_v46, %v1831_v51  ;;  %v5622_v63 = vld [vmem:[#allocation8 + $0xb8] sm:$0xff]   ;;  %v1837_v50 = vrot.slane %v6621_v56, 5  ;;  %v1848_v61 = vrot.slane %v1183_v34, 5  ;;  %v1836_v0 = vrot.slane %v1834_v57, 4  ;;  %v1211_v2 = vld [vmem:[#allocation2 + $0x2c] sm:$0x1] }
 0x1fc   : > { %v1844_v1 = vrot.slane %v6624_v59, 5  ;;  %v4575_v4 = vrot.slane %v1800_v41, 9  ;;  %v1843_v7 = vrot.slane %v1841_v60, 4  ;;  %v1185_v9 = vld [vmem:[#allocation2 + $0x34] sm:$0xf]  ;;  %v4576_v11 = vrot.slane %v1801_v38, 9 }
 0x1fd   : > { %5097 = vmatprep.mubr.bf16.mxu1 %v4581_v52  ;;  %v1212_v10 = vld [vmem:[#allocation2 + $0x38] sm:$0x1]  ;;  %v1850_v29 = vrot.slane %v1848_v61, 4  ;;  %v1851_v23 = vrot.slane %v1211_v2, 5  ;;  %v1802_v30 = vld [vmem:[#allocation2 + $0x30] sm:$0xe]  ;;  %v1835_v33 = vsel %vm6607_vm11, %v4574_v58, %v1834_v57  ;;  %v1838_v35 = vsel %vm6607_vm11, %v1836_v0, %v1837_v50 }
 0x1fe   : > { %5086 = vmatpush3.bf16.msra.mxu1 %v5617_v62  ;;  %v5623_v16 = vld [vmem:[#allocation8 + $0xc0] sm:$0xff]   ;;  %v1855_v24 = vrot.slane %v1185_v9, 5  ;;  %v1858_v8 = vrot.slane %v1212_v10, 5  ;;  %v1842_v17 = vsel %vm6607_vm11, %v4575_v4, %v1841_v60  ;;  %v1845_v36 = vsel %vm6607_vm11, %v1843_v7, %v1844_v1  ;;  %v1187_v62 = vld [vmem:[#allocation2 + $0x40] sm:$0xf]  ;;  %v5626_v1 = vld [vmem:[#allocation8 + $0xd8] sm:$0xff]  }
 0x1ff   : > { %5087 = vmatprep.subr.bf16.mxu1 %v5618_v18  ;;  %v5624_v44 = vld [vmem:[#allocation8 + $0xc8] sm:$0xff]   ;;  %v1803_v43 = vld [vmem:[#allocation2 + $0x3c] sm:$0xe]  ;;  %v4583_v45 = vcombine.low %v1842_v17, %v1845_v36  ;;  %v4577_v46 = vrot.slane %v1802_v30, 9  ;;  %v1862_v52 = vrot.slane %v1187_v62, 5  ;;  %v1849_v57 = vsel %vm6607_vm11, %v4576_v11, %v1848_v61  ;;  %v5659_v21 = vld [vmem:[#allocation8 + $0x50] sm:$0xff]  }
 0x200   : > { %v1213_v42 = vld [vmem:[#allocation2 + $0x44] sm:$0x1]  ;;  %v1857_v47 = vrot.slane %v1855_v24, 4  ;;  %v4578_v51 = vrot.slane %v1803_v43, 9  ;;  %v1214_v54 = vld [vmem:[#allocation2 + $0x50] sm:$0x1]  ;;  %v1852_v34 = vsel %vm6607_vm11, %v1850_v29, %v1851_v23 }
 0x201   : > { %v1856_v60 = vsel %vm6607_vm11, %v4577_v46, %v1855_v24  ;;  %v1804_v38 = vld [vmem:[#allocation2 + $0x48] sm:$0xe]  ;;  %v1872_v50 = vrot.slane %v1214_v54, 5  ;;  %v4584_v0 = vcombine.low %v1849_v57, %v1852_v34  ;;  %v1191_v2 = vld [vmem:[#allocation2 + $0x58] sm:$0xf]  ;;  %v1229_v10 = vshll.u32 %v6603_v37, 16 }
 0x202   : > { %5088 = vmatpush3.bf16.msra.mxu1 %v5618_v18  ;;  %v4582_v18 = vcombine.low %v1835_v33, %v1838_v35  ;;  %v1859_v41 = vsel %vm6607_vm11, %v1857_v47, %v1858_v8  ;;  %v4579_v4 = vrot.slane %v1804_v38, 9  ;;  %v1215_v9 = vld [vmem:[#allocation2 + $0x5c] sm:$0x1]  ;;  %v1233_v11 = vshrl.u32 %v6603_v37, 16  ;;  %v1805_v29 = vld [vmem:[#allocation2 + $0x54] sm:$0xe] }
 0x203   : > { %5089 = vmatprep.subr.bf16.mxu1 %v5619_v49  ;;  %v4585_v61 = vcombine.low %v1856_v60, %v1859_v41  ;;  %v1863_v23 = vsel %vm6607_vm11, %v4578_v51, %v1862_v52  ;;  %v5627_v33 = vld [vmem:[#allocation8 + $0xe0] sm:$0xff]   ;;  %v6655_v37 = vrot.slane %v1229_v10, 5  ;;  %v4580_v17 = vrot.slane %v1805_v29, 9  ;;  %v5628_v43 = vld [vmem:[#allocation8 + $0xe8] sm:$0xff]   ;;  %v2342_v10 = vld [vmem:[#allocation2 + $0x30] sm:$0xf] }
 0x204   : > { %v1235_v8 = vrot.slane %v1233_v11, 4  ;;  %v1879_v62 = vrot.slane %v1215_v9, 5  ;;  %v1253_v46 = vshll.u32 %v6617_v48, 16  ;;  %v1257_v51 = vshrl.u32 %v6617_v48, 16  ;;  %v2336_v54 = vld [vmem:[#allocation2 + $0x18] sm:$0xf] }
 0x205   : > { %7598 = vst [vmem:[#allocation37_spill] sm:$0xff] %v6655_v37  ;;  %v5631_v48 = vld [vmem:[#allocation2 + $0xc] sm:$0xff]   ;;  %v2385_v9 = vshll.u32 %v2336_v54, 16  ;;  %vm1216_vm12 = vsmask.f32 3328  ;;  %v5657_v28 = vld [vmem:[#allocation8 + $0x48] sm:$0xff]  }
 0x206   : > { %5090 = vmatpush3.bf16.msra.mxu1 %v5619_v49  ;;  %v1189_v49 = vld [vmem:[#allocation2 + $0x4c] sm:$0xf]  ;;  %v6673_v41 = vrot.slane %v1253_v46, 5  ;;  %vm1217_vm13 = vsmask.f32 7440  ;;  %s7620_s20 = sld [smem:[#allocation52_spill]] }
 0x207   : > { %5091 = vmatprep.subr.bf16.mxu1 %v5620_v53  ;;  %v1869_v58 = vrot.slane %v1189_v49, 5  ;;  %v6694_v46 = vld [vmem:[#allocation2 + $0x2c] sm:$0x1]  ;;  %v6735_v27 = vld [vmem:[#allocation2 + $0x44] sm:$0x1]  ;;  %vm6756_vm14 = vmor %vm1216_vm12, %vm1217_vm13  ;;  %s7629_s13 = sld [smem:[#allocation17_spill]] }
 0x208   : > { %7601 = vst [vmem:[#allocation40_spill] sm:$0xff] %v6735_v27  ;;  %v6742_v22 = vld [vmem:[#allocation2 + $0x4c] sm:$0xf]  ;;  %v2473_v15 = vshll.u32 %v6735_v27, 16  ;;  %v6765_v12 = vld [vmem:[#allocation2 + $0x50] sm:$0x1] }
 0x209   : > { %v1871_v7 = vrot.slane %v1869_v58, 4  ;;  %v1870_v35 = vsel %vm6607_vm11, %v4579_v4, %v1869_v58  ;;  %v2339_v58 = vld [vmem:[#allocation2 + $0x24] sm:$0xf]  ;;  %7602 = vst [vmem:[#allocation41_spill] sm:$0xff] %v6742_v22  ;;  %v5717_v3 = vld [vmem:[#allocation9 + $0x30] sm:$0xff]   ;;  %s4750_s29 = sshll.u32 %s5960_s19, 4 }
 0x20a   : > { %5092 = vmatpush3.bf16.msra.mxu1 %v5620_v53  ;;  %v5625_v53 = vld [vmem:[#allocation8 + $0xd0] sm:$0xff]   ;;  %v2406_v29 = vshrl.u32 %v2339_v58, 16  ;;  %s4366_s11 = sshll.u32 %s6587_s12, 4  ;;  %s7435_s16 = scalar_lea.sflag [#allocation5], %s433_s4  ;;  %s7428_s11 = int_to_ptr.vmem [resolvable:$true] %s4366_s11 }
 0x20b   : > { %5093 = vmatprep.subr.bf16.mxu1 %v5621_v40  ;;  %v1873_v24 = vsel %vm6607_vm11, %v1871_v7, %v1872_v50  ;;  %v6675_v50 = vld [vmem:[#allocation2 + $0x28] sm:$0xf]  ;;  %v2382_v7 = vshrl.u32 %v2336_v54, 16  ;;  %s5989_s6 = smov [#allocation11]  }
 0x20c   : > { %s5850_s1 = sshll.u32 %s5989_s6, 4  ;;  %s5851_s1 = int_to_ptr.vmem [resolvable:$false] %s5850_s1 }
 0x20d   : > { %s4724_s28 = sshll.u32 %s7629_s13, 5  ;;  %p5853_p4 = scmp.lt.s32.totalorder %s7428_s11, %s5851_s1 }
 0x20e   : > { %5094 = vmatpush3.bf16.msra.mxu1 %v5621_v40  ;;  %v1865_v40 = vrot.slane %v1213_v42, 5  ;;  %v1239_v42 = vshll.u32 %v6605_v39, 16  ;;  %v6665_v39 = vld [vmem:[#allocation2 + $0x10] sm:$0xf]  ;;  %s4363_s19 = sadd.s32 %s4750_s29, %s4724_s28 }
 0x20f   : > { %5095 = vmatprep.subr.bf16.mxu1 %v5622_v63  ;;  %v2371_v4 = vshrl.u32 %v6665_v39, 16  ;;  %s4725_s26 = sshll.u32 %s4363_s19, 7 }
 0x210   : > { %v6667_v57 = vrot.slane %v1239_v42, 5  ;;  %v2387_v42 = vrot.slane %v2385_v9, 5 }
 0x212   : > { %5096 = vmatpush3.bf16.msra.mxu1 %v5622_v63  ;;  %v1864_v63 = vrot.slane %v1862_v52, 4  ;;  %v2333_v52 = vld [vmem:[#allocation2 + $0xc] sm:$0xf] }
 0x213   : > { %5113 = vmatprep.subr.bf16.mxu1 %v5623_v16  ;;  %v2358_v38 = vshrl.u32 %v2333_v52, 16 }
 0x214   : > { %v1866_v30 = vsel %vm6607_vm11, %v1864_v63, %v1865_v40  ;;  %v6669_v40 = vld [vmem:[#allocation2 + $0x1c] sm:$0xf]  ;;  %v2361_v63 = vshll.u32 %v2333_v52, 16 }
 0x215   : > { %5098 = vmatmul.mubr.bf16.vlgmr.msra.gmra.mrb[0].mxu1 %v4582_v18  ;;  %v4586_v18 = vcombine.low %v1863_v23, %v1866_v30  ;;  %v2391_v11 = vshll.u32 %v6669_v40, 16  ;;  %v2409_v23 = vshll.u32 %v2339_v58, 16  ;;  %v2415_v30 = vshll.u32 %v6675_v50, 16 }
 0x216   : > { %5114 = vmatpush3.bf16.msra.mxu1 %v5623_v16  ;;  %5101 = vmatprep.mubr.bf16.mxu1 %v4583_v45  ;;  %v1876_v16 = vrot.slane %v1191_v2, 5  ;;  %v1236_v45 = vor.u32 %v1235_v8, %v6655_v37  ;;  %v5630_v2 = vld [vmem:[#allocation8 + $0xf8] sm:$0xff]   ;;  %v2360_v8 = vrot.slane %v2358_v38, 4  ;;  %v5663_v37 = vld [vmem:[#allocation8 + $0x60] sm:$0xff]  }
 0x217   : > { %5115 = vmatprep.subr.bf16.mxu1 %v5624_v44  ;;  %v2411_v52 = vrot.slane %v2409_v23, 5  ;;  %v6696_v54 = vrot.slane %v2415_v30, 5  ;;  %v6699_v38 = vld [vmem:[#allocation2 + $0x34] sm:$0xf]  ;;  %v2345_v30 = vld [vmem:[#allocation2 + $0x3c] sm:$0xf] }
 0x218   : > { %v1878_v36 = vrot.slane %v1876_v16, 4  ;;  %v1877_v47 = vsel %vm6607_vm11, %v4580_v17, %v1876_v16  ;;  %v6671_v60 = vrot.slane %v1236_v45, 4  ;;  %v2395_v16 = vshrl.u32 %v6669_v40, 16 }
 0x219   : > { %v2363_v17 = vrot.slane %v2361_v63, 5 }
 0x21a   : > { %5116 = vmatpush3.bf16.msra.mxu1 %v5624_v44  ;;  %v4587_v44 = vcombine.low %v1870_v35, %v1873_v24  ;;  %v1880_v49 = vsel %vm6607_vm11, %v1878_v36, %v1879_v62  ;;  %v2430_v35 = vshrl.u32 %v2342_v10, 16  ;;  %v2433_v24 = vshll.u32 %v2342_v10, 16 }
 0x21b   : > { %5117 = vmatprep.subr.bf16.mxu1 %v5625_v53  ;;  %v4588_v34 = vcombine.low %v1877_v47, %v1880_v49  ;;  %v2373_v62 = vrot.slane %v2371_v4, 4  ;;  %v2397_v45 = vrot.slane %v2395_v16, 4  ;;  %v5632_v47 = vld [vmem:[#allocation2 + $0x18] sm:$0xff]   ;;  %v5635_v4 = vld [vmem:[#allocation2 + $0x24] sm:$0xff]  }
 0x21c   : > { %v5633_v49 = vld [vmem:[#allocation8 + $0x100] sm:$0xff]  }
 0x21d   : > { %5102 = vmatmul.mubr.bf16.gmra.mrb[4].mxu1 %v4584_v0  ;;  %v6677_v0 = vrot.slane %v1257_v51, 4  ;;  %v2408_v51 = vrot.slane %v2406_v29, 4  ;;  %v6706_v16 = vld [vmem:[#allocation2 + $0x38] sm:$0x1] }
 0x21e   : > { %5118 = vmatpush3.bf16.msra.mxu1 %v5625_v53  ;;  %5105 = vmatprep.mubr.bf16.mxu1 %v4585_v61  ;;  %v5629_v53 = vld [vmem:[#allocation8 + $0xf0] sm:$0xff]   ;;  %v2367_v61 = vshll.u32 %v6665_v39, 16 }
 0x21f   : > { %5119 = vmatprep.subr.bf16.mxu1 %v5626_v1 }
 0x220   : > { %v6688_v36 = vrot.slane %v2367_v61, 5  ;;  %v5634_v61 = vld [vmem:[#allocation8 + $0x108] sm:$0xff]  }
 0x222   : > { %5120 = vmatpush3.bf16.msra.mxu1 %v5626_v1  ;;  %v1263_v1 = vshll.u32 %v6621_v56, 16  ;;  %v2419_v56 = vshrl.u32 %v6675_v50, 16  ;;  %v2374_v9 = vor.u32 %v2373_v62, %v6688_v36  ;;  %v2443_v62 = vshrl.u32 %v6699_v38, 16 }
 0x223   : > { %5121 = vmatprep.subr.bf16.mxu1 %v5627_v33 }
 0x224   : > { %v6701_v63 = vrot.slane %v1263_v1, 5 }
 0x225   : > { %5106 = vmatmul.mubr.bf16.gmra.mrb[8].mxu1 %v4586_v18  ;;  %v6690_v18 = vld [vmem:[#allocation2 + $0x20] sm:$0x1] }
 0x226   : > { %5122 = vmatpush3.bf16.msra.mxu1 %v5627_v33  ;;  %5109 = vmatprep.mubr.bf16.mxu1 %v4587_v44  ;;  %v6686_v33 = vld [vmem:[#allocation2 + $0x14] sm:$0x1]  ;;  %v2384_v44 = vrot.slane %v2382_v7, 4  ;;  %7599 = vst [vmem:[#allocation38_spill] sm:$0xff] %v6701_v63  ;;  %v2364_v7 = vor.u32 %v2363_v17, %v2360_v8  ;;  %v2401_v10 = vshll.u32 %v6690_v18, 16  ;;  %v5642_v63 = vld [vmem:[#allocation8 + $0x128] sm:$0xff]  }
 0x227   : > { %5123 = vmatprep.subr.bf16.mxu1 %v5628_v43  ;;  %v2377_v58 = vshll.u32 %v6686_v33, 16 }
 0x228   : > { %v2388_v29 = vor.u32 %v2387_v42, %v2384_v44  ;;  %v5637_v44 = vld [vmem:[#allocation8 + $0x110] sm:$0xff]   ;;  %v6715_v42 = vrot.slane %v2364_v7, 4  ;;  %v5636_v7 = vld [vmem:[#allocation2 + $0x30] sm:$0xff]  }
 0x229   : > { %v6711_v8 = vrot.slane %v2377_v58, 5 }
 0x22a   : > { %5124 = vmatpush3.bf16.msra.mxu1 %v5628_v43  ;;  %v6692_v43 = vrot.slane %v2391_v11, 5  ;;  %v2425_v11 = vshll.u32 %v6694_v46, 16  ;;  %v6723_v58 = vrot.slane %v2388_v29, 4 }
 0x22b   : > { %5125 = vmatprep.subr.bf16.mxu1 %v5629_v53 }
 0x22c   : > { %v2398_v23 = vor.u32 %v2397_v45, %v6692_v43  ;;  %v6717_v45 = vrot.slane %v2374_v9, 4 }
 0x22d   : > { %5110 = vmatmul.mubr.bf16.gmra.mrb[12].mxu1 %v4588_v34  ;;  %v2421_v34 = vrot.slane %v2419_v56, 4  ;;  %v2412_v56 = vor.u32 %v2411_v52, %v2408_v51  ;;  %v6719_v51 = vrot.slane %v2401_v10, 5  ;;  %v6721_v52 = vld [vmem:[#allocation2 + $0x40] sm:$0xf] }
 0x22e   : > { %5126 = vmatpush3.bf16.msra.mxu1 %v5629_v53  ;;  %5129 = vmatprep.mubr.bf16.mxu1 %v5631_v48  ;;  %v2432_v53 = vrot.slane %v2430_v35, 4  ;;  %v2435_v48 = vrot.slane %v2433_v24, 5  ;;  %v2439_v35 = vshll.u32 %v6699_v38, 16  ;;  %v5655_v24 = vld [vmem:[#allocation8 + $0x40] sm:$0xff]   ;;  %7600 = vst [vmem:[#allocation39_spill] sm:$0xff] %v6721_v52  ;;  %v2463_v31 = vshll.u32 %v6721_v52, 16 }
 0x22f   : > { %5127 = vmatprep.subr.bf16.mxu1 %v5630_v2  ;;  %v2422_v1 = vor.u32 %v2421_v34, %v6696_v54  ;;  %v2454_v34 = vshrl.u32 %v2345_v30, 16  ;;  %5017 = vmatprep.subr.bf16.mxu0 %v5655_v24  ;;  %v6729_v9 = vrot.slane %v2412_v56, 4  ;;  %v5638_v56 = vld [vmem:[#allocation8 + $0x118] sm:$0xff]  }
 0x230   : > { %v2436_v17 = vor.u32 %v2435_v48, %v2432_v53  ;;  %v6725_v53 = vrot.slane %v2398_v23, 4  ;;  %v6727_v48 = vrot.slane %v2425_v11, 5  ;;  %v6733_v32 = vrot.slane %v2439_v35, 5  ;;  %5018 = vmatpush3.bf16.msra.mxu0 %v5655_v24 }
 0x231   : > { %v6731_v10 = vrot.slane %v2422_v1, 4  ;;  %v2445_v23 = vrot.slane %v2443_v62, 4  ;;  %5019 = vmatprep.subr.bf16.mxu0 %v5657_v28  ;;  %v2456_v1 = vrot.slane %v2454_v34, 4  ;;  %v2467_v35 = vshrl.u32 %v6721_v52, 16  ;;  %v6746_v62 = vld [vmem:[#allocation2 + $0x58] sm:$0xf] }
 0x232   : > { %5128 = vmatpush3.bf16.msra.mxu1 %v5630_v2  ;;  %v2449_v2 = vshll.u32 %v6706_v16, 16  ;;  %v6737_v29 = vrot.slane %v2436_v17, 4  ;;  %v2487_v17 = vshll.u32 %v6742_v22, 16  ;;  %7603 = vst [vmem:[#allocation42_spill] sm:$0xff] %v6746_v62  ;;  %v6748_v25 = vrot.slane %v2463_v31, 5  ;;  %v5661_v31 = vld [vmem:[#allocation8 + $0x58] sm:$0xff]  }
 0x233   : > { %5145 = vmatprep.subr.bf16.mxu1 %v5633_v49  ;;  %v2491_v34 = vshrl.u32 %v6742_v22, 16  ;;  %v2469_v19 = vrot.slane %v2467_v35, 4  ;;  %v2511_v13 = vshll.u32 %v6746_v62, 16  ;;  %v6763_v35 = vld [vmem:[#allocation2 + $0x64] sm:$0xf] }
 0x234   : > { %v6739_v11 = vrot.slane %v2449_v2, 5  ;;  %5020 = vmatpush3.bf16.msra.mxu0 %v5657_v28  ;;  %v2515_v28 = vshrl.u32 %v6746_v62, 16  ;;  %7606 = vst [vmem:[#allocation43_spill] sm:$0xff] %v6763_v35  ;;  %v6767_v22 = vld [vmem:[#allocation2 + $0x5c] sm:$0x1] }
 0x235   : > { %5130 = vmatmul.mubr.bf16.vlgmr.msra.gmra.mrb[0].mxu1 %v5632_v47  ;;  %v2348_v47 = vld [vmem:[#allocation2 + $0x48] sm:$0xf]  ;;  %5021 = vmatprep.subr.bf16.mxu0 %v5659_v21  ;;  %v2493_v62 = vrot.slane %v2491_v34, 4  ;;  %7607 = vst [vmem:[#allocation44_spill] sm:$0xff] %v6767_v22  ;;  %v6781_v34 = vrot.slane %v2473_v15, 5  ;;  %v2497_v15 = vshll.u32 %v6765_v12, 16 }
 0x236   : > { %5146 = vmatpush3.bf16.msra.mxu1 %v5633_v49  ;;  %5133 = vmatprep.mubr.bf16.mxu1 %v5635_v4  ;;  %v2457_v49 = vshll.u32 %v2345_v30, 16  ;;  %v5639_v4 = vld [vmem:[#allocation2 + $0x3c] sm:$0xff]   ;;  %v2478_v26 = vshrl.u32 %v2348_v47, 16  ;;  %v2351_v30 = vld [vmem:[#allocation2 + $0x54] sm:$0xf]  ;;  %v2481_v24 = vshll.u32 %v2348_v47, 16 }
 0x237   : > { %5147 = vmatprep.subr.bf16.mxu1 %v5634_v61  ;;  %v2502_v20 = vshrl.u32 %v2351_v30, 16  ;;  %v2505_v14 = vshll.u32 %v2351_v30, 16  ;;  %v5641_v47 = vld [vmem:[#allocation8 + $0x120] sm:$0xff]  }
 0x238   : > { %v2459_v2 = vrot.slane %v2457_v49, 5  ;;  %v2480_v6 = vrot.slane %v2478_v26, 4  ;;  %v5640_v49 = vld [vmem:[#allocation2 + $0x48] sm:$0xff]   ;;  %5022 = vmatpush3.bf16.msra.mxu0 %v5659_v21  ;;  %v5643_v26 = vld [vmem:[#allocation2 + $0x54] sm:$0xff]   ;;  %v2370_v21 = vsel %vm6756_vm14, %v6715_v42, %v6688_v36  ;;  %v2470_v36 = vor.u32 %v2469_v19, %v6748_v25 }
 0x239   : > { %5023 = vmatprep.subr.bf16.mxu0 %v5661_v31  ;;  %v2504_v52 = vrot.slane %v2502_v20, 4  ;;  %v2539_v20 = vshrl.u32 %v6763_v35, 16  ;;  %v6794_v19 = vld [vmem:[#allocation2 + $0xc] sm:$0xe] }
 0x23a   : > { %5148 = vmatpush3.bf16.msra.mxu1 %v5634_v61  ;;  %v2354_v61 = vld [vmem:[#allocation2 + $0x60] sm:$0xf]  ;;  %v2460_v30 = vor.u32 %v2459_v2, %v2456_v1  ;;  %v2380_v1 = vsel %vm6756_vm14, %v6717_v45, %v6711_v8 }
 0x23b   : > { %5149 = vmatprep.subr.bf16.mxu1 %v5637_v44  ;;  %v2526_v27 = vshrl.u32 %v2354_v61, 16  ;;  %v2529_v59 = vshll.u32 %v2354_v61, 16 }
 0x23c   : > { %5024 = vmatpush3.bf16.msra.mxu0 %v5661_v31 }
 0x23d   : > { %5134 = vmatmul.mubr.bf16.gmra.mrb[4].mxu1 %v5636_v7  ;;  %v2446_v7 = vor.u32 %v2445_v23, %v6733_v32  ;;  %v2507_v23 = vrot.slane %v2505_v14, 5  ;;  %v2535_v14 = vshll.u32 %v6763_v35, 16  ;;  %v2528_v42 = vrot.slane %v2526_v27, 4  ;;  %5025 = vmatprep.subr.bf16.mxu0 %v5663_v37  ;;  %v5644_v27 = vld [vmem:[#allocation2 + $0x60] sm:$0xff]  }
 0x23e   : > { %5150 = vmatpush3.bf16.msra.mxu1 %v5637_v44  ;;  %5137 = vmatprep.mubr.bf16.mxu1 %v5639_v4  ;;  %v2483_v44 = vrot.slane %v2481_v24, 5  ;;  %v6761_v4 = vrot.slane %v2487_v17, 5  ;;  %v6777_v24 = vrot.slane %v2511_v13, 5  ;;  %v2517_v17 = vrot.slane %v2515_v28, 4  ;;  %v5645_v13 = vld [vmem:[#allocation8 + $0x130] sm:$0xff]  }
 0x23f   : > { %5151 = vmatprep.subr.bf16.mxu1 %v5638_v56  ;;  %v6779_v2 = vrot.slane %v2446_v7, 4  ;;  %v2531_v61 = vrot.slane %v2529_v59, 5  ;;  %v2521_v28 = vshll.u32 %v6767_v22, 16  ;;  %v6791_v7 = vld [vmem:[#allocation2 + $0x68] sm:$0x1]  ;;  %v2508_v31 = vor.u32 %v2507_v23, %v2504_v52  ;;  %v5646_v23 = vld [vmem:[#allocation8 + $0x138] sm:$0xff]  }
 0x240   : > { %v2484_v8 = vor.u32 %v2483_v44, %v2480_v6  ;;  %v2494_v45 = vor.u32 %v2493_v62, %v6761_v4  ;;  %v6796_v59 = vrot.slane %v2535_v14, 5  ;;  %v2541_v6 = vrot.slane %v2539_v20, 4  ;;  %5026 = vmatpush3.bf16.msra.mxu0 %v5663_v37  ;;  %v5665_v20 = vld [vmem:[#allocation8 + $0x68] sm:$0xff]  }
 0x241   : > { %v4613_v62 = vcombine.low %v2370_v21, %v2380_v1  ;;  %v2532_v44 = vor.u32 %v2531_v61, %v2528_v42  ;;  %v2545_v35 = vshll.u32 %v6791_v7, 16  ;;  %v2499_v52 = vrot.slane %v2497_v15, 5  ;;  %v6811_v1 = vld [vmem:[#allocation2 + $0x18] sm:$0xe]  ;;  %5027 = vmatprep.subr.bf16.mxu0 %v5665_v20 }
 0x242   : > { %5152 = vmatpush3.bf16.msra.mxu1 %v5638_v56  ;;  %v6785_v56 = vrot.slane %v2460_v30, 4  ;;  %v2518_v30 = vor.u32 %v2517_v17, %v6777_v24  ;;  %v6799_v22 = vrot.slane %v2484_v8, 4  ;;  %v6805_v17 = vrot.slane %v2508_v31, 4  ;;  %v6832_v31 = vld [vmem:[#allocation2 + $0x24] sm:$0xe] }
 0x243   : > { %5153 = vmatprep.subr.bf16.mxu1 %v5641_v47  ;;  %v4629_v37 = vrot.slane %v6794_v19, 9  ;;  %v2793_v21 = vrot.slane %v6665_v39, 5  ;;  %v2796_v42 = vrot.slane %v6686_v33, 5  ;;  %v2800_v61 = vrot.slane %v6669_v40, 5 }
 0x244   : > { %v6807_v14 = vrot.slane %v2518_v30, 4  ;;  %v6818_v8 = vrot.slane %v2545_v35, 5  ;;  %v2404_v15 = vsel %vm6756_vm14, %v6725_v53, %v6719_v51  ;;  %5028 = vmatpush3.bf16.msra.mxu0 %v5665_v20  ;;  %v2442_v51 = vsel %vm6756_vm14, %v6737_v29, %v6733_v32  ;;  %v5667_v53 = vld [vmem:[#allocation8 + $0x70] sm:$0xff]   ;;  %v6865_v30 = vld [vmem:[#allocation2 + $0x30] sm:$0xe] }
 0x245   : > { %5138 = vmatmul.mubr.bf16.gmra.mrb[8].mxu1 %v5640_v49  ;;  %v2471_v49 = vrot.slane %v2470_v36, 4  ;;  %v2542_v36 = vor.u32 %v2541_v6, %v6796_v59  ;;  %v2803_v32 = vrot.slane %v6690_v18, 5  ;;  %v2466_v29 = vsel %vm6756_vm14, %v6785_v56, %v6748_v25  ;;  %5029 = vmatprep.subr.bf16.mxu0 %v5667_v53  ;;  %v5648_v6 = vld [vmem:[#allocation8 + $0x148] sm:$0xff]   ;;  %v5669_v56 = vld [vmem:[#allocation8 + $0x78] sm:$0xff]  }
 0x246   : > { %5154 = vmatpush3.bf16.msra.mxu1 %v5641_v47  ;;  %5141 = vmatprep.mubr.bf16.mxu1 %v5643_v26  ;;  %v6801_v47 = vrot.slane %v2494_v45, 4  ;;  %v6803_v26 = vrot.slane %v2521_v28, 5  ;;  %v2394_v45 = vsel %vm6756_vm14, %v6723_v58, %v6692_v43  ;;  %v2418_v28 = vsel %vm6756_vm14, %v6729_v9, %v6696_v54  ;;  %v5647_v9 = vld [vmem:[#allocation8 + $0x140] sm:$0xff]  }
 0x247   : > { %5155 = vmatprep.subr.bf16.mxu1 %v5642_v63  ;;  %v2428_v43 = vsel %vm6756_vm14, %v6731_v10, %v6727_v48  ;;  %v2452_v54 = vsel %vm6756_vm14, %v6779_v2, %v6739_v11  ;;  %v2795_v58 = vrot.slane %v2793_v21, 4  ;;  %v6848_v35 = vrot.slane %v2542_v36, 4 }
 0x248   : > { %v4630_v48 = vrot.slane %v6811_v1, 9  ;;  %v6853_v10 = vrot.slane %v2800_v61, 4  ;;  %v2476_v11 = vsel %vm6756_vm14, %v2471_v49, %v6781_v34  ;;  %v4631_v2 = vrot.slane %v6832_v31, 9  ;;  %5030 = vmatpush3.bf16.msra.mxu0 %v5667_v53 }
 0x249   : > { %v2500_v25 = vsel %vm6756_vm14, %v6801_v47, %v2499_v52  ;;  %v2810_v34 = vrot.slane %v6694_v46, 5  ;;  %v4615_v49 = vcombine.low %v2418_v28, %v2428_v43  ;;  %v1260_v1 = vor.u32 %v6677_v0, %v6673_v41  ;;  %5031 = vmatprep.subr.bf16.mxu0 %v5669_v56  ;;  %v6883_v52 = vld [vmem:[#allocation2] sm:$0xf]  ;;  %v6892_v0 = vld [vmem:[#allocation8] sm:$0xff]  }
 0x24a   : > { %5156 = vmatpush3.bf16.msra.mxu1 %v5642_v63  ;;  %v6816_v63 = vrot.slane %v2532_v44, 4  ;;  %v1242_v44 = vsel %vm6756_vm14, %v6671_v60, %v6667_v57  ;;  %v4632_v20 = vrot.slane %v6865_v30, 9  ;;  %v2814_v47 = vrot.slane %v6699_v38, 5  ;;  %v5687_v38 = vld [vmem:[#allocation8 + $0x28] sm:$0xff]  }
 0x24b   : > { %5157 = vmatprep.subr.bf16.mxu1 %v5645_v13  ;;  %v1223_v57 = vshll.u32 %v6883_v52, 16  ;;  %v2514_v28 = vsel %vm6756_vm14, %v6805_v17, %v6777_v24  ;;  %v2524_v43 = vsel %vm6756_vm14, %v6807_v14, %v6803_v26  ;;  %v6913_v24 = vsel %vm6607_vm11, %v4629_v37, %v2793_v21  ;;  %v5650_v37 = vld [vmem:[#allocation8 + $0x158] sm:$0xff]  }
 0x24c   : > { %5032 = vmatpush3.bf16.msra.mxu0 %v5669_v56  ;;  %v6919_v26 = vsel %vm6607_vm11, %v2795_v58, %v2796_v42  ;;  %v2817_v17 = vrot.slane %v6706_v16, 5  ;;  %v2538_v39 = vsel %vm6756_vm14, %v6816_v63, %v6796_v59  ;;  %v6933_v33 = vsel %vm6607_vm11, %v4630_v48, %v2800_v61  ;;  %v6943_v58 = vld [vmem:[#allocation2 + $0x3c] sm:$0xe]  ;;  %v7608_v63 = vld [vmem:[#allocation39_spill] sm:$0xff] }
 0x24d   : > { %5142 = vmatmul.mubr.bf16.gmra.mrb[12].mxu1 %v5644_v27  ;;  %v4614_v27 = vcombine.low %v2394_v45, %v2404_v15  ;;  %v1220_v45 = vshrl.u32 %v6883_v52, 16  ;;  %v5649_v15 = vld [vmem:[#allocation8 + $0x150] sm:$0xff]   ;;  %5049 = vmatprep.subr.bf16.mxu0 %v6892_v0  ;;  %v2548_v21 = vsel %vm6756_vm14, %v6848_v35, %v6818_v8  ;;  %v6941_v42 = vrot.slane %v2814_v47, 4  ;;  %v6952_v35 = vld [vmem:[#allocation2 + $0x18] sm:$0xf] }
 0x24e   : > { %5158 = vmatpush3.bf16.msra.mxu1 %v5645_v13  ;;  %5161 = vmatprep.mubr.bf16.mxu1 %v4613_v62  ;;  %v2807_v13 = vrot.slane %v6675_v50, 5  ;;  %v2490_v62 = vsel %vm6756_vm14, %v6799_v22, %v6761_v4  ;;  %v4616_v22 = vcombine.low %v2442_v51, %v2452_v54  ;;  %v4617_v4 = vcombine.low %v2466_v29, %v2476_v11 }
 0x24f   : > { %5159 = vmatprep.subr.bf16.mxu1 %v5646_v23  ;;  %v6887_v36 = vcombine.low %v2490_v62, %v2500_v25  ;;  %v1222_v53 = vrot.slane %v1220_v45, 4  ;;  %v1225_v29 = vrot.slane %v1223_v57, 5  ;;  %v1277_v40 = vshll.u32 %v6619_v55, 16  ;;  %v7609_v25 = vld [vmem:[#allocation38_spill] sm:$0xff]  ;;  %v7610_v45 = vld [vmem:[#allocation37_spill] sm:$0xff] }
 0x250   : > { %v6904_v51 = vrot.slane %v2807_v13, 4  ;;  %v4637_v61 = vcombine.low %v6913_v24, %v6919_v26  ;;  %v2821_v48 = vrot.slane %v7608_v63, 5 }
 0x251   : > { %v1226_v19 = vor.u32 %v1225_v29, %v1222_v53  ;;  %v6956_v55 = vrot.slane %v1277_v40, 5  ;;  %v5675_v40 = vld [vmem:[#allocation8 + $0x8] sm:$0xff]  }
 0x252   : > { %5160 = vmatpush3.bf16.msra.mxu1 %v5646_v23  ;;  %v6885_v23 = vld [vmem:[#allocation2 + $0xc] sm:$0xf] }
 0x253   : > { %5177 = vmatprep.subr.bf16.mxu1 %v5647_v9  ;;  %v1244_v60 = vshrl.u32 %v6885_v23, 16  ;;  %v1247_v54 = vshll.u32 %v6885_v23, 16  ;;  %v1227_v62 = vrot.slane %v1226_v19, 4  ;;  %v4633_v19 = vrot.slane %v6943_v58, 9 }
 0x255   : > { %5162 = vmatmul.mubr.bf16.vlgmr.msra.gmra.mrb[0].mxu1 %v4614_v27  ;;  %v1246_v11 = vrot.slane %v1244_v60, 4  ;;  %v1261_v27 = vrot.slane %v1260_v1, 4  ;;  %v1249_v14 = vrot.slane %v1247_v54, 5  ;;  %v1271_v1 = vshll.u32 %v6952_v35, 16  ;;  %v6963_v60 = vld [vmem:[#allocation2 + $0x1c] sm:$0xf] }
 0x256   : > { %5178 = vmatpush3.bf16.msra.mxu1 %v5647_v9  ;;  %5165 = vmatprep.mubr.bf16.mxu1 %v4615_v49  ;;  %v6923_v9 = vcombine.low %v2514_v28, %v2524_v43  ;;  %v1268_v49 = vshrl.u32 %v6952_v35, 16  ;;  %v1232_v57 = vsel %vm6756_vm14, %v1227_v62, %v7610_v45  ;;  %v1281_v28 = vshrl.u32 %v6963_v60, 16  ;;  %v7611_v43 = vld [vmem:[#allocation36_spill] sm:$0xff] }
 0x257   : > { %5179 = vmatprep.subr.bf16.mxu1 %v5648_v6  ;;  %v1250_v59 = vor.u32 %v1249_v14, %v1246_v11  ;;  %v1266_v8 = vsel %vm6756_vm14, %v1261_v27, %v7609_v25  ;;  %v1287_v54 = vshll.u32 %v7611_v43, 16  ;;  %v4541_v29 = vcombine.low %v1232_v57, %v1242_v44  ;;  %v5651_v45 = vld [vmem:[#allocation8 + $0x160] sm:$0xff]  }
 0x258   : > { %v1270_v27 = vrot.slane %v1268_v49, 4  ;;  %v1273_v14 = vrot.slane %v1271_v1, 5  ;;  %v1283_v62 = vrot.slane %v1281_v28, 4  ;;  %v5721_v49 = vld [vmem:[#allocation2 + $0x2c] sm:$0x1] }
 0x259   : > { %v1251_v56 = vrot.slane %v1250_v59, 4  ;;  %5033 = vmatprep.mubr.bf16.mxu0 %v4541_v29  ;;  %v1311_v1 = vshll.u32 %v5721_v49, 16 }
 0x25a   : > { %5180 = vmatpush3.bf16.msra.mxu1 %v5648_v6  ;;  %v6958_v6 = vld [vmem:[#allocation2 + $0x24] sm:$0xf]  ;;  %v1274_v43 = vor.u32 %v1273_v14, %v1270_v27  ;;  %v5723_v14 = vld [vmem:[#allocation2 + $0x38] sm:$0x1] }
 0x25b   : > { %5181 = vmatprep.subr.bf16.mxu1 %v5649_v15  ;;  %v1292_v53 = vshrl.u32 %v6958_v6, 16  ;;  %v1256_v11 = vsel %vm6756_vm14, %v1251_v56, %v6673_v41  ;;  %v1295_v44 = vshll.u32 %v6958_v6, 16 }
 0x25c   : > { %v4542_v59 = vcombine.low %v1256_v11, %v1266_v8  ;;  %v1289_v8 = vrot.slane %v1287_v54, 5  ;;  %v1275_v57 = vrot.slane %v1274_v43, 4  ;;  %v1313_v54 = vrot.slane %v1311_v1, 5 }
 0x25d   : > { %5166 = vmatmul.mubr.bf16.gmra.mrb[4].mxu1 %v4616_v22  ;;  %v1294_v25 = vrot.slane %v1292_v53, 4  ;;  %v6973_v22 = vld [vmem:[#allocation2 + $0x28] sm:$0xf]  ;;  %v1297_v28 = vrot.slane %v1295_v44, 5 }
 0x25e   : > { %5182 = vmatpush3.bf16.msra.mxu1 %v5649_v15  ;;  %5169 = vmatprep.mubr.bf16.mxu1 %v4617_v4  ;;  %v1301_v41 = vshll.u32 %v6973_v22, 16  ;;  %v1305_v56 = vshrl.u32 %v6973_v22, 16  ;;  %v6977_v15 = vcombine.low %v2538_v39, %v2548_v21  ;;  %v1284_v4 = vor.u32 %v1283_v62, %v6956_v55  ;;  %v7007_v62 = vld [vmem:[#allocation2 + $0x40] sm:$0xf] }
 0x25f   : > { %5183 = vmatprep.subr.bf16.mxu1 %v5650_v37  ;;  %5034 = vmatmul.mubr.bf16.vlgmr.msra.gmra.mrb[24].mxu0 %v4542_v59  ;;  %v6986_v39 = vsel %vm6607_vm11, %v6853_v10, %v2803_v32  ;;  %v6994_v21 = vsel %vm6607_vm11, %v4631_v2, %v2807_v13  ;;  %v1280_v18 = vsel %vm6756_vm14, %v1275_v57, %v6956_v55  ;;  %v6999_v32 = vld [vmem:[#allocation2 + $0x34] sm:$0xf]  ;;  %v5677_v2 = vld [vmem:[#allocation8 + $0x10] sm:$0xff]   ;;  %v7004_v13 = vld [vmem:[#allocation2 + $0x30] sm:$0xf]  ;;  %v1335_v59 = vshll.u32 %v5723_v14, 16 }
 0x260   : > { %5050 = vmatpush3.bf16.msra.mxu0 %v6892_v0  ;;  %v1303_v53 = vrot.slane %v1301_v41, 5  ;;  %v1307_v29 = vrot.slane %v1305_v56, 4  ;;  %v1285_v0 = vrot.slane %v1284_v4, 4  ;;  %v1298_v11 = vor.u32 %v1297_v28, %v1294_v25  ;;  %v5653_v25 = vld [vmem:[#allocation8 + $0x170] sm:$0xff]   ;;  %v5681_v56 = vld [vmem:[#allocation8 + $0x18] sm:$0xff]  }
 0x261   : > { %5051 = vmatprep.subr.bf16.mxu0 %v5675_v40  ;;  %v1325_v50 = vshll.u32 %v6999_v32, 16  ;;  %v1329_v27 = vshrl.u32 %v6999_v32, 16  ;;  %v1349_v55 = vshll.u32 %v7007_v62, 16  ;;  %v1316_v4 = vshrl.u32 %v7004_v13, 16  ;;  %v5725_v14 = vld [vmem:[#allocation2 + $0x44] sm:$0x1] }
 0x262   : > { %5184 = vmatpush3.bf16.msra.mxu1 %v5650_v37  ;;  %v5652_v37 = vld [vmem:[#allocation8 + $0x168] sm:$0xff]   ;;  %v1308_v10 = vor.u32 %v1307_v29, %v1303_v53  ;;  %v1290_v31 = vsel %vm6756_vm14, %v1285_v0, %v1289_v8  ;;  %v1299_v44 = vrot.slane %v1298_v11, 4  ;;  %v7012_v8 = vld [vmem:[#allocation2 + $0x3c] sm:$0xf]  ;;  %v1319_v49 = vshll.u32 %v7004_v13, 16 }
 0x263   : > { %5185 = vmatprep.subr.bf16.mxu1 %v5651_v45  ;;  %v4543_v43 = vcombine.low %v1280_v18, %v1290_v31  ;;  %v1327_v1 = vrot.slane %v1325_v50, 5  ;;  %v1331_v57 = vrot.slane %v1329_v27, 4  ;;  %v1337_v28 = vrot.slane %v1335_v59, 5 }
 0x264   : > { %5052 = vmatpush3.bf16.msra.mxu0 %v5675_v40  ;;  %v1309_v41 = vrot.slane %v1308_v10, 4  ;;  %v1318_v29 = vrot.slane %v1316_v4, 4  ;;  %v1340_v0 = vshrl.u32 %v7012_v8, 16  ;;  %v1343_v11 = vshll.u32 %v7012_v8, 16  ;;  %v5654_v10 = vld [vmem:[#allocation8 + $0x178] sm:$0xff]   ;;  %v5683_v4 = vld [vmem:[#allocation8 + $0x20] sm:$0xff]  }
 0x265   : > { %5170 = vmatmul.mubr.bf16.gmra.mrb[8].mxu1 %v6887_v36  ;;  %5037 = vmatprep.mubr.bf16.mxu0 %v4543_v43  ;;  %v1304_v36 = vsel %vm6756_vm14, %v1299_v44, %v1303_v53  ;;  %v1351_v31 = vrot.slane %v1349_v55, 5  ;;  %v1353_v27 = vshrl.u32 %v7007_v62, 16  ;;  %v1359_v53 = vshll.u32 %v5725_v14, 16 }
 0x266   : > { %5186 = vmatpush3.bf16.msra.mxu1 %v5651_v45  ;;  %5173 = vmatprep.mubr.bf16.mxu1 %v6923_v9  ;;  %v1314_v40 = vsel %vm6756_vm14, %v1309_v41, %v1313_v54  ;;  %v1321_v45 = vrot.slane %v1319_v49, 5  ;;  %v1332_v9 = vor.u32 %v1331_v57, %v1327_v1  ;;  %v1342_v50 = vrot.slane %v1340_v0, 4  ;;  %v7050_v0 = vld [vmem:[#allocation2 + $0x48] sm:$0xf] }
 0x267   : > { %5187 = vmatprep.subr.bf16.mxu1 %v5652_v37  ;;  %v4544_v18 = vcombine.low %v1304_v36, %v1314_v40  ;;  %5053 = vmatprep.subr.bf16.mxu0 %v5677_v2  ;;  %v7028_v54 = vsel %vm6607_vm11, %v6904_v51, %v2810_v34  ;;  %v1345_v44 = vrot.slane %v1343_v11, 5  ;;  %v7034_v55 = vrot.slane %v2821_v48, 4 }
 0x268   : > { %5054 = vmatpush3.bf16.msra.mxu0 %v5677_v2  ;;  %v1322_v59 = vor.u32 %v1321_v45, %v1318_v29  ;;  %v1333_v43 = vrot.slane %v1332_v9, 4  ;;  %v4638_v2 = vcombine.low %v6933_v33, %v6986_v39  ;;  %v1355_v46 = vrot.slane %v1353_v27, 4  ;;  %v5727_v9 = vld [vmem:[#allocation2 + $0x50] sm:$0x1]  ;;  %v7614_v39 = vld [vmem:[#allocation42_spill] sm:$0xff] }
 0x269   : > { %5038 = vmatmul.mubr.bf16.gmra.mrb[28].mxu0 %v4544_v18  ;;  %5055 = vmatprep.subr.bf16.mxu0 %v5681_v56  ;;  %v1346_v51 = vor.u32 %v1345_v44, %v1342_v50  ;;  %v1361_v57 = vrot.slane %v1359_v53, 5  ;;  %v4639_v36 = vcombine.low %v6994_v21, %v7028_v54  ;;  %v7048_v40 = vsel %vm6607_vm11, %v4632_v20, %v2814_v47  ;;  %v7059_v20 = vld [vmem:[#allocation2 + $0x54] sm:$0xf]  ;;  %v5656_v47 = vld [vmem:[#allocation8 + $0x180] sm:$0xff]   ;;  %v5658_v50 = vld [vmem:[#allocation8 + $0x188] sm:$0xff]  }
 0x26a   : > { %5188 = vmatpush3.bf16.msra.mxu1 %v5652_v37  ;;  %v7612_v37 = vld [vmem:[#allocation40_spill] sm:$0xff]  ;;  %v1323_v49 = vrot.slane %v1322_v59, 4  ;;  %v1338_v34 = vsel %vm6756_vm14, %v1333_v43, %v1337_v28  ;;  %v1356_v29 = vor.u32 %v1355_v46, %v1351_v31  ;;  %v1364_v30 = vshrl.u32 %v7050_v0, 16 }
 0x26b   : > { %5189 = vmatprep.subr.bf16.mxu1 %v5653_v25  ;;  %v2824_v41 = vrot.slane %v7612_v37, 5  ;;  %v1347_v21 = vrot.slane %v1346_v51, 4  ;;  %v1367_v28 = vshll.u32 %v7050_v0, 16  ;;  %v1383_v11 = vshll.u32 %v5727_v9, 16 }
 0x26c   : > { %5056 = vmatpush3.bf16.msra.mxu0 %v5681_v56  ;;  %v1357_v18 = vrot.slane %v1356_v29, 4  ;;  %v1388_v54 = vshrl.u32 %v7059_v20, 16  ;;  %v2764_v29 = vld [vmem:[#allocation2 + $0x48] sm:$0xe]  ;;  %v2822_v33 = vsel %vm6607_vm11, %v4633_v19, %v2821_v48  ;;  %v2835_v16 = vrot.slane %v7614_v39, 5  ;;  %v5693_v48 = vld [vmem:[#allocation8 + $0x38] sm:$0xff]  }
 0x26d   : > { %5174 = vmatmul.mubr.bf16.gmra.mrb[12].mxu1 %v6977_v15  ;;  %v1328_v15 = vsel %vm6756_vm14, %v1323_v49, %v1327_v1  ;;  %5057 = vmatprep.subr.bf16.mxu0 %v5683_v4  ;;  %v1366_v1 = vrot.slane %v1364_v30, 4  ;;  %v1369_v45 = vrot.slane %v1367_v28, 5  ;;  %v1385_v44 = vrot.slane %v1383_v11, 5  ;;  %v5729_v28 = vld [vmem:[#allocation2 + $0x5c] sm:$0x1] }
 0x26e   : > { %5190 = vmatpush3.bf16.msra.mxu1 %v5653_v25  ;;  %5193 = vmatprep.mubr.bf16.mxu1 %v4637_v61  ;;  %v4545_v56 = vcombine.low %v1328_v15, %v1338_v34  ;;  %v7061_v25 = vld [vmem:[#allocation2 + $0x4c] sm:$0xf]  ;;  %v1352_v61 = vsel %vm6756_vm14, %v1347_v21, %v1351_v31  ;;  %v1362_v27 = vsel %vm6756_vm14, %v1357_v18, %v1361_v57  ;;  %v1391_v31 = vshll.u32 %v7059_v20, 16  ;;  %v7071_v34 = vld [vmem:[#allocation2 + $0x58] sm:$0xf]  ;;  %v7613_v15 = vld [vmem:[#allocation41_spill] sm:$0xff] }
 0x26f   : > { %5191 = vmatprep.subr.bf16.mxu1 %v5654_v10  ;;  %v1373_v24 = vshll.u32 %v7061_v25, 16  ;;  %v1377_v26 = vshrl.u32 %v7061_v25, 16  ;;  %v4546_v59 = vcombine.low %v1352_v61, %v1362_v27  ;;  %v1370_v43 = vor.u32 %v1369_v45, %v1366_v1  ;;  %v5689_v57 = vld [vmem:[#allocation8 + $0x30] sm:$0xff]   ;;  %v2765_v19 = vld [vmem:[#allocation2 + $0x54] sm:$0xe]  ;;  %v5672_v39 = vld [vmem:[#allocation2 + $0x18] sm:$0xff]  }
 0x270   : > { %5041 = vmatprep.mubr.bf16.mxu0 %v4545_v56  ;;  %5058 = vmatpush3.bf16.msra.mxu0 %v5683_v4  ;;  %v1390_v49 = vrot.slane %v1388_v54, 4  ;;  %v1397_v51 = vshll.u32 %v7071_v34, 16  ;;  %v1401_v4 = vshrl.u32 %v7071_v34, 16  ;;  %v2828_v21 = vrot.slane %v7613_v15, 5  ;;  %v5660_v1 = vld [vmem:[#allocation8 + $0x190] sm:$0xff]  }
 0x271   : > { %v1375_v14 = vrot.slane %v1373_v24, 5  ;;  %v1379_v53 = vrot.slane %v1377_v26, 4  ;;  %5059 = vmatprep.subr.bf16.mxu0 %v5687_v38  ;;  %5042 = vmatmul.mubr.bf16.gmra.mrb[32].mxu0 %v4546_v59  ;;  %v1393_v30 = vrot.slane %v1391_v31, 5  ;;  %v1407_v56 = vshll.u32 %v5729_v28, 16  ;;  %v7615_v59 = vld [vmem:[#allocation44_spill] sm:$0xff] }
 0x272   : > { %5192 = vmatpush3.bf16.msra.mxu1 %v5654_v10  ;;  %v1371_v10 = vrot.slane %v1370_v43, 4  ;;  %v2818_v18 = vsel %vm6607_vm11, %v6941_v42, %v2817_v17  ;;  %v1399_v26 = vrot.slane %v1397_v51, 5  ;;  %v1403_v61 = vrot.slane %v1401_v4, 4  ;;  %v5664_v4 = vld [vmem:[#allocation8 + $0x1a0] sm:$0xff]  }
 0x273   : > { %5209 = vmatprep.subr.bf16.mxu1 %v5656_v47  ;;  %v1380_v46 = vor.u32 %v1379_v53, %v1375_v14  ;;  %v1394_v17 = vor.u32 %v1393_v30, %v1390_v49  ;;  %v2825_v42 = vsel %vm6607_vm11, %v7034_v55, %v2824_v41  ;;  %v4640_v45 = vcombine.low %v7048_v40, %v2818_v18  ;;  %v7616_v49 = vld [vmem:[#allocation43_spill] sm:$0xff] }
 0x274   : > { %5060 = vmatpush3.bf16.msra.mxu0 %v5687_v38  ;;  %v1404_v58 = vor.u32 %v1403_v61, %v1399_v26  ;;  %v4634_v9 = vrot.slane %v2764_v29, 9  ;;  %v4641_v37 = vcombine.low %v2822_v33, %v2825_v42  ;;  %v2830_v27 = vrot.slane %v2828_v21, 4  ;;  %v2766_v29 = vld [vmem:[#allocation2 + $0x60] sm:$0xe]  ;;  %v5731_v18 = vld [vmem:[#allocation2 + $0x10] sm:$0xf] }
 0x275   : > { %5194 = vmatmul.mubr.bf16.vlgmr.msra.gmra.mrb[0].mxu1 %v4638_v2  ;;  %v1381_v24 = vrot.slane %v1380_v46, 4  ;;  %v1376_v2 = vsel %vm6756_vm14, %v1371_v10, %v1375_v14  ;;  %5061 = vmatprep.subr.bf16.mxu0 %v5689_v57  ;;  %v2831_v55 = vrot.slane %v6765_v12, 5  ;;  %v5662_v14 = vld [vmem:[#allocation8 + $0x198] sm:$0xff]   ;;  %v4635_v53 = vrot.slane %v2765_v19, 9  ;;  %v5668_v33 = vld [vmem:[#allocation8 + $0x1b0] sm:$0xff]  }
 0x276   : > { %5210 = vmatpush3.bf16.msra.mxu1 %v5656_v47  ;;  %5197 = vmatprep.mubr.bf16.mxu1 %v4639_v36  ;;  %v1409_v36 = vrot.slane %v1407_v56, 5  ;;  %v1395_v47 = vrot.slane %v1394_v17, 4  ;;  %v1405_v11 = vrot.slane %v1404_v58, 4  ;;  %v2837_v54 = vrot.slane %v2835_v16, 4  ;;  %v5666_v56 = vld [vmem:[#allocation8 + $0x1a8] sm:$0xff]  }
 0x277   : > { %5211 = vmatprep.subr.bf16.mxu1 %v5658_v50  ;;  %v1386_v63 = vsel %vm6756_vm14, %v1381_v24, %v1385_v44  ;;  %v2838_v43 = vrot.slane %v7615_v59, 5  ;;  %v2829_v12 = vsel %vm6607_vm11, %v4634_v9, %v2828_v21  ;;  %v2832_v46 = vsel %vm6607_vm11, %v2830_v27, %v2831_v55  ;;  %v7129_v17 = vld [vmem:[#allocation2 + $0x1c] sm:$0xf]  ;;  %v3303_v42 = vld [vmem:[#allocation2 + $0x24] sm:$0xf]  ;;  %v5680_v27 = vld [vmem:[#allocation8 + $0x1d0] sm:$0xff]  }
 0x278   : > { %v4547_v38 = vcombine.low %v1376_v2, %v1386_v63  ;;  %5062 = vmatpush3.bf16.msra.mxu0 %v5689_v57  ;;  %v1400_v41 = vsel %vm6756_vm14, %v1395_v47, %v1399_v26  ;;  %v1410_v40 = vsel %vm6756_vm14, %v1405_v11, %v1409_v36  ;;  %v2842_v51 = vrot.slane %v7616_v49, 5  ;;  %v5674_v2 = vld [vmem:[#allocation8 + $0x1c0] sm:$0xff]   ;;  %v5673_v63 = vld [vmem:[#allocation2 + $0x24] sm:$0xff]   ;;  %v7139_v9 = vld [vmem:[#allocation2 + $0x20] sm:$0x1] }
 0x279   : > { %5063 = vmatprep.subr.bf16.mxu0 %v5693_v48  ;;  %v4548_v44 = vcombine.low %v1400_v41, %v1410_v40  ;;  %v2836_v57 = vsel %vm6607_vm11, %v4635_v53, %v2835_v16  ;;  %v4642_v15 = vcombine.low %v2829_v12, %v2832_v46  ;;  %v4636_v21 = vrot.slane %v2766_v29, 9  ;;  %v3300_v16 = vld [vmem:[#allocation2 + $0x18] sm:$0xf]  ;;  %v7135_v47 = vld [vmem:[#allocation2 + $0x28] sm:$0xf]  ;;  %v5682_v40 = vld [vmem:[#allocation8 + $0x1d8] sm:$0xff]  }
 0x27a   : > { %5212 = vmatpush3.bf16.msra.mxu1 %v5658_v50  ;;  %5045 = vmatprep.mubr.bf16.mxu0 %v4547_v38  ;;  %v5730_v50 = vld [vmem:[#allocation2 + $0x4] sm:$0xf]  ;;  %v2844_v30 = vrot.slane %v2842_v51, 4  ;;  %v2845_v28 = vrot.slane %v6791_v7, 5  ;;  %v4558_v24 = vcombine.low %v6885_v23, %v5731_v18  ;;  %v4559_v26 = vcombine.low %v6952_v35, %v6963_v60  ;;  %v5670_v23 = vld [vmem:[#allocation8 + $0x1b8] sm:$0xff]  }
 0x27b   : > { %5213 = vmatprep.subr.bf16.mxu1 %v5660_v1  ;;  %v4557_v31 = vcombine.low %v6883_v52, %v5730_v50  ;;  %v2839_v52 = vsel %vm6607_vm11, %v2837_v54, %v2838_v43  ;;  %5046 = vmatmul.mubr.bf16.gmra.mrb[36].mxu0 %v4548_v44  ;;  %v2843_v61 = vsel %vm6607_vm11, %v4636_v21, %v2842_v51  ;;  %v3325_v58 = vshrl.u32 %v3300_v16, 16  ;;  %v5679_v54 = vld [vmem:[#allocation2 + $0x3c] sm:$0xff]   ;;  %v3306_v43 = vld [vmem:[#allocation2 + $0x30] sm:$0xf]  ;;  %v5684_v44 = vld [vmem:[#allocation2 + $0x48] sm:$0xff]  }
 0x27c   : > { %5064 = vmatpush3.bf16.msra.mxu0 %v5693_v48  ;;  %v4643_v10 = vcombine.low %v2836_v57, %v2839_v52  ;;  %v4560_v35 = vcombine.low %v6958_v6, %v6973_v22  ;;  %v4561_v60 = vcombine.low %v7004_v13, %v6999_v32  ;;  %v3328_v36 = vshll.u32 %v3300_v16, 16  ;;  %v5676_v48 = vld [vmem:[#allocation8 + $0x1c8] sm:$0xff]   ;;  %v5678_v6 = vld [vmem:[#allocation2 + $0x30] sm:$0xff]  }
 0x27d   : > { %5198 = vmatmul.mubr.bf16.gmra.mrb[4].mxu1 %v4640_v45  ;;  %5065 = vmatprep.mubr.bf16.mxu0 %v4557_v31  ;;  %v3334_v22 = vshll.u32 %v7129_v17, 16  ;;  %v3338_v32 = vshrl.u32 %v7129_v17, 16  ;;  %v3349_v13 = vshrl.u32 %v3303_v42, 16  ;;  %v3352_v19 = vshll.u32 %v3303_v42, 16  ;;  %v7150_v12 = vld [vmem:[#allocation2 + $0x34] sm:$0xf] }
 0x27e   : > { %5214 = vmatpush3.bf16.msra.mxu1 %v5660_v1  ;;  %5201 = vmatprep.mubr.bf16.mxu1 %v4641_v37  ;;  %v2846_v1 = vsel %vm6607_vm11, %v2844_v30, %v2845_v28  ;;  %v4562_v38 = vcombine.low %v7012_v8, %v7007_v62  ;;  %v4563_v45 = vcombine.low %v7050_v0, %v7061_v25  ;;  %v3327_v11 = vrot.slane %v3325_v58, 4  ;;  %v3309_v30 = vld [vmem:[#allocation2 + $0x3c] sm:$0xf]  ;;  %v7165_v42 = vld [vmem:[#allocation2 + $0x4c] sm:$0xf] }
 0x27f   : > { %5215 = vmatprep.subr.bf16.mxu1 %v5662_v14  ;;  %v4644_v7 = vcombine.low %v2843_v61, %v2846_v1  ;;  %v3330_v37 = vrot.slane %v3328_v36, 5  ;;  %v7141_v55 = vrot.slane %v3334_v22, 5  ;;  %v3340_v41 = vrot.slane %v3338_v32, 4  ;;  %v7161_v61 = vld [vmem:[#allocation2 + $0x40] sm:$0xf] }
 0x280   : > { %v3351_v62 = vrot.slane %v3349_v13, 4  ;;  %v3354_v8 = vrot.slane %v3352_v19, 5  ;;  %v3358_v53 = vshll.u32 %v7135_v47, 16  ;;  %v3362_v0 = vshrl.u32 %v7135_v47, 16  ;;  %v5690_v1 = vld [vmem:[#allocation2 + $0x60] sm:$0xff]  }
 0x281   : > { %v3344_v25 = vshll.u32 %v7139_v9, 16  ;;  %v3331_v59 = vor.u32 %v3330_v37, %v3327_v11  ;;  %v3341_v50 = vor.u32 %v3340_v41, %v7141_v55  ;;  %v3373_v52 = vshrl.u32 %v3306_v43, 16  ;;  %v5692_v41 = vld [vmem:[#allocation8 + $0x1f0] sm:$0xff]  }
 0x282   : > { %5216 = vmatpush3.bf16.msra.mxu1 %v5662_v14  ;;  %v7143_v14 = vld [vmem:[#allocation2 + $0x2c] sm:$0x1]  ;;  %v3355_v46 = vor.u32 %v3354_v8, %v3351_v62  ;;  %v7152_v49 = vrot.slane %v3358_v53, 5  ;;  %v3364_v51 = vrot.slane %v3362_v0, 4  ;;  %v3376_v29 = vshll.u32 %v3306_v43, 16 }
 0x283   : > { %5217 = vmatprep.subr.bf16.mxu1 %v5664_v4  ;;  %5066 = vmatmul.mubr.bf16.vlgmr.msra.gmra.mrb[24].mxu0 %v4558_v24  ;;  %v3368_v31 = vshll.u32 %v7143_v14, 16  ;;  %v3346_v57 = vrot.slane %v3344_v25, 5  ;;  %v3382_v21 = vshll.u32 %v7150_v12, 16  ;;  %v3342_v28 = vrot.slane %v3341_v50, 4  ;;  %v5685_v24 = vld [vmem:[#allocation2 + $0x54] sm:$0xff]   ;;  %v5691_v0 = vld [vmem:[#allocation2 + $0x6c] sm:$0xff]  }
 0x284   : > { %5069 = vmatprep.mubr.bf16.mxu0 %v4559_v26  ;;  %v3386_v18 = vshrl.u32 %v7150_v12, 16  ;;  %v3356_v26 = vrot.slane %v3355_v46, 4  ;;  %v3406_v36 = vshll.u32 %v7161_v61, 16  ;;  %v3430_v19 = vshll.u32 %v7165_v42, 16  ;;  %v7183_v53 = vld [vmem:[#allocation2 + $0x44] sm:$0x1] }
 0x285   : > { %5202 = vmatmul.mubr.bf16.gmra.mrb[8].mxu1 %v4642_v15  ;;  %v5686_v15 = vld [vmem:[#allocation8 + $0x1e0] sm:$0xff]   ;;  %v3347_v13 = vsel %vm6756_vm14, %v3342_v28, %v3346_v57  ;;  %v3315_v46 = vld [vmem:[#allocation2 + $0x54] sm:$0xf]  ;;  %v3416_v57 = vshll.u32 %v7183_v53, 16 }
 0x286   : > { %5218 = vmatpush3.bf16.msra.mxu1 %v5664_v4  ;;  %5205 = vmatprep.mubr.bf16.mxu1 %v4643_v10  ;;  %v4564_v4 = vcombine.low %v7059_v20, %v7071_v34  ;;  %v3332_v10 = vrot.slane %v3331_v59, 4  ;;  %v3365_v20 = vor.u32 %v3364_v51, %v7152_v49  ;;  %v3370_v34 = vrot.slane %v3368_v31, 5 }
 0x287   : > { %5219 = vmatprep.subr.bf16.mxu1 %v5666_v56  ;;  %v3388_v16 = vrot.slane %v3386_v18, 4  ;;  %v7185_v25 = vrot.slane %v3406_v36, 5  ;;  %v7189_v50 = vrot.slane %v3430_v19, 5  ;;  %v3445_v28 = vshrl.u32 %v3315_v46, 16  ;;  %v3318_v18 = vld [vmem:[#allocation2 + $0x60] sm:$0xf] }
 0x288   : > { %v3337_v32 = vsel %vm6756_vm14, %v3332_v10, %v7141_v55  ;;  %v3361_v55 = vsel %vm6756_vm14, %v3356_v26, %v7152_v49 }
 0x28a   : > { %5220 = vmatpush3.bf16.msra.mxu1 %v5666_v56  ;;  %v7157_v56 = vld [vmem:[#allocation2 + $0x38] sm:$0x1] }
 0x28b   : > { %5221 = vmatprep.subr.bf16.mxu1 %v5668_v33  ;;  %5070 = vmatmul.mubr.bf16.gmra.mrb[28].mxu0 %v4560_v35  ;;  %v3397_v35 = vshrl.u32 %v3309_v30, 16  ;;  %v3392_v58 = vshll.u32 %v7157_v56, 16 }
 0x28c   : > { %5073 = vmatprep.mubr.bf16.mxu0 %v4561_v60  ;;  %v3312_v60 = vld [vmem:[#allocation2 + $0x48] sm:$0xf] }
 0x28d   : > { %5206 = vmatmul.mubr.bf16.gmra.mrb[12].mxu1 %v4644_v7  ;;  %v3378_v7 = vrot.slane %v3376_v29, 5  ;;  %v3424_v22 = vshll.u32 %v3312_v60, 16  ;;  %v3399_v37 = vrot.slane %v3397_v35, 4  ;;  %v3394_v8 = vrot.slane %v3392_v58, 5  ;;  %v5694_v29 = vld [vmem:[#allocation8 + $0x1f8] sm:$0xff]  }
 0x28e   : > { %5222 = vmatpush3.bf16.msra.mxu1 %v5668_v33  ;;  %5225 = vmatprep.mubr.bf16.mxu1 %v5672_v39  ;;  %v3375_v33 = vrot.slane %v3373_v52, 4  ;;  %v5688_v39 = vld [vmem:[#allocation8 + $0x1e8] sm:$0xff]   ;;  %v7192_v52 = vld [vmem:[#allocation2 + $0x58] sm:$0xf]  ;;  %v3418_v35 = vrot.slane %v3416_v57, 5 }
 0x28f   : > { %5223 = vmatprep.subr.bf16.mxu1 %v5670_v23  ;;  %v3426_v43 = vrot.slane %v3424_v22, 5  ;;  %v3447_v22 = vrot.slane %v3445_v28, 4 }
 0x292   : > { %5224 = vmatpush3.bf16.msra.mxu1 %v5670_v23  ;;  %v7163_v23 = vrot.slane %v3382_v21, 5 }
 0x293   : > { %5241 = vmatprep.subr.bf16.mxu1 %v5674_v2  ;;  %5074 = vmatmul.mubr.bf16.gmra.mrb[32].mxu0 %v4562_v38  ;;  %v3434_v38 = vshrl.u32 %v7165_v42, 16 }
 0x294   : > { %5077 = vmatprep.mubr.bf16.mxu0 %v4563_v45  ;;  %v3379_v45 = vor.u32 %v3378_v7, %v3375_v33  ;;  %v3389_v11 = vor.u32 %v3388_v16, %v7163_v23  ;;  %v3469_v16 = vshrl.u32 %v3318_v18, 16 }
 0x295   : > { %5226 = vmatmul.mubr.bf16.vlgmr.msra.gmra.mrb[0].mxu1 %v5673_v63  ;;  %v3366_v63 = vrot.slane %v3365_v20, 4  ;;  %v3436_v31 = vrot.slane %v3434_v38, 4  ;;  %v3448_v20 = vshll.u32 %v3315_v46, 16 }
 0x296   : > { %5242 = vmatpush3.bf16.msra.mxu1 %v5674_v2  ;;  %5229 = vmatprep.mubr.bf16.mxu1 %v5678_v6  ;;  %v3400_v2 = vshll.u32 %v3309_v30, 16  ;;  %v3421_v6 = vshrl.u32 %v3312_v60, 16  ;;  %v3380_v49 = vrot.slane %v3379_v45, 4  ;;  %v3390_v51 = vrot.slane %v3389_v11, 4  ;;  %v5697_v60 = vld [vmem:[#allocation8 + $0x200] sm:$0xff]   ;;  %v5698_v45 = vld [vmem:[#allocation8 + $0x208] sm:$0xff]  }
 0x297   : > { %5243 = vmatprep.subr.bf16.mxu1 %v5676_v48  ;;  %v3371_v62 = vsel %vm6756_vm14, %v3366_v63, %v3370_v34  ;;  %v3437_v26 = vor.u32 %v3436_v31, %v7189_v50  ;;  %v3454_v34 = vshll.u32 %v7192_v52, 16 }
 0x298   : > { %v3423_v59 = vrot.slane %v3421_v6, 4  ;;  %v3385_v33 = vsel %vm6756_vm14, %v3380_v49, %v7163_v23  ;;  %v3395_v7 = vsel %vm6756_vm14, %v3390_v51, %v3394_v8  ;;  %v3450_v23 = vrot.slane %v3448_v20, 5  ;;  %v7212_v8 = vld [vmem:[#allocation2 + $0x70] sm:$0xf] }
 0x299   : > { %v7210_v19 = vrot.slane %v3454_v34, 5  ;;  %v4671_v11 = vcombine.low %v3385_v33, %v3395_v7  ;;  %v3506_v57 = vshrl.u32 %v7212_v8, 16  ;;  %v5702_v7 = vld [vmem:[#allocation8 + $0x218] sm:$0xff]  }
 0x29a   : > { %5244 = vmatpush3.bf16.msra.mxu1 %v5676_v48  ;;  %v3410_v48 = vshrl.u32 %v7161_v61, 16  ;;  %v3427_v21 = vor.u32 %v3426_v43, %v3423_v59  ;;  %v7220_v43 = vld [vmem:[#allocation2 + $0x68] sm:$0x1]  ;;  %v3451_v46 = vor.u32 %v3450_v23, %v3447_v22  ;;  %v3760_v23 = vrot.slane %v7129_v17, 5 }
 0x29b   : > { %5245 = vmatprep.subr.bf16.mxu1 %v5680_v27  ;;  %5078 = vmatmul.mubr.bf16.gmra.mrb[36].mxu0 %v4564_v4  ;;  %v3508_v33 = vrot.slane %v3506_v57, 4 }
 0x29c   : > { %v3452_v28 = vrot.slane %v3451_v46, 4 }
 0x29d   : > { %5230 = vmatmul.mubr.bf16.gmra.mrb[4].mxu1 %v5679_v54  ;;  %v3412_v54 = vrot.slane %v3410_v48, 4  ;;  %v3428_v48 = vrot.slane %v3427_v21, 4 }
 0x29e   : > { %5246 = vmatpush3.bf16.msra.mxu1 %v5680_v27  ;;  %5233 = vmatprep.mubr.bf16.mxu1 %v5684_v44  ;;  %v3402_v27 = vrot.slane %v3400_v2, 5  ;;  %v7187_v44 = vld [vmem:[#allocation2 + $0x50] sm:$0x1]  ;;  %v3472_v2 = vshll.u32 %v3318_v18, 16 }
 0x29f   : > { %5247 = vmatprep.subr.bf16.mxu1 %v5682_v40  ;;  %v3413_v10 = vor.u32 %v3412_v54, %v7185_v25  ;;  %v3440_v30 = vshll.u32 %v7187_v44, 16 }
 0x2a0   : > { %v3403_v4 = vor.u32 %v3402_v27, %v3399_v37  ;;  %v3321_v37 = vld [vmem:[#allocation2 + $0x6c] sm:$0xf]  ;;  %v3471_v27 = vrot.slane %v3469_v16, 4  ;;  %v7231_v16 = vld [vmem:[#allocation2 + $0x74] sm:$0x1] }
 0x2a1   : > { %v3414_v36 = vrot.slane %v3413_v10, 4  ;;  %v3442_v6 = vrot.slane %v3440_v30, 5  ;;  %v3496_v51 = vshll.u32 %v3321_v37, 16 }
 0x2a2   : > { %5248 = vmatpush3.bf16.msra.mxu1 %v5682_v40  ;;  %v4669_v40 = vcombine.low %v3337_v32, %v3347_v13  ;;  %v3438_v32 = vrot.slane %v3437_v26, 4  ;;  %v7208_v13 = vld [vmem:[#allocation2 + $0x5c] sm:$0x1] }
 0x2a3   : > { %5249 = vmatprep.subr.bf16.mxu1 %v5686_v15  ;;  %v3419_v54 = vsel %vm6756_vm14, %v3414_v36, %v3418_v35  ;;  %v3464_v59 = vshll.u32 %v7208_v13, 16  ;;  %v3498_v34 = vrot.slane %v3496_v51, 5 }
 0x2a4   : > { %v3443_v31 = vsel %vm6756_vm14, %v3438_v32, %v3442_v6  ;;  %v5705_v6 = vld [vmem:[#allocation8 + $0x220] sm:$0xff]  }
 0x2a5   : > { %5234 = vmatmul.mubr.bf16.gmra.mrb[8].mxu1 %v5685_v24  ;;  %v7196_v24 = vld [vmem:[#allocation2 + $0x64] sm:$0xf]  ;;  %v3466_v26 = vrot.slane %v3464_v59, 5  ;;  %v3767_v59 = vrot.slane %v7135_v47, 5  ;;  %v5710_v47 = vld [vmem:[#allocation8 + $0x238] sm:$0xff]  }
 0x2a6   : > { %5250 = vmatpush3.bf16.msra.mxu1 %v5686_v15  ;;  %5237 = vmatprep.mubr.bf16.mxu1 %v5690_v1  ;;  %v4670_v15 = vcombine.low %v3361_v55, %v3371_v62  ;;  %v3458_v1 = vshrl.u32 %v7192_v52, 16  ;;  %v3478_v63 = vshll.u32 %v7196_v24, 16  ;;  %v3482_v58 = vshrl.u32 %v7196_v24, 16 }
 0x2a7   : > { %5251 = vmatprep.subr.bf16.mxu1 %v5688_v39  ;;  %v3769_v5 = vrot.slane %v3767_v59, 4 }
 0x2a8   : > { %v3460_v38 = vrot.slane %v3458_v1, 4  ;;  %v3480_v55 = vrot.slane %v3478_v63, 5  ;;  %v3484_v62 = vrot.slane %v3482_v58, 4 }
 0x2aa   : > { %5252 = vmatpush3.bf16.msra.mxu1 %v5688_v39  ;;  %v3404_v39 = vrot.slane %v3403_v4, 4  ;;  %v3461_v49 = vor.u32 %v3460_v38, %v7210_v19  ;;  %v3502_v4 = vshll.u32 %v7212_v8, 16  ;;  %v3485_v10 = vor.u32 %v3484_v62, %v3480_v55 }
 0x2ab   : > { %5253 = vmatprep.subr.bf16.mxu1 %v5692_v41 }
 0x2ac   : > { %v3462_v18 = vrot.slane %v3461_v49, 4  ;;  %v3504_v1 = vrot.slane %v3502_v4, 5  ;;  %v3486_v35 = vrot.slane %v3485_v10, 4  ;;  %v3774_v49 = vrot.slane %v7150_v12, 5 }
 0x2ad   : > { %5238 = vmatmul.mubr.bf16.gmra.mrb[12].mxu1 %v5691_v0  ;;  %v3409_v0 = vsel %vm6756_vm14, %v3404_v39, %v7185_v25  ;;  %v3493_v25 = vshrl.u32 %v3321_v37, 16 }
 0x2ae   : > { %5254 = vmatpush3.bf16.msra.mxu1 %v5692_v41  ;;  %5257 = vmatprep.mubr.bf16.mxu1 %v4669_v40  ;;  %v3474_v41 = vrot.slane %v3472_v2, 5  ;;  %v3433_v40 = vsel %vm6756_vm14, %v3428_v48, %v7189_v50  ;;  %v3488_v50 = vshll.u32 %v7220_v43, 16  ;;  %v4672_v21 = vcombine.low %v3409_v0, %v3419_v54 }
 0x2af   : > { %5255 = vmatprep.subr.bf16.mxu1 %v5694_v29  ;;  %v4673_v30 = vcombine.low %v3433_v40, %v3443_v31  ;;  %v3495_v20 = vrot.slane %v3493_v25, 4  ;;  %v3457_v2 = vsel %vm6756_vm14, %v3452_v28, %v7210_v19  ;;  %v3467_v63 = vsel %vm6756_vm14, %v3462_v18, %v3466_v26  ;;  %v3726_v19 = vld [vmem:[#allocation2 + $0x18] sm:$0xe]  ;;  %v5709_v40 = vld [vmem:[#allocation8 + $0x230] sm:$0xff]   ;;  %v3728_v25 = vld [vmem:[#allocation2 + $0x30] sm:$0xe] }
 0x2b0   : > { %v3509_v36 = vor.u32 %v3508_v33, %v3504_v1  ;;  %v3512_v48 = vshll.u32 %v7231_v16, 16  ;;  %v4674_v38 = vcombine.low %v3457_v2, %v3467_v63  ;;  %v4685_v62 = vrot.slane %v3726_v19, 9  ;;  %v3729_v18 = vld [vmem:[#allocation2 + $0x3c] sm:$0xe]  ;;  %v3730_v26 = vld [vmem:[#allocation2 + $0x48] sm:$0xe] }
 0x2b1   : > { %v3499_v58 = vor.u32 %v3498_v34, %v3495_v20  ;;  %v3762_v0 = vrot.slane %v3760_v23, 4  ;;  %v3763_v54 = vrot.slane %v7139_v9, 5  ;;  %v3727_v9 = vld [vmem:[#allocation2 + $0x24] sm:$0xe]  ;;  %v3776_v10 = vrot.slane %v3774_v49, 4 }
 0x2b2   : > { %5256 = vmatpush3.bf16.msra.mxu1 %v5694_v29  ;;  %v5701_v29 = vld [vmem:[#allocation8 + $0x210] sm:$0xff]   ;;  %v3510_v37 = vrot.slane %v3509_v36, 4  ;;  %v3761_v31 = vsel %vm6607_vm11, %v4685_v62, %v3760_v23  ;;  %v4686_v57 = vrot.slane %v3727_v9, 9  ;;  %v3795_v2 = vrot.slane %v7192_v52, 5  ;;  %v5716_v9 = vld [vmem:[#allocation9 + $0x28] sm:$0xff]  }
 0x2b3   : > { %5273 = vmatprep.subr.bf16.mxu1 %v5697_v60  ;;  %v3764_v46 = vsel %vm6607_vm11, %v3762_v0, %v3763_v54  ;;  %v3802_v36 = vrot.slane %v7196_v24, 5  ;;  %v3798_v23 = vrot.slane %v7208_v13, 5  ;;  %v3805_v52 = vrot.slane %v7220_v43, 5 }
 0x2b4   : > { %v4693_v4 = vcombine.low %v3761_v31, %v3764_v46  ;;  %v3768_v12 = vsel %vm6607_vm11, %v4686_v57, %v3767_v59  ;;  %v3809_v24 = vrot.slane %v7212_v8, 5  ;;  %v3812_v54 = vrot.slane %v7231_v16, 5  ;;  %v5711_v59 = vld [vmem:[#allocation9] sm:$0xff]   ;;  %v5713_v31 = vld [vmem:[#allocation9 + $0x10] sm:$0xff]   ;;  %v5714_v46 = vld [vmem:[#allocation9 + $0x18] sm:$0xff]  }
 0x2b5   : > { %5258 = vmatmul.mubr.bf16.vlgmr.msra.gmra.mrb[0].mxu1 %v4670_v15  ;;  %v3475_v15 = vor.u32 %v3474_v41, %v3471_v27  ;;  %v3514_v27 = vrot.slane %v3512_v48, 5  ;;  %v5706_v41 = vld [vmem:[#allocation8 + $0x228] sm:$0xff]   ;;  %5305 = vmatprep.subr.bf16.mxu0 %v5711_v59  ;;  %v5715_v16 = vld [vmem:[#allocation9 + $0x20] sm:$0xff]  }
 0x2b6   : > { %5274 = vmatpush3.bf16.msra.mxu1 %v5697_v60  ;;  %5261 = vmatprep.mubr.bf16.mxu1 %v4671_v11  ;;  %v3490_v60 = vrot.slane %v3488_v50, 5  ;;  %v3500_v11 = vrot.slane %v3499_v58, 4  ;;  %v3777_v50 = vrot.slane %v7157_v56, 5  ;;  %v3788_v56 = vrot.slane %v7165_v42, 5  ;;  %v3731_v58 = vld [vmem:[#allocation2 + $0x54] sm:$0xe] }
 0x2b7   : > { %5275 = vmatprep.subr.bf16.mxu1 %v5698_v45  ;;  %v3476_v39 = vrot.slane %v3475_v15, 4  ;;  %v3515_v17 = vsel %vm6756_vm14, %v3510_v37, %v3514_v27  ;;  %v4687_v15 = vrot.slane %v3728_v25, 9  ;;  %v3733_v27 = vld [vmem:[#allocation2 + $0x6c] sm:$0xe]  ;;  %v3811_v0 = vrot.slane %v3809_v24, 4  ;;  %5306 = vmatpush3.bf16.msra.mxu0 %v5711_v59 }
 0x2b8   : > { %v3491_v32 = vsel %vm6756_vm14, %v3486_v35, %v3490_v60  ;;  %v3778_v28 = vsel %vm6607_vm11, %v3776_v10, %v3777_v50  ;;  %v3791_v35 = vrot.slane %v7187_v44, 5  ;;  %v3732_v44 = vld [vmem:[#allocation2 + $0x60] sm:$0xe]  ;;  %v4692_v43 = vrot.slane %v3733_v27, 9 }
 0x2b9   : > { %v3481_v22 = vsel %vm6756_vm14, %v3476_v39, %v3480_v55  ;;  %v3505_v55 = vsel %vm6756_vm14, %v3500_v11, %v3504_v1  ;;  %v4688_v1 = vrot.slane %v3729_v18, 9  ;;  %v4689_v39 = vrot.slane %v3730_v26, 9  ;;  %v7306_v26 = vld [vmem:[%s7617_s2] ss:$0 sm:$0xff]  ;;  %s7636_s2 = sld [smem:[#allocation18_spill]] }
 0x2ba   : > { %5276 = vmatpush3.bf16.msra.mxu1 %v5698_v45  ;;  %v4675_v45 = vcombine.low %v3481_v22, %v3491_v32  ;;  %v4676_v51 = vcombine.low %v3505_v55, %v3515_v17  ;;  %v4690_v22 = vrot.slane %v3731_v58, 9  ;;  %v3797_v32 = vrot.slane %v3795_v2, 4 }
 0x2bb   : > { %5277 = vmatprep.subr.bf16.mxu1 %v5701_v29  ;;  %v3789_v63 = vsel %vm6607_vm11, %v4689_v39, %v3788_v56  ;;  %v4691_v19 = vrot.slane %v3732_v44, 9  ;;  %v3810_v55 = vsel %vm6607_vm11, %v4692_v43, %v3809_v24  ;;  %v3813_v8 = vsel %vm6607_vm11, %v3811_v0, %v3812_v54 }
 0x2bc   : > { %v3799_v11 = vsel %vm6607_vm11, %v3797_v32, %v3798_v23  ;;  %v4700_v17 = vcombine.low %v3810_v55, %v3813_v8 }
 0x2bd   : > { %5262 = vmatmul.mubr.bf16.gmra.mrb[4].mxu1 %v4672_v21  ;;  %v3803_v37 = vsel %vm6607_vm11, %v4691_v19, %v3802_v36 }
 0x2be   : > { %5278 = vmatpush3.bf16.msra.mxu1 %v5701_v29  ;;  %5265 = vmatprep.mubr.bf16.mxu1 %v4673_v30  ;;  %v3770_v29 = vrot.slane %v7143_v14, 5  ;;  %v3781_v30 = vrot.slane %v7161_v61, 5  ;;  %v3775_v14 = vsel %vm6607_vm11, %v4687_v15, %v3774_v49  ;;  %v3790_v61 = vrot.slane %v3788_v56, 4  ;;  %v5718_v49 = vld [vmem:[#allocation9 + $0x38] sm:$0xff]  }
 0x2bf   : > { %5279 = vmatprep.subr.bf16.mxu1 %v5702_v7  ;;  %v4695_v34 = vcombine.low %v3775_v14, %v3778_v28  ;;  %p7640_p6 = scmp.ne.s32.totalorder %s7636_s2, 0 }
 0x2c0   : > { %v3771_v21 = vsel %vm6607_vm11, %v3769_v5, %v3770_v29  ;;  %v3783_v33 = vrot.slane %v3781_v30, 4  ;;  %v3782_v60 = vsel %vm6607_vm11, %v4688_v1, %v3781_v30  ;;  %v7311_v1 = vld [vmem:[%s7618_s10] ss:$0 sm:$0xff]  ;;  %s7639_s10 = sld [smem:[#allocation53_spill]] }
 0x2c1   : > { %v4694_v20 = vcombine.low %v3768_v12, %v3771_v21 }
 0x2c2   : > { %5280 = vmatpush3.bf16.msra.mxu1 %v5702_v7  ;;  %v3784_v7 = vrot.slane %v7183_v53, 5  ;;  %v3792_v53 = vsel %vm6607_vm11, %v3790_v61, %v3791_v35 }
 0x2c3   : > { %5281 = vmatprep.subr.bf16.mxu1 %v5705_v6 }
 0x2c4   : > { %v3785_v42 = vsel %vm6607_vm11, %v3783_v33, %v3784_v7 }
 0x2c5   : > { %5266 = vmatmul.mubr.bf16.gmra.mrb[8].mxu1 %v4674_v38  ;;  %v4696_v48 = vcombine.low %v3782_v60, %v3785_v42  ;;  %v3804_v38 = vrot.slane %v3802_v36, 4 }
 0x2c6   : > { %5282 = vmatpush3.bf16.msra.mxu1 %v5705_v6  ;;  %5269 = vmatprep.mubr.bf16.mxu1 %v4675_v45  ;;  %v4697_v6 = vcombine.low %v3789_v63, %v3792_v53  ;;  %v3796_v45 = vsel %vm6607_vm11, %v4690_v22, %v3795_v2  ;;  %s7426_s30 = scalar_lea.hbm %s7639_s10, %s4725_s26 }
 0x2c7   : > { %5283 = vmatprep.subr.bf16.mxu1 %v5706_v41  ;;  %v3806_v13 = vsel %vm6607_vm11, %v3804_v38, %v3805_v52 }
 0x2c8   : > { %v4699_v62 = vcombine.low %v3803_v37, %v3806_v13 }
 0x2ca   : > { %5284 = vmatpush3.bf16.msra.mxu1 %v5706_v41  ;;  %v4698_v41 = vcombine.low %v3796_v45, %v3799_v11 }
 0x2cb   : > { %5285 = vmatprep.subr.bf16.mxu1 %v5709_v40 }
 0x2cd   : > { %5270 = vmatmul.mubr.bf16.gmra.mrb[12].mxu1 %v4676_v51 }
 0x2ce   : > { %5286 = vmatpush3.bf16.msra.mxu1 %v5709_v40  ;;  %5289 = vmatprep.mubr.bf16.mxu1 %v4693_v4  ;;  %v5712_v40 = vld [vmem:[#allocation9 + $0x8] sm:$0xff]  }
 0x2cf   : > { %5287 = vmatprep.subr.bf16.mxu1 %v5710_v47  ;;  %5307 = vmatprep.subr.bf16.mxu0 %v5712_v40 }
 0x2d0   : > { %5308 = vmatpush3.bf16.msra.mxu0 %v5712_v40 }
 0x2d1   : > { %5309 = vmatprep.subr.bf16.mxu0 %v5713_v31 }
 0x2d2   : > { %5288 = vmatpush3.bf16.msra.mxu1 %v5710_v47 }
 0x2d4   : > { %5310 = vmatpush3.bf16.msra.mxu0 %v5713_v31 }
 0x2d5   : > { %5290 = vmatmul.mubr.bf16.vlgmr.msra.gmra.mrb[0].mxu1 %v4694_v20  ;;  %5311 = vmatprep.subr.bf16.mxu0 %v5714_v46 }
 0x2d6   : > { %5293 = vmatprep.mubr.bf16.mxu1 %v4695_v34 }
 0x2d8   : > { %5312 = vmatpush3.bf16.msra.mxu0 %v5714_v46 }
 0x2d9   : > { %5313 = vmatprep.subr.bf16.mxu0 %v5715_v16 }
 0x2dc   : > { %5314 = vmatpush3.bf16.msra.mxu0 %v5715_v16 }
 0x2dd   : > { %5294 = vmatmul.mubr.bf16.gmra.mrb[4].mxu1 %v4696_v48  ;;  %5315 = vmatprep.subr.bf16.mxu0 %v5716_v9 }
 0x2de   : > { %5297 = vmatprep.mubr.bf16.mxu1 %v4697_v6 }
 0x2e0   : > { %5316 = vmatpush3.bf16.msra.mxu0 %v5716_v9 }
 0x2e1   : > { %5317 = vmatprep.subr.bf16.mxu0 %v5717_v3 }
 0x2e4   : > { %5318 = vmatpush3.bf16.msra.mxu0 %v5717_v3 }
 0x2e5   : > { %5298 = vmatmul.mubr.bf16.gmra.mrb[8].mxu1 %v4698_v41  ;;  %5319 = vmatprep.subr.bf16.mxu0 %v5718_v49 }
 0x2e6   : > { %5301 = vmatprep.mubr.bf16.mxu1 %v4699_v62 }
 0x2e8   : > { %5320 = vmatpush3.bf16.msra.mxu0 %v5718_v49 }
 0x2ed   : > { %5302 = vmatmul.mubr.bf16.gmra.mrb[12].mxu1 %v4700_v17 }
 0x356   : > { %v5067_v25 = vpop.f32.mrb[24].mxu0 }
 0x357   : > { %v1735_v51 = vpop.f32.mrb[25].mxu0 }
 0x358   : > { %v5068_v4 = vpop.f32.mrb[26].mxu0 }
 0x359   : > { %v1738_v57 = vpop.f32.mrb[27].mxu0 }
 0x35e   : > { %v5071_v5 = vpop.f32.mrb[28].mxu0 }
 0x35f   : > { %v1751_v29 = vpop.f32.mrb[29].mxu0 }
 0x360   : > { %v5072_v47 = vpop.f32.mrb[30].mxu0 }
 0x361   : > { %v1754_v15 = vpop.f32.mrb[31].mxu0 }
 0x366   : > { %v5075_v10 = vpop.f32.mrb[32].mxu0 }
 0x367   : > { %v1767_v50 = vpop.f32.mrb[33].mxu0 }
 0x368   : > { %v5076_v12 = vpop.f32.mrb[34].mxu0 }
 0x369   : > { %v1770_v21 = vpop.f32.mrb[35].mxu0 }
 0x36e   : > { %v7295_v30 = vpop.f32.mrb[36].mxu0 }
 0x36f   : > { %v7297_v14 = vpop.f32.mrb[37].mxu0 }
 0x370   : > { %v7299_v28 = vpop.f32.mrb[38].mxu0 }
 0x371   : > { %v7301_v18 = vpop.f32.mrb[39].mxu0 }
 0x3a8   : > { %v5291_v56 = vpop.f32.mrb[0].mxu1 }
 0x3a9   : > { %v5337_v20 = vadd.f32 %v5291_v56, %v5067_v25  ;;  %v3945_v34 = vpop.f32.mrb[1].mxu1 }
 0x3aa   : > { %v5338_v33 = vadd.f32 %v3945_v34, %v1735_v51  ;;  %v5292_v7 = vpop.f32.mrb[2].mxu1 }
 0x3ab   : > { %v4033_v39 = vmul.f32 %v5337_v20, %v7306_v26  ;;  %v5339_v61 = vadd.f32 %v5292_v7, %v5068_v4  ;;  %v3948_v35 = vpop.f32.mrb[3].mxu1 }
 0x3ac   : > { %v4031_v60 = vmul.f32 %v5338_v33, %v7306_v26  ;;  %v5340_v42 = vadd.f32 %v3948_v35, %v1738_v57 }
 0x3ad   : > { %v4056_v2 = vadd.f32 %v7311_v1, %v4033_v39  ;;  %v4034_v63 = vmul.f32 %v5339_v61, %v7306_v26 }
 0x3ae   : > { %v4054_v53 = vadd.f32 %v7311_v1, %v4031_v60  ;;  %v4032_v58 = vmul.f32 %v5340_v42, %v7306_v26 }
 0x3af   : > { %v4057_v36 = vadd.f32 %v7311_v1, %v4034_v63  ;;  %v4072_v6 = vmax.f32 %v4056_v2, 0.0 }
 0x3b0   : > { %v4055_v44 = vadd.f32 %v7311_v1, %v4032_v58  ;;  %v5295_v48 = vpop.f32.mrb[4].mxu1  ;;  %v4070_v19 = vmax.f32 %v4054_v53, 0.0 }
 0x3b1   : > { %v4073_v22 = vmax.f32 %v4057_v36, 0.0  ;;  %v5341_v32 = vadd.f32 %v5295_v48, %v5071_v5  ;;  %v3961_v23 = vpop.f32.mrb[5].mxu1 }
 0x3b2   : > { %v4071_v38 = vmax.f32 %v4055_v44, 0.0  ;;  %v5342_v52 = vadd.f32 %v3961_v23, %v1751_v29  ;;  %v5296_v45 = vpop.f32.mrb[6].mxu1 }
 0x3b3   : > { %v4087_v11 = vpack.c.bf16 %v4073_v22, %v4072_v6  ;;  %v4037_v24 = vmul.f32 %v5341_v32, %v7306_v26  ;;  %v5343_v37 = vadd.f32 %v5296_v45, %v5072_v47  ;;  %v3964_v13 = vpop.f32.mrb[7].mxu1 }
 0x3b4   : > { %v4035_v27 = vmul.f32 %v5342_v52, %v7306_v26  ;;  %v5344_v41 = vadd.f32 %v3964_v13, %v1754_v15  ;;  %v4086_v62 = vpack.c.bf16 %v4071_v38, %v4070_v19 }
 0x3b5   : > { %v4060_v43 = vadd.f32 %v7311_v1, %v4037_v24  ;;  %v4038_v0 = vmul.f32 %v5343_v37, %v7306_v26  ;;  %v7352_v24 = vld [vmem:[%s7619_s27] ss:$0 sm:$0xff]  ;;  %s5846_s27 = scalar_lea.vmem %s7428_s11, 2048 }
 0x3b6   : > { %v4058_v54 = vadd.f32 %v7311_v1, %v4035_v27  ;;  %v4036_v55 = vmul.f32 %v5344_v41, %v7306_v26  ;;  %5321 = vmatprep.mubr.bf16.mxu0 %v4086_v62  ;;  %v7357_v37 = vld [vmem:[%s7620_s20] ss:$0 sm:$0xff]  ;;  %p5847_p13 = scmp.ne.s32.totalorder %s7428_s11, %s5846_s27  ;;  %s5852_s20 = scalar_lea.vmem %s5851_s1, 4096 }
 0x3b7   : > { %v4061_v8 = vadd.f32 %v7311_v1, %v4038_v0  ;;  %5322 = vmatmul.mubr.bf16.vlgmr.msra.gmra.mrb[40].mxu0 %v4087_v11  ;;  %v4076_v40 = vmax.f32 %v4060_v43, 0.0  ;;  %p5854_p7 = scmp.lt.s32.totalorder %s5852_s20, %s5846_s27 }
 0x3b8   : > { %v4059_v17 = vadd.f32 %v7311_v1, %v4036_v55  ;;  %v5299_v59 = vpop.f32.mrb[8].mxu1  ;;  %v4074_v9 = vmax.f32 %v4058_v54, 0.0  ;;  %p5848_p8 = pnand %p5847_p13, %p7640_p6 }
 0x3b9   : > { %v4077_v31 = vmax.f32 %v4061_v8, 0.0  ;;  %v5345_v46 = vadd.f32 %v5299_v59, %v5075_v10  ;;  %v3977_v16 = vpop.f32.mrb[9].mxu1  ;;  %v7621_v8 = vld [vmem:[#allocation22_spill] sm:$0xff]  ;;  %p5855_p3 = por %p5854_p7, %p5853_p4 }
 0x3ba   : > { %v4075_v3 = vmax.f32 %v4059_v17, 0.0  ;;  %v5346_v49 = vadd.f32 %v3977_v16, %v1767_v50  ;;  %v5300_v25 = vpop.f32.mrb[10].mxu1  ;;  %p5849_p12 = pneg %p5848_p8 }
 0x3bb   : > { %v4041_v51 = vmul.f32 %v5345_v46, %v7306_v26  ;;  %v5347_v4 = vadd.f32 %v5300_v25, %v5076_v12  ;;  %v3980_v57 = vpop.f32.mrb[11].mxu1  ;;  %v4089_v5 = vpack.c.bf16 %v4077_v31, %v4076_v40  ;;  %v7622_v40 = vld [vmem:[#allocation20_spill] sm:$0xff]  ;;  %v7624_v25 = vld [vmem:[#allocation21_spill] sm:$0xff] }
 0x3bc   : > { %v4039_v29 = vmul.f32 %v5346_v49, %v7306_v26  ;;  %v5348_v47 = vadd.f32 %v3980_v57, %v1770_v21  ;;  %v4088_v15 = vpack.c.bf16 %v4075_v3, %v4074_v9  ;;  %v7623_v9 = vld [vmem:[#allocation23_spill] sm:$0xff]  ;;  %p5856_p0 = pnand %p5855_p3, %p5849_p12 }
 0x3bd   : > { %v4064_v56 = vadd.f32 %v7311_v1, %v4041_v51  ;;  %v4042_v20 = vmul.f32 %v5347_v4, %v7306_v26 }
 0x3be   : > { %v4062_v10 = vadd.f32 %v7311_v1, %v4039_v29  ;;  %v4040_v34 = vmul.f32 %v5348_v47, %v7306_v26  ;;  %5325 = vmatprep.mubr.bf16.mxu0 %v4088_v15 }
 0x3bf   : > { %v4065_v50 = vadd.f32 %v7311_v1, %v4042_v20  ;;  %5326 = vmatmul.mubr.bf16.gmra.mrb[44].mxu0 %v4089_v5  ;;  %v4080_v7 = vmax.f32 %v4064_v56, 0.0 }
 0x3c0   : > { %v4063_v12 = vadd.f32 %v7311_v1, %v4040_v34  ;;  %v5303_v33 = vpop.f32.mrb[12].mxu1  ;;  %v4078_v35 = vmax.f32 %v4062_v10, 0.0 }
 0x3c1   : > { %v4081_v39 = vmax.f32 %v4065_v50, 0.0  ;;  %v5349_v21 = vadd.f32 %v5303_v33, %v7295_v30  ;;  %v3993_v61 = vpop.f32.mrb[13].mxu1  ;;  %v7625_v33 = vld [vmem:[#allocation26_spill] sm:$0xff] }
 0x3c2   : > { %v4079_v60 = vmax.f32 %v4063_v12, 0.0  ;;  %v5350_v42 = vadd.f32 %v3993_v61, %v7297_v14  ;;  %v5304_v2 = vpop.f32.mrb[14].mxu1 }
 0x3c3   : > { %v4045_v63 = vmul.f32 %v5349_v21, %v7306_v26  ;;  %v5351_v53 = vadd.f32 %v5304_v2, %v7299_v28  ;;  %v3996_v58 = vpop.f32.mrb[15].mxu1  ;;  %v4091_v36 = vpack.c.bf16 %v4081_v39, %v4080_v7  ;;  %v7626_v21 = vld [vmem:[#allocation24_spill] sm:$0xff] }
 0x3c4   : > { %v4043_v44 = vmul.f32 %v5350_v42, %v7306_v26  ;;  %v5352_v48 = vadd.f32 %v3996_v58, %v7301_v18  ;;  %v4090_v6 = vpack.c.bf16 %v4079_v60, %v4078_v35  ;;  %v7627_v42 = vld [vmem:[#allocation27_spill] sm:$0xff] }
 0x3c5   : > { %v4068_v22 = vadd.f32 %v7311_v1, %v4045_v63  ;;  %v4046_v30 = vmul.f32 %v5351_v53, %v7306_v26  ;;  %v7628_v53 = vld [vmem:[#allocation25_spill] sm:$0xff] }
 0x3c6   : > { %v4066_v32 = vadd.f32 %v7311_v1, %v4043_v44  ;;  %v4044_v14 = vmul.f32 %v5352_v48, %v7306_v26  ;;  %5329 = vmatprep.mubr.bf16.mxu0 %v4090_v6 }
 0x3c7   : > { %v4069_v23 = vadd.f32 %v7311_v1, %v4046_v30  ;;  %5330 = vmatmul.mubr.bf16.gmra.mrb[48].mxu0 %v4091_v36  ;;  %v4084_v19 = vmax.f32 %v4068_v22, 0.0 }
 0x3c8   : > { %v4067_v28 = vadd.f32 %v7311_v1, %v4044_v14  ;;  %v4082_v52 = vmax.f32 %v4066_v32, 0.0 }
 0x3c9   : > { %v4085_v38 = vmax.f32 %v4069_v23, 0.0 }
 0x3ca   : > { %v4083_v45 = vmax.f32 %v4067_v28, 0.0 }
 0x3cb   : > { %v4093_v18 = vpack.c.bf16 %v4085_v38, %v4084_v19 }
 0x3cc   : > { %v4092_v11 = vpack.c.bf16 %v4083_v45, %v4082_v52  ;;  %v7630_v52 = vld [vmem:[#allocation30_spill] sm:$0xff] }
 0x3ce   : > { %5333 = vmatprep.mubr.bf16.mxu0 %v4092_v11  ;;  %v7631_v11 = vld [vmem:[#allocation28_spill] sm:$0xff] }
 0x3cf   : > { %5334 = vmatmul.mubr.bf16.gmra.mrb[52].mxu0 %v4093_v18 }
 0x48a   : > { %v5323_v26 = vpop.f32.mrb[40].mxu0 }
 0x48b   : > { %v4264_v1 = vmul.f32 %v5323_v26, %v7352_v24  ;;  %v4192_v13 = vpop.f32.mrb[41].mxu0 }
 0x48c   : > { %v4262_v27 = vmul.f32 %v7352_v24, %v4192_v13  ;;  %v5324_v41 = vpop.f32.mrb[42].mxu0 }
 0x48d   : > { %v4287_v62 = vadd.f32 %v7357_v37, %v4264_v1  ;;  %v4265_v43 = vmul.f32 %v5324_v41, %v7352_v24  ;;  %v4195_v0 = vpop.f32.mrb[43].mxu0 }
 0x48e   : > { %v4285_v54 = vadd.f32 %v7357_v37, %v4262_v27  ;;  %v4263_v55 = vmul.f32 %v7352_v24, %v4195_v0  ;;  %v7632_v27 = vld [vmem:[#allocation31_spill] sm:$0xff] }
 0x48f   : > { %v4303_v17 = vadd.f32 %v4287_v62, %v7621_v8  ;;  %v4288_v59 = vadd.f32 %v7357_v37, %v4265_v43  ;;  %v7633_v43 = vld [vmem:[#allocation29_spill] sm:$0xff] }
 0x490   : > { %v4301_v31 = vadd.f32 %v4285_v54, %v7622_v40  ;;  %v4286_v46 = vadd.f32 %v7357_v37, %v4263_v55 }
 0x491   : > { %v4319_v16 = vmax.f32 %v4303_v17, 0.0  ;;  %v4304_v3 = vadd.f32 %v4288_v59, %v7623_v9 }
 0x492   : > { %v4317_v49 = vmax.f32 %v4301_v31, 0.0  ;;  %v4302_v51 = vadd.f32 %v4286_v46, %v7624_v25  ;;  %v5327_v4 = vpop.f32.mrb[44].mxu0  ;;  %v7634_v25 = vld [vmem:[#allocation34_spill] sm:$0xff] }
 0x493   : > { %4335 = vst [vmem:[%s6587_s12 + $0x10] sm:$0xff] %v4319_v16  ;;  %v4320_v57 = vmax.f32 %v4304_v3, 0.0  ;;  %v4268_v5 = vmul.f32 %v5327_v4, %v7352_v24  ;;  %v4208_v29 = vpop.f32.mrb[45].mxu0 }
 0x494   : > { %4333 = vst [vmem:[%s6587_s12] sm:$0xff] %v4317_v49  ;;  %v4318_v47 = vmax.f32 %v4302_v51, 0.0  ;;  %v4266_v15 = vmul.f32 %v7352_v24, %v4208_v29  ;;  %v5328_v56 = vpop.f32.mrb[46].mxu0 }
 0x495   : > { %4336 = vst [vmem:[%s6587_s12 + $0x18] sm:$0xff] %v4320_v57  ;;  %v4291_v20 = vadd.f32 %v7357_v37, %v4268_v5  ;;  %v4269_v10 = vmul.f32 %v5328_v56, %v7352_v24  ;;  %v4211_v34 = vpop.f32.mrb[47].mxu0  ;;  %v7635_v57 = vld [vmem:[#allocation32_spill] sm:$0xff] }
 0x496   : > { %4334 = vst [vmem:[%s6587_s12 + $0x8] sm:$0xff] %v4318_v47  ;;  %v4289_v50 = vadd.f32 %v7357_v37, %v4266_v15  ;;  %v4267_v12 = vmul.f32 %v7352_v24, %v4211_v34  ;;  %v7637_v15 = vld [vmem:[#allocation35_spill] sm:$0xff] }
 0x497   : > { %v4307_v7 = vadd.f32 %v4291_v20, %v7625_v33  ;;  %v4292_v39 = vadd.f32 %v7357_v37, %v4269_v10  ;;  %v7638_v10 = vld [vmem:[#allocation33_spill] sm:$0xff] }
 0x498   : > { %v4305_v61 = vadd.f32 %v4289_v50, %v7626_v21  ;;  %v4290_v35 = vadd.f32 %v7357_v37, %v4267_v12 }
 0x499   : > { %v4323_v60 = vmax.f32 %v4307_v7, 0.0  ;;  %v4308_v2 = vadd.f32 %v4292_v39, %v7627_v42 }
 0x49a   : > { %v4321_v63 = vmax.f32 %v4305_v61, 0.0  ;;  %v4306_v58 = vadd.f32 %v4290_v35, %v7628_v53  ;;  %v5331_v36 = vpop.f32.mrb[48].mxu0 }
 0x49b   : > { %4339 = vst [vmem:[%s6587_s12 + $0x30] sm:$0xff] %v4323_v60  ;;  %v4324_v44 = vmax.f32 %v4308_v2, 0.0  ;;  %v4272_v48 = vmul.f32 %v5331_v36, %v7352_v24  ;;  %v4224_v6 = vpop.f32.mrb[49].mxu0 }
 0x49c   : > { %4337 = vst [vmem:[%s6587_s12 + $0x20] sm:$0xff] %v4321_v63  ;;  %v4322_v22 = vmax.f32 %v4306_v58, 0.0  ;;  %v4270_v30 = vmul.f32 %v7352_v24, %v4224_v6  ;;  %v5332_v32 = vpop.f32.mrb[50].mxu0 }
 0x49d   : > { %4340 = vst [vmem:[%s6587_s12 + $0x38] sm:$0xff] %v4324_v44  ;;  %v4295_v14 = vadd.f32 %v7357_v37, %v4272_v48  ;;  %v4273_v23 = vmul.f32 %v5332_v32, %v7352_v24  ;;  %v4227_v28 = vpop.f32.mrb[51].mxu0 }
 0x49e   : > { %4338 = vst [vmem:[%s6587_s12 + $0x28] sm:$0xff] %v4322_v22  ;;  %v4293_v19 = vadd.f32 %v7357_v37, %v4270_v30  ;;  %v4271_v38 = vmul.f32 %v7352_v24, %v4227_v28 }
 0x49f   : > { %v4311_v45 = vadd.f32 %v4295_v14, %v7630_v52  ;;  %v4296_v18 = vadd.f32 %v7357_v37, %v4273_v23 }
 0x4a0   : > { %v4309_v26 = vadd.f32 %v4293_v19, %v7631_v11  ;;  %v4294_v1 = vadd.f32 %v7357_v37, %v4271_v38 }
 0x4a1   : > { %v4327_v13 = vmax.f32 %v4311_v45, 0.0  ;;  %v4312_v41 = vadd.f32 %v4296_v18, %v7632_v27 }
 0x4a2   : > { %v4325_v62 = vmax.f32 %v4309_v26, 0.0  ;;  %v4310_v0 = vadd.f32 %v4294_v1, %v7633_v43  ;;  %v5335_v54 = vpop.f32.mrb[52].mxu0 }
 0x4a3   : > { %4343 = vst [vmem:[%s6587_s12 + $0x50] sm:$0xff] %v4327_v13  ;;  %v4328_v55 = vmax.f32 %v4312_v41, 0.0  ;;  %v4276_v8 = vmul.f32 %v5335_v54, %v7352_v24  ;;  %v4240_v17 = vpop.f32.mrb[53].mxu0 }
 0x4a4   : > { %4341 = vst [vmem:[%s6587_s12 + $0x40] sm:$0xff] %v4325_v62  ;;  %v4326_v59 = vmax.f32 %v4310_v0, 0.0  ;;  %v4274_v40 = vmul.f32 %v7352_v24, %v4240_v17  ;;  %v5336_v31 = vpop.f32.mrb[54].mxu0 }
 0x4a5   : > { %4344 = vst [vmem:[%s6587_s12 + $0x58] sm:$0xff] %v4328_v55  ;;  %v4299_v46 = vadd.f32 %v7357_v37, %v4276_v8  ;;  %v4277_v16 = vmul.f32 %v5336_v31, %v7352_v24  ;;  %v4243_v9 = vpop.f32.mrb[55].mxu0 }
 0x4a6   : > { %4342 = vst [vmem:[%s6587_s12 + $0x48] sm:$0xff] %v4326_v59  ;;  %v4297_v3 = vadd.f32 %v7357_v37, %v4274_v40  ;;  %v4275_v49 = vmul.f32 %v7352_v24, %v4243_v9 }
 0x4a7   : > { %v4315_v51 = vadd.f32 %v4299_v46, %v7634_v25  ;;  %v4300_v4 = vadd.f32 %v7357_v37, %v4277_v16 }
 0x4a8   : > { %v4313_v5 = vadd.f32 %v4297_v3, %v7635_v57  ;;  %v4298_v29 = vadd.f32 %v7357_v37, %v4275_v49 }
 0x4a9   : > { %v4331_v47 = vmax.f32 %v4315_v51, 0.0  ;;  %v4316_v56 = vadd.f32 %v4300_v4, %v7637_v15 }
 0x4aa   : > { %v4329_v20 = vmax.f32 %v4313_v5, 0.0  ;;  %v4314_v24 = vadd.f32 %v4298_v29, %v7638_v10 }
 0x4ab   : > { %4347 = vst [vmem:[%s6587_s12 + $0x70] sm:$0xff] %v4331_v47  ;;  %v4332_v34 = vmax.f32 %v4316_v56, 0.0 }
 0x4ac   : > { %4345 = vst [vmem:[%s6587_s12 + $0x60] sm:$0xff] %v4329_v20  ;;  %v4330_v37 = vmax.f32 %v4314_v24, 0.0 }
 0x4ad   : > { %4348 = vst [vmem:[%s6587_s12 + $0x78] sm:$0xff] %v4332_v34 }
 0x4ae   : > { %4346 = vst [vmem:[%s6587_s12 + $0x68] sm:$0xff] %v4330_v37 }
 0x4af   : > { %5859 = shalt.err (!%p5856_p0)
}
 0x4b0   : > { %s5860_s4 = scalar_lea.hbm %s7426_s30, 2048  ;;  %s5864_s29 = scalar_lea.hbm %s7639_s10, 8192 }
 0x4b1   : > { %p5861_p1 = scmp.ne.s32.totalorder %s7426_s30, %s5860_s4  ;;  %p5865_p2 = scmp.lt.u32.totalorder %s7426_s30, %s7639_s10 }
 0x4b2   : > { %p5866_p9 = scmp.lt.u32.totalorder %s5864_s29, %s5860_s4  ;;  %p5868_p13 = scmp.lt.u32.totalorder %s5860_s4, %s7426_s30 }
 0x4b3   : > { %p5862_p11 = pnand %p5861_p1, %p7640_p6 }
 0x4b4   : > { %p5867_p5 = por %p5866_p9, %p5865_p2 }
 0x4b5   : > { %p5863_p10 = pneg %p5862_p11 }
 0x4b6   : > { %p5869_p8 = por %p5868_p13, %p5867_p5 }
 0x4b8   : > { %p5870_p12 = pnand %p5869_p8, %p5863_p10 }
 0x4ba   : > { %5873 = shalt.err (!%p5870_p12)
}
 0x4bb   : > { %s5990_s26 = smov 128   ;;  %s5991_s3 = smov 8  }
 0x4bc   : > { %5479 = dma.vmem_to_hbm [thread:$0]  (%p7640_p6), %s7428_s11, 2048, %s7426_s30, %s7435_s16, %s5990_s26, %s5990_s26, %s5991_s3  }
 0x4bd PF: > { %s7641_s5 = sld [smem:[#allocation16_spill]]  ;;  %s7642_s27 = sld [smem:[#allocation19_spill]] }
 0x4be   : > { %p5506_p4 = scmp.ge.s32.totalorder %s5976_s23, 2 }
 0x4c3   : > { %s4381_s6 = sand.u32 1, %s7641_s5   ;;  %p7643_p7 = scmp.ne.s32.totalorder %s7642_s27, 0 }
 0x4c4   : > { %s4382_s1 = scalar_lea.sflag [#allocation5], %s4381_s6 }
 0x4c5   : > { %p5496_p3 = pnand %p5506_p4, %p7643_p7 }
 0x4c7   : > { %5931 = dma.done.wait (!%p5496_p3), %s4382_s1, 2048  }
 0x4c8   : > { %5933 = vsyncadd (!%p5496_p3), %s4382_s1, 4294965248  ;;  %s28_s23 = sadd.s32 1, %s5976_s23   ;;  %s7644_s13 = smov %s5940_s14 }
 0x4c9   : > { %p25_p0 = scmp.ge.s32.totalorder %s28_s23, 6   ;;  %s7645_s14 = smov %s5944_s15 }
 0x4ca   : > { %s7646_s15 = smov %s6254_s9  ;;  %s7647_s16 = smov %s5952_s17 }
 0x4cb   : > { %s7648_s17 = smov %s5956_s18  ;;  %s7649_s18 = smov %s6249_s25 }
 0x4cc   : > { %s7650_s19 = smov %s5968_s21  ;;  %s7651_s20 = smov %s5972_s22 }
 0x4cd   : > { %s7652_s21 = smov %s7655_s8  ;;  %s7653_s22 = smov %s7659_s24 }
 0x4ce   :  { %27 = sbr.rel (!%p25_p0) target bundleno = 21 (0x15), region = 139 }
 0x4d5   :  { %4387 = vsyncpa [#allocation4], 1 }
 0x4d6   :  { %4389 = vsyncpa [#allocation4 + $0x1], 1 }
 0x4d7   :  { %4390 = vsyncpa [#allocation7], 1 }
 0x4d8   :  { %4391 = vsyncpa [#allocation10], 1 }
 0x4d9   :  { %4392 = vsyncpa [#allocation5], 1 }
 0x4da   :  { %4394 = vsyncpa [#allocation5 + $0x1], 1 }

</bundles_post_ra>
